<compile_context>
chip_gen: v7x
topology: tpu7x:2x2x1
jax: 0.10.0
libtpu: 0.0.40
codegen_flags: <defaults>
</compile_context>

<pallas_src>
import jax
import jax.numpy as jnp
from jax import lax
from jax.experimental import pallas as pl
from jax.experimental.pallas import tpu as pltpu


def rcab_kernel(x_ref, a1_ref, b1_ref, a2_ref, b2_ref,
                wdu1_ref, bdu1_ref, wdu2_ref, bdu2_ref,
                out_ref, pad_ref):
    # x_ref    : (Bt, H, W*C) f32    lane-dense input rows (channels folded)
    # a1/a2    : (K, W*C, W*C) bf16  row-banded conv weights (kw taps + W pad baked in)
    # b1/b2    : (1, W*C) f32        conv biases, tiled over W
    # wdu1     : (C, Cr) f32,  bdu1: (1, Cr) f32      CA squeeze
    # wdu2     : (Cr, W*C) f32, bdu2: (1, W*C) f32    CA excite, pre-tiled over W
    # out_ref  : (Bt, H, W*C) f32
    # pad_ref  : (Bt, H + K - 1, W*C) f32  VMEM scratch with a zero row-halo
    f32, bf16 = jnp.float32, jnp.bfloat16
    Bt, H, WC = out_ref.shape
    K = a1_ref.shape[0]
    C = wdu1_ref.shape[0]
    W = WC // C
    Hp = H + K - 1
    P = K // 2
    M = Bt * H

    # Zero only the row-halos (full-lane stores); the interior is fully
    # overwritten every step, so this stays megacore-safe without pl.when.
    pad_ref[:, 0:P, :] = jnp.zeros((Bt, P, WC), f32)
    pad_ref[:, H + P:Hp, :] = jnp.zeros((Bt, Hp - H - P, WC), f32)

    x = x_ref[...]                                           # (Bt, H, WC) f32

    def conv3x3(a_ref, b_ref):
        # Row-banded SAME conv: one (M, WC)x(WC, WC) bf16 MXU matmul per kh
        # tap, f32 accumulation.  kw taps / W-padding live inside the banded
        # weight -> no im2col, and every operand/result is lane-dense (N=WC).
        acc = jnp.broadcast_to(b_ref[...], (M, WC))
        for kh in range(K):
            rows = pad_ref[:, kh:kh + H, :].reshape(M, WC).astype(bf16)
            acc = acc + jnp.dot(rows, a_ref[kh],
                                preferred_element_type=f32)
        return acc                                           # (M, WC) f32

    # ---- conv1 (3x3, SAME) + bias + ReLU ----
    pad_ref[:, P:H + P, :] = x
    h1 = jnp.maximum(conv3x3(a1_ref, b1_ref), 0.0)           # (M, WC)

    # ---- conv2 (3x3, SAME) + bias ----
    pad_ref[:, P:H + P, :] = h1.reshape(Bt, H, WC)
    h2 = conv3x3(a2_ref, b2_ref).reshape(Bt, H, WC)          # (Bt, H, WC) f32

    # ---- channel attention (CALayer) ----
    # Global average pool in the lane-folded layout: sublane-reduce over H,
    # then fold the W lane-groups.  All tiny -> keep it on VPU/XLU instead of
    # paying MXU push/drain latency for (Bt,32)x(32,4)-sized matmuls.
    row_sum = jnp.sum(h2, axis=1)                            # (Bt, WC)
    y = jnp.zeros((Bt, C), f32)
    for w in range(W):
        y = y + row_sum[:, w * C:(w + 1) * C]
    y = y * (1.0 / (H * W))                                  # (Bt, C)

    z = jnp.maximum(
        jnp.sum(y[:, :, None] * wdu1_ref[...][None, :, :], axis=1)
        + bdu1_ref[...], 0.0)                                # (Bt, Cr)
    s = jax.nn.sigmoid(
        jnp.sum(z[:, :, None] * wdu2_ref[...][None, :, :], axis=1)
        + bdu2_ref[...])                                     # (Bt, WC), gate tiled over W

    # ---- gate + residual (f32, lane-dense full-width store) ----
    out_ref[...] = (h2 * s[:, None, :] + x).astype(out_ref.dtype)


def band_conv_weights(w_hwio, width):
    """(K, K, C, C) HWIO conv weight -> (K, W*C, W*C) row-banded matrices.

    A[kh, win*C + cin, wout*C + cout] = w[kh, kw, cin, cout], kw = win - wout + K//2
    (zero outside [0, K)), which bakes the kw taps and SAME zero-padding along W
    into an ordinary lane-dense matmul weight.
    """
    K, _, C, _ = w_hwio.shape
    win = jnp.arange(width)[:, None]
    wout = jnp.arange(width)[None, :]
    kw = win - wout + K // 2                                 # (W, W)
    valid = (kw >= 0) & (kw < K)
    taps = w_hwio[:, jnp.clip(kw, 0, K - 1), :, :]           # (K, W, W, C, C)
    taps = taps * valid[None, :, :, None, None].astype(w_hwio.dtype)
    a = jnp.transpose(taps, (0, 1, 3, 2, 4))                 # (K, W, C, W, C)
    return a.reshape(K, width * C, width * C)


def rcab_forward(x_nhwc, params, block_batch=None):
    """x_nhwc: (B, H, W, C) float32.  params: dict of weights (HWIO / (Cin,Cout))."""
    B, H, W, C = x_nhwc.shape
    K = params["w1"].shape[0]
    Cr = params["wdu1"].shape[1]
    WC = W * C

    if block_batch is None:
        # Largest per-step batch that still leaves >= 2 grid steps, so the
        # "parallel" batch axis can be sharded across v7x's two TensorCores
        # and the software pipeline has something to overlap.
        divisors = [d for d in range(1, B + 1) if B % d == 0]
        cands = [d for d in divisors if B // d >= 2]
        block_batch = max(cands) if cands else 1
    Bt = block_batch
    assert B % Bt == 0, "batch must be divisible by block_batch"

    # Conv weights -> row-banded bf16 matrices (constant index map in the grid
    # => fetched into VMEM once, not per step).
    a1 = band_conv_weights(params["w1"], W).astype(jnp.bfloat16)
    a2 = band_conv_weights(params["w2"], W).astype(jnp.bfloat16)
    # Biases / CA excite pre-tiled over W so they are already lane-folded.
    b1t = jnp.tile(params["b1"], (1, W))          # (1, WC)
    b2t = jnp.tile(params["b2"], (1, W))          # (1, WC)
    wdu2t = jnp.tile(params["wdu2"], (1, W))      # (Cr, WC)
    bdu2t = jnp.tile(params["bdu2"], (1, W))      # (1, WC)

    # Lane-dense HBM layout: pure metadata reshape outside the kernel.
    x_flat = x_nhwc.reshape(B, H, WC)

    full = lambda shape: pl.BlockSpec(shape, lambda g: (0,) * len(shape))

    out_flat = pl.pallas_call(
        rcab_kernel,
        out_shape=jax.ShapeDtypeStruct((B, H, WC), jnp.float32),
        grid_spec=pltpu.PrefetchScalarGridSpec(
            num_scalar_prefetch=0,
            grid=(B // Bt,),
            in_specs=[
                pl.BlockSpec((Bt, H, WC), lambda g: (g, 0, 0)),   # x (lane-dense)
                full((K, WC, WC)),      # a1 (banded conv1 weight)
                full((1, WC)),          # b1 (tiled)
                full((K, WC, WC)),      # a2 (banded conv2 weight)
                full((1, WC)),          # b2 (tiled)
                full((C, Cr)),          # wdu1
                full((1, Cr)),          # bdu1
                full((Cr, WC)),         # wdu2 (tiled)
                full((1, WC)),          # bdu2 (tiled)
            ],
            out_specs=pl.BlockSpec((Bt, H, WC), lambda g: (g, 0, 0)),
            scratch_shapes=[
                pltpu.VMEM((Bt, H + K - 1, WC), jnp.float32),     # row-halo scratch
            ],
        ),
        compiler_params=pltpu.CompilerParams(
            dimension_semantics=("parallel",),      # batch axis -> megacore on v7x
            # Above the 32 MiB default (v5e/v6e tile growth), below v7x's
            # 64 MiB physical VMEM with headroom.
            vmem_limit_bytes=48 * 1024 * 1024,
        ),
    )(x_flat, a1, b1t, a2, b2t,
      params["wdu1"], params["bdu1"], wdu2t, bdu2t)

    return out_flat.reshape(B, H, W, C)


def rcab_reference(x_nhwc, params):
    """Pure-JAX reference matching the PyTorch RCAB forward (NHWC, f32)."""
    dn = ("NHWC", "HWIO", "NHWC")
    h1 = lax.conv_general_dilated(x_nhwc, params["w1"], (1, 1), "SAME",
                                  dimension_numbers=dn)
    h1 = jnp.maximum(h1 + params["b1"].reshape(1, 1, 1, -1), 0.0)
    h2 = lax.conv_general_dilated(h1, params["w2"], (1, 1), "SAME",
                                  dimension_numbers=dn)
    h2 = h2 + params["b2"].reshape(1, 1, 1, -1)
    y = jnp.mean(h2, axis=(1, 2), keepdims=True)                     # (B,1,1,C)
    z = jnp.maximum(jnp.einsum("bijc,cr->bijr", y, params["wdu1"])
                    + params["bdu1"].reshape(1, 1, 1, -1), 0.0)
    s = jax.nn.sigmoid(jnp.einsum("bijr,rc->bijc", z, params["wdu2"])
                       + params["bdu2"].reshape(1, 1, 1, -1))
    return h2 * s + x_nhwc


def make_params(key, n_feat, kernel_size, reduction):
    """Deterministic synthetic weights, shapes matching the PyTorch module."""
    cr = n_feat // reduction
    ks = jax.random.split(key, 8)
    scale_conv = 1.0 / (n_feat * kernel_size * kernel_size) ** 0.5
    scale_1x1a = 1.0 / n_feat ** 0.5
    scale_1x1b = 1.0 / max(cr, 1) ** 0.5
    return {
        # conv weights stored as HWIO (PyTorch is OIHW; transpose is pure glue)
        "w1": jax.random.normal(ks[0], (kernel_size, kernel_size, n_feat, n_feat),
                                jnp.float32) * scale_conv,
        "b1": jax.random.normal(ks[1], (1, n_feat), jnp.float32) * 0.01,
        "w2": jax.random.normal(ks[2], (kernel_size, kernel_size, n_feat, n_feat),
                                jnp.float32) * scale_conv,
        "b2": jax.random.normal(ks[3], (1, n_feat), jnp.float32) * 0.01,
        # CALayer 1x1 convs stored as (Cin, Cout) matmul weights
        "wdu1": jax.random.normal(ks[4], (n_feat, cr), jnp.float32) * scale_1x1a,
        "bdu1": jax.random.normal(ks[5], (1, cr), jnp.float32) * 0.01,
        "wdu2": jax.random.normal(ks[6], (cr, n_feat), jnp.float32) * scale_1x1b,
        "bdu2": jax.random.normal(ks[7], (1, n_feat), jnp.float32) * 0.01,
    }


if __name__ == "__main__":
    # Module-consistent small shapes: batch=2, n_feat=32, H=W=16,
    # kernel_size=3, reduction=8  (channel // reduction = 4).
    B, C, H, W = 2, 32, 16, 16
    kernel_size, reduction = 3, 8

    key = jax.random.PRNGKey(0)
    kx, kp = jax.random.split(key)

    # PyTorch input is NCHW (B, C, H, W); the kernel works in (lane-folded) NHWC.
    x_nchw = jax.random.normal(kx, (B, C, H, W), jnp.float32)
    x_nhwc = jnp.transpose(x_nchw, (0, 2, 3, 1))

    params = make_params(kp, C, kernel_size, reduction)

    fwd = jax.jit(lambda xx: rcab_forward(xx, params))
    out = jax.block_until_ready(fwd(x_nhwc))

    ref = rcab_reference(x_nhwc, params)
    assert out.shape == (B, H, W, C)
    max_err = float(jnp.max(jnp.abs(out - ref)))
    # bf16 MXU operands with f32 accumulation -> looser tolerance than pure f32.
    assert jnp.allclose(out, ref, rtol=4e-2, atol=4e-2), max_err

    print("KERNEL_OK")
</pallas_src>

<mosaic_0001>
module attributes {stable_mosaic.version = 11 : i64} {
  func.func @rcab_kernel(%arg0: i32, %arg1: memref<1x16x512xf32, #tpu.memory_space<vmem>>, %arg2: memref<3x512x512xbf16, #tpu.memory_space<vmem>>, %arg3: memref<1x512xf32, #tpu.memory_space<vmem>>, %arg4: memref<3x512x512xbf16, #tpu.memory_space<vmem>>, %arg5: memref<1x512xf32, #tpu.memory_space<vmem>>, %arg6: memref<32x4xf32, #tpu.memory_space<vmem>>, %arg7: memref<1x4xf32, #tpu.memory_space<vmem>>, %arg8: memref<4x512xf32, #tpu.memory_space<vmem>>, %arg9: memref<1x512xf32, #tpu.memory_space<vmem>>, %arg10: memref<1x16x512xf32, #tpu.memory_space<vmem>>, %arg11: memref<1x18x512xf32, #tpu.memory_space<vmem>>) attributes {dimension_semantics = [#tpu.dimension_semantics<parallel>], iteration_bounds = array<i64: 2>, scalar_prefetch = 0 : i64, scratch_operands = 1 : i64, tpu.core_type = #tpu.core_type<tc>, window_params = [{transform_indices = @transform_0, window_bounds = array<i64: 1, 16, 512>}, {pipeline_mode = #tpu.pipeline_mode<synchronous>, transform_indices = @transform_1, window_bounds = array<i64: 3, 512, 512>}, {pipeline_mode = #tpu.pipeline_mode<synchronous>, transform_indices = @transform_2, window_bounds = array<i64: 1, 512>}, {pipeline_mode = #tpu.pipeline_mode<synchronous>, transform_indices = @transform_3, window_bounds = array<i64: 3, 512, 512>}, {pipeline_mode = #tpu.pipeline_mode<synchronous>, transform_indices = @transform_4, window_bounds = array<i64: 1, 512>}, {pipeline_mode = #tpu.pipeline_mode<synchronous>, transform_indices = @transform_5, window_bounds = array<i64: 32, 4>}, {pipeline_mode = #tpu.pipeline_mode<synchronous>, transform_indices = @transform_6, window_bounds = array<i64: 1, 4>}, {pipeline_mode = #tpu.pipeline_mode<synchronous>, transform_indices = @transform_7, window_bounds = array<i64: 4, 512>}, {pipeline_mode = #tpu.pipeline_mode<synchronous>, transform_indices = @transform_8, window_bounds = array<i64: 1, 512>}, {transform_indices = @transform_9, window_bounds = array<i64: 1, 16, 512>}]} {
    %cst = arith.constant 0.000000e+00 : f32
    %0 = vector.broadcast %cst : f32 to vector<1x1x512xf32>
    %c0 = arith.constant 0 : index
    %c0_0 = arith.constant 0 : index
    %c0_1 = arith.constant 0 : index
    %1 = vector.load %arg11[%c0, %c0_0, %c0_1] : memref<1x18x512xf32, #tpu.memory_space<vmem>>, vector<1x1x512xf32>
    tpu.vector_store %arg11[%c0, %c0_0, %c0_1], %0 {strides = array<i32>} : memref<1x18x512xf32, #tpu.memory_space<vmem>>, vector<1x1x512xf32>,
    %cst_2 = arith.constant 0.000000e+00 : f32
    %2 = vector.broadcast %cst_2 : f32 to vector<1x1x512xf32>
    %c0_3 = arith.constant 0 : index
    %c17 = arith.constant 17 : index
    %c0_4 = arith.constant 0 : index
    %3 = vector.load %arg11[%c0_3, %c17, %c0_4] : memref<1x18x512xf32, #tpu.memory_space<vmem>>, vector<1x1x512xf32>
    tpu.vector_store %arg11[%c0_3, %c17, %c0_4], %2 {strides = array<i32>} : memref<1x18x512xf32, #tpu.memory_space<vmem>>, vector<1x1x512xf32>,
    %c0_5 = arith.constant 0 : index
    %c0_6 = arith.constant 0 : index
    %c0_7 = arith.constant 0 : index
    %4 = vector.load %arg1[%c0_5, %c0_6, %c0_7] : memref<1x16x512xf32, #tpu.memory_space<vmem>>, vector<1x16x512xf32>
    %c0_8 = arith.constant 0 : index
    %c1 = arith.constant 1 : index
    %c0_9 = arith.constant 0 : index
    %5 = vector.load %arg11[%c0_8, %c1, %c0_9] : memref<1x18x512xf32, #tpu.memory_space<vmem>>, vector<1x16x512xf32>
    tpu.vector_store %arg11[%c0_8, %c1, %c0_9], %4 {strides = array<i32>} : memref<1x18x512xf32, #tpu.memory_space<vmem>>, vector<1x16x512xf32>,
    %c0_10 = arith.constant 0 : index
    %c0_11 = arith.constant 0 : index
    %6 = vector.load %arg3[%c0_10, %c0_11] : memref<1x512xf32, #tpu.memory_space<vmem>>, vector<1x512xf32>
    %7 = vector.shape_cast %6 : vector<1x512xf32> to vector<1x512xf32>
    %8 = vector.broadcast %7 : vector<1x512xf32> to vector<16x512xf32>
    %c0_12 = arith.constant 0 : index
    %c0_13 = arith.constant 0 : index
    %c0_14 = arith.constant 0 : index
    %9 = vector.load %arg11[%c0_12, %c0_13, %c0_14] : memref<1x18x512xf32, #tpu.memory_space<vmem>>, vector<1x16x512xf32>
    %10 = vector.shape_cast %9 : vector<1x16x512xf32> to vector<16x512xf32>
    %11 = arith.truncf %10 : vector<16x512xf32> to vector<16x512xbf16>
    %c0_15 = arith.constant 0 : index
    %c0_16 = arith.constant 0 : index
    %c0_17 = arith.constant 0 : index
    %12 = vector.load %arg2[%c0_15, %c0_16, %c0_17] : memref<3x512x512xbf16, #tpu.memory_space<vmem>>, vector<1x512x512xbf16>
    %13 = vector.shape_cast %12 : vector<1x512x512xbf16> to vector<512x512xbf16>
    %cst_18 = arith.constant dense<0.000000e+00> : vector<16x512xf32>
    %14 = tpu.matmul %11, %13, %cst_18 {dimension_numbers = #tpu.dot_dimension_numbers<[1], [0], [0], [1], [0, 0, 1, 1], [], []>} : vector<16x512xbf16>, vector<512x512xbf16>, vector<16x512xf32> -> vector<16x512xf32>
    %15 = arith.addf %8, %14 : vector<16x512xf32>
    %c0_19 = arith.constant 0 : index
    %c1_20 = arith.constant 1 : index
    %c0_21 = arith.constant 0 : index
    %16 = vector.load %arg11[%c0_19, %c1_20, %c0_21] : memref<1x18x512xf32, #tpu.memory_space<vmem>>, vector<1x16x512xf32>
    %17 = vector.shape_cast %16 : vector<1x16x512xf32> to vector<16x512xf32>
    %18 = arith.truncf %17 : vector<16x512xf32> to vector<16x512xbf16>
    %c1_22 = arith.constant 1 : index
    %c0_23 = arith.constant 0 : index
    %c0_24 = arith.constant 0 : index
    %19 = vector.load %arg2[%c1_22, %c0_23, %c0_24] : memref<3x512x512xbf16, #tpu.memory_space<vmem>>, vector<1x512x512xbf16>
    %20 = vector.shape_cast %19 : vector<1x512x512xbf16> to vector<512x512xbf16>
    %cst_25 = arith.constant dense<0.000000e+00> : vector<16x512xf32>
    %21 = tpu.matmul %18, %20, %cst_25 {dimension_numbers = #tpu.dot_dimension_numbers<[1], [0], [0], [1], [0, 0, 1, 1], [], []>} : vector<16x512xbf16>, vector<512x512xbf16>, vector<16x512xf32> -> vector<16x512xf32>
    %22 = arith.addf %15, %21 : vector<16x512xf32>
    %c0_26 = arith.constant 0 : index
    %c2 = arith.constant 2 : index
    %c0_27 = arith.constant 0 : index
    %23 = vector.load %arg11[%c0_26, %c2, %c0_27] : memref<1x18x512xf32, #tpu.memory_space<vmem>>, vector<1x16x512xf32>
    %24 = vector.shape_cast %23 : vector<1x16x512xf32> to vector<16x512xf32>
    %25 = arith.truncf %24 : vector<16x512xf32> to vector<16x512xbf16>
    %c2_28 = arith.constant 2 : index
    %c0_29 = arith.constant 0 : index
    %c0_30 = arith.constant 0 : index
    %26 = vector.load %arg2[%c2_28, %c0_29, %c0_30] : memref<3x512x512xbf16, #tpu.memory_space<vmem>>, vector<1x512x512xbf16>
    %27 = vector.shape_cast %26 : vector<1x512x512xbf16> to vector<512x512xbf16>
    %cst_31 = arith.constant dense<0.000000e+00> : vector<16x512xf32>
    %28 = tpu.matmul %25, %27, %cst_31 {dimension_numbers = #tpu.dot_dimension_numbers<[1], [0], [0], [1], [0, 0, 1, 1], [], []>} : vector<16x512xbf16>, vector<512x512xbf16>, vector<16x512xf32> -> vector<16x512xf32>
    %29 = arith.addf %22, %28 : vector<16x512xf32>
    %cst_32 = arith.constant 0.000000e+00 : f32
    %30 = vector.broadcast %cst_32 : f32 to vector<16x512xf32>
    %31 = arith.maximumf %29, %30 : vector<16x512xf32>
    %32 = vector.shape_cast %31 : vector<16x512xf32> to vector<1x16x512xf32>
    %c0_33 = arith.constant 0 : index
    %c1_34 = arith.constant 1 : index
    %c0_35 = arith.constant 0 : index
    %33 = vector.load %arg11[%c0_33, %c1_34, %c0_35] : memref<1x18x512xf32, #tpu.memory_space<vmem>>, vector<1x16x512xf32>
    tpu.vector_store %arg11[%c0_33, %c1_34, %c0_35], %32 {strides = array<i32>} : memref<1x18x512xf32, #tpu.memory_space<vmem>>, vector<1x16x512xf32>,
    %c0_36 = arith.constant 0 : index
    %c0_37 = arith.constant 0 : index
    %34 = vector.load %arg5[%c0_36, %c0_37] : memref<1x512xf32, #tpu.memory_space<vmem>>, vector<1x512xf32>
    %35 = vector.shape_cast %34 : vector<1x512xf32> to vector<1x512xf32>
    %36 = vector.broadcast %35 : vector<1x512xf32> to vector<16x512xf32>
    %c0_38 = arith.constant 0 : index
    %c0_39 = arith.constant 0 : index
    %c0_40 = arith.constant 0 : index
    %37 = vector.load %arg11[%c0_38, %c0_39, %c0_40] : memref<1x18x512xf32, #tpu.memory_space<vmem>>, vector<1x16x512xf32>
    %38 = vector.shape_cast %37 : vector<1x16x512xf32> to vector<16x512xf32>
    %39 = arith.truncf %38 : vector<16x512xf32> to vector<16x512xbf16>
    %c0_41 = arith.constant 0 : index
    %c0_42 = arith.constant 0 : index
    %c0_43 = arith.constant 0 : index
    %40 = vector.load %arg4[%c0_41, %c0_42, %c0_43] : memref<3x512x512xbf16, #tpu.memory_space<vmem>>, vector<1x512x512xbf16>
    %41 = vector.shape_cast %40 : vector<1x512x512xbf16> to vector<512x512xbf16>
    %cst_44 = arith.constant dense<0.000000e+00> : vector<16x512xf32>
    %42 = tpu.matmul %39, %41, %cst_44 {dimension_numbers = #tpu.dot_dimension_numbers<[1], [0], [0], [1], [0, 0, 1, 1], [], []>} : vector<16x512xbf16>, vector<512x512xbf16>, vector<16x512xf32> -> vector<16x512xf32>
    %43 = arith.addf %36, %42 : vector<16x512xf32>
    %c0_45 = arith.constant 0 : index
    %c1_46 = arith.constant 1 : index
    %c0_47 = arith.constant 0 : index
    %44 = vector.load %arg11[%c0_45, %c1_46, %c0_47] : memref<1x18x512xf32, #tpu.memory_space<vmem>>, vector<1x16x512xf32>
    %45 = vector.shape_cast %44 : vector<1x16x512xf32> to vector<16x512xf32>
    %46 = arith.truncf %45 : vector<16x512xf32> to vector<16x512xbf16>
    %c1_48 = arith.constant 1 : index
    %c0_49 = arith.constant 0 : index
    %c0_50 = arith.constant 0 : index
    %47 = vector.load %arg4[%c1_48, %c0_49, %c0_50] : memref<3x512x512xbf16, #tpu.memory_space<vmem>>, vector<1x512x512xbf16>
    %48 = vector.shape_cast %47 : vector<1x512x512xbf16> to vector<512x512xbf16>
    %cst_51 = arith.constant dense<0.000000e+00> : vector<16x512xf32>
    %49 = tpu.matmul %46, %48, %cst_51 {dimension_numbers = #tpu.dot_dimension_numbers<[1], [0], [0], [1], [0, 0, 1, 1], [], []>} : vector<16x512xbf16>, vector<512x512xbf16>, vector<16x512xf32> -> vector<16x512xf32>
    %50 = arith.addf %43, %49 : vector<16x512xf32>
    %c0_52 = arith.constant 0 : index
    %c2_53 = arith.constant 2 : index
    %c0_54 = arith.constant 0 : index
    %51 = vector.load %arg11[%c0_52, %c2_53, %c0_54] : memref<1x18x512xf32, #tpu.memory_space<vmem>>, vector<1x16x512xf32>
    %52 = vector.shape_cast %51 : vector<1x16x512xf32> to vector<16x512xf32>
    %53 = arith.truncf %52 : vector<16x512xf32> to vector<16x512xbf16>
    %c2_55 = arith.constant 2 : index
    %c0_56 = arith.constant 0 : index
    %c0_57 = arith.constant 0 : index
    %54 = vector.load %arg4[%c2_55, %c0_56, %c0_57] : memref<3x512x512xbf16, #tpu.memory_space<vmem>>, vector<1x512x512xbf16>
    %55 = vector.shape_cast %54 : vector<1x512x512xbf16> to vector<512x512xbf16>
    %cst_58 = arith.constant dense<0.000000e+00> : vector<16x512xf32>
    %56 = tpu.matmul %53, %55, %cst_58 {dimension_numbers = #tpu.dot_dimension_numbers<[1], [0], [0], [1], [0, 0, 1, 1], [], []>} : vector<16x512xbf16>, vector<512x512xbf16>, vector<16x512xf32> -> vector<16x512xf32>
    %57 = arith.addf %50, %56 : vector<16x512xf32>
    %58 = vector.shape_cast %57 : vector<16x512xf32> to vector<1x16x512xf32>
    %cst_59 = arith.constant dense<0.000000e+00> : vector<1x512xf32>
    %59 = vector.multi_reduction <add>, %58, %cst_59 [1] : vector<1x16x512xf32> to vector<1x512xf32>
    %cst_60 = arith.constant 0.000000e+00 : f32
    %60 = vector.broadcast %cst_60 : f32 to vector<1x32xf32>
    %61 = vector.extract_strided_slice %59 {offsets = [0, 0], sizes = [1, 32], strides = [1, 1]} : vector<1x512xf32> to vector<1x32xf32>
    %62 = arith.addf %60, %61 : vector<1x32xf32>
    %63 = vector.extract_strided_slice %59 {offsets = [0, 32], sizes = [1, 32], strides = [1, 1]} : vector<1x512xf32> to vector<1x32xf32>
    %64 = arith.addf %62, %63 : vector<1x32xf32>
    %65 = vector.extract_strided_slice %59 {offsets = [0, 64], sizes = [1, 32], strides = [1, 1]} : vector<1x512xf32> to vector<1x32xf32>
    %66 = arith.addf %64, %65 : vector<1x32xf32>
    %67 = vector.extract_strided_slice %59 {offsets = [0, 96], sizes = [1, 32], strides = [1, 1]} : vector<1x512xf32> to vector<1x32xf32>
    %68 = arith.addf %66, %67 : vector<1x32xf32>
    %69 = vector.extract_strided_slice %59 {offsets = [0, 128], sizes = [1, 32], strides = [1, 1]} : vector<1x512xf32> to vector<1x32xf32>
    %70 = arith.addf %68, %69 : vector<1x32xf32>
    %71 = vector.extract_strided_slice %59 {offsets = [0, 160], sizes = [1, 32], strides = [1, 1]} : vector<1x512xf32> to vector<1x32xf32>
    %72 = arith.addf %70, %71 : vector<1x32xf32>
    %73 = vector.extract_strided_slice %59 {offsets = [0, 192], sizes = [1, 32], strides = [1, 1]} : vector<1x512xf32> to vector<1x32xf32>
    %74 = arith.addf %72, %73 : vector<1x32xf32>
    %75 = vector.extract_strided_slice %59 {offsets = [0, 224], sizes = [1, 32], strides = [1, 1]} : vector<1x512xf32> to vector<1x32xf32>
    %76 = arith.addf %74, %75 : vector<1x32xf32>
    %77 = vector.extract_strided_slice %59 {offsets = [0, 256], sizes = [1, 32], strides = [1, 1]} : vector<1x512xf32> to vector<1x32xf32>
    %78 = arith.addf %76, %77 : vector<1x32xf32>
    %79 = vector.extract_strided_slice %59 {offsets = [0, 288], sizes = [1, 32], strides = [1, 1]} : vector<1x512xf32> to vector<1x32xf32>
    %80 = arith.addf %78, %79 : vector<1x32xf32>
    %81 = vector.extract_strided_slice %59 {offsets = [0, 320], sizes = [1, 32], strides = [1, 1]} : vector<1x512xf32> to vector<1x32xf32>
    %82 = arith.addf %80, %81 : vector<1x32xf32>
    %83 = vector.extract_strided_slice %59 {offsets = [0, 352], sizes = [1, 32], strides = [1, 1]} : vector<1x512xf32> to vector<1x32xf32>
    %84 = arith.addf %82, %83 : vector<1x32xf32>
    %85 = vector.extract_strided_slice %59 {offsets = [0, 384], sizes = [1, 32], strides = [1, 1]} : vector<1x512xf32> to vector<1x32xf32>
    %86 = arith.addf %84, %85 : vector<1x32xf32>
    %87 = vector.extract_strided_slice %59 {offsets = [0, 416], sizes = [1, 32], strides = [1, 1]} : vector<1x512xf32> to vector<1x32xf32>
    %88 = arith.addf %86, %87 : vector<1x32xf32>
    %89 = vector.extract_strided_slice %59 {offsets = [0, 448], sizes = [1, 32], strides = [1, 1]} : vector<1x512xf32> to vector<1x32xf32>
    %90 = arith.addf %88, %89 : vector<1x32xf32>
    %91 = vector.extract_strided_slice %59 {offsets = [0, 480], sizes = [1, 32], strides = [1, 1]} : vector<1x512xf32> to vector<1x32xf32>
    %92 = arith.addf %90, %91 : vector<1x32xf32>
    %cst_61 = arith.constant 3.906250e-03 : f32
    %93 = vector.broadcast %cst_61 : f32 to vector<1x32xf32>
    %94 = arith.mulf %92, %93 : vector<1x32xf32>
    %95 = vector.shape_cast %94 : vector<1x32xf32> to vector<1x32x1xf32>
    %c0_62 = arith.constant 0 : index
    %c0_63 = arith.constant 0 : index
    %96 = vector.load %arg6[%c0_62, %c0_63] : memref<32x4xf32, #tpu.memory_space<vmem>>, vector<32x4xf32>
    %97 = vector.shape_cast %96 : vector<32x4xf32> to vector<1x32x4xf32>
    %98 = vector.broadcast %95 : vector<1x32x1xf32> to vector<1x32x4xf32>
    %99 = arith.mulf %98, %97 : vector<1x32x4xf32>
    %cst_64 = arith.constant dense<0.000000e+00> : vector<1x4xf32>
    %100 = vector.multi_reduction <add>, %99, %cst_64 [1] : vector<1x32x4xf32> to vector<1x4xf32>
    %c0_65 = arith.constant 0 : index
    %c0_66 = arith.constant 0 : index
    %101 = vector.load %arg7[%c0_65, %c0_66] : memref<1x4xf32, #tpu.memory_space<vmem>>, vector<1x4xf32>
    %102 = arith.addf %100, %101 : vector<1x4xf32>
    %cst_67 = arith.constant 0.000000e+00 : f32
    %103 = vector.broadcast %cst_67 : f32 to vector<1x4xf32>
    %104 = arith.maximumf %102, %103 : vector<1x4xf32>
    %105 = vector.shape_cast %104 : vector<1x4xf32> to vector<1x4x1xf32>
    %c0_68 = arith.constant 0 : index
    %c0_69 = arith.constant 0 : index
    %106 = vector.load %arg8[%c0_68, %c0_69] : memref<4x512xf32, #tpu.memory_space<vmem>>, vector<4x512xf32>
    %107 = vector.shape_cast %106 : vector<4x512xf32> to vector<1x4x512xf32>
    %108 = vector.broadcast %105 : vector<1x4x1xf32> to vector<1x4x512xf32>
    %109 = arith.mulf %108, %107 : vector<1x4x512xf32>
    %cst_70 = arith.constant dense<0.000000e+00> : vector<1x512xf32>
    %110 = vector.multi_reduction <add>, %109, %cst_70 [1] : vector<1x4x512xf32> to vector<1x512xf32>
    %c0_71 = arith.constant 0 : index
    %c0_72 = arith.constant 0 : index
    %111 = vector.load %arg9[%c0_71, %c0_72] : memref<1x512xf32, #tpu.memory_space<vmem>>, vector<1x512xf32>
    %112 = arith.addf %110, %111 : vector<1x512xf32>
    %113 = arith.negf %112 : vector<1x512xf32>
    %114 = math.exp %113 : vector<1x512xf32>
    %cst_73 = arith.constant 1.000000e+00 : f32
    %115 = vector.broadcast %cst_73 : f32 to vector<1x512xf32>
    %116 = arith.addf %115, %114 : vector<1x512xf32>
    %117 = arith.divf %115, %116 : vector<1x512xf32>
    %118 = vector.shape_cast %117 : vector<1x512xf32> to vector<1x1x512xf32>
    %119 = vector.broadcast %118 : vector<1x1x512xf32> to vector<1x16x512xf32>
    %120 = arith.mulf %58, %119 : vector<1x16x512xf32>
    %121 = arith.addf %120, %4 : vector<1x16x512xf32>
    %c0_74 = arith.constant 0 : index
    %c0_75 = arith.constant 0 : index
    %c0_76 = arith.constant 0 : index
    %122 = vector.load %arg10[%c0_74, %c0_75, %c0_76] : memref<1x16x512xf32, #tpu.memory_space<vmem>>, vector<1x16x512xf32>
    tpu.vector_store %arg10[%c0_74, %c0_75, %c0_76], %121 {strides = array<i32>} : memref<1x16x512xf32, #tpu.memory_space<vmem>>, vector<1x16x512xf32>,
    return
  }
  func.func @transform_0(%arg0: i32) -> (i32, i32, i32) {
    %c0_i32 = arith.constant 0 : i32
    %c0_i32_0 = arith.constant 0 : i32
    %c0_i32_1 = arith.constant 0 : i32
    return %arg0, %c0_i32, %c0_i32_0 : i32, i32, i32
  }
  func.func @transform_1(%arg0: i32) -> (i32, i32, i32) {
    %c0_i32 = arith.constant 0 : i32
    %c0_i32_0 = arith.constant 0 : i32
    %c0_i32_1 = arith.constant 0 : i32
    %c0_i32_2 = arith.constant 0 : i32
    return %c0_i32, %c0_i32_0, %c0_i32_1 : i32, i32, i32
  }
  func.func @transform_2(%arg0: i32) -> (i32, i32) {
    %c0_i32 = arith.constant 0 : i32
    %c0_i32_0 = arith.constant 0 : i32
    %c0_i32_1 = arith.constant 0 : i32
    return %c0_i32, %c0_i32_0 : i32, i32
  }
  func.func @transform_3(%arg0: i32) -> (i32, i32, i32) {
    %c0_i32 = arith.constant 0 : i32
    %c0_i32_0 = arith.constant 0 : i32
    %c0_i32_1 = arith.constant 0 : i32
    %c0_i32_2 = arith.constant 0 : i32
    return %c0_i32, %c0_i32_0, %c0_i32_1 : i32, i32, i32
  }
  func.func @transform_4(%arg0: i32) -> (i32, i32) {
    %c0_i32 = arith.constant 0 : i32
    %c0_i32_0 = arith.constant 0 : i32
    %c0_i32_1 = arith.constant 0 : i32
    return %c0_i32, %c0_i32_0 : i32, i32
  }
  func.func @transform_5(%arg0: i32) -> (i32, i32) {
    %c0_i32 = arith.constant 0 : i32
    %c0_i32_0 = arith.constant 0 : i32
    %c0_i32_1 = arith.constant 0 : i32
    return %c0_i32, %c0_i32_0 : i32, i32
  }
  func.func @transform_6(%arg0: i32) -> (i32, i32) {
    %c0_i32 = arith.constant 0 : i32
    %c0_i32_0 = arith.constant 0 : i32
    %c0_i32_1 = arith.constant 0 : i32
    return %c0_i32, %c0_i32_0 : i32, i32
  }
  func.func @transform_7(%arg0: i32) -> (i32, i32) {
    %c0_i32 = arith.constant 0 : i32
    %c0_i32_0 = arith.constant 0 : i32
    %c0_i32_1 = arith.constant 0 : i32
    return %c0_i32, %c0_i32_0 : i32, i32
  }
  func.func @transform_8(%arg0: i32) -> (i32, i32) {
    %c0_i32 = arith.constant 0 : i32
    %c0_i32_0 = arith.constant 0 : i32
    %c0_i32_1 = arith.constant 0 : i32
    return %c0_i32, %c0_i32_0 : i32, i32
  }
  func.func @transform_9(%arg0: i32) -> (i32, i32, i32) {
    %c0_i32 = arith.constant 0 : i32
    %c0_i32_0 = arith.constant 0 : i32
    %c0_i32_1 = arith.constant 0 : i32
    return %arg0, %c0_i32, %c0_i32_0 : i32, i32, i32
  }
}

</mosaic_0001>

<bundles_post_ra>
// kernel: tile.27
= control target key start
LH: loop header
LB: loop body
LE: loop exit
PB: predicated region body
PF: predicated region fallthrough
CT: control target
= control target key end

     0   :  { %vm20_vm0 = vcmask 1043458   ;;  %vm25_vm1 = vcmask 1045508   ;;  %vm30_vm2 = vcmask 1047558   ;;  %s64_s6 = smov 3  ;;  %s67_s7 = smov 12  ;;  %vm3_vm3 = vcmask 261120   ;;  %s344_s0 = inlined_call_operand.vmem [shape: f32[4,16,32], index: 0, kind: input, shape index: {}]   ;;  %s345_s1 = inlined_call_operand.vmem [shape: f32[4,512], index: 1, kind: output, shape index: {}]  }
   0x1   :  { %v195_v0 = vld [vmem:[%s344_s0 + $0x2] ss:$16 sm:%s64_s6]   ;;  %s72_s12 = smov 48  ;;  %s77_s13 = smov 192  ;;  %v2_v12 = vld [vmem:[%s344_s0] ss:$4 sm:$0xff]  }
   0x2   :  { %v196_v1 = vld [vmem:[%s344_s0 + $0x2] ss:$16 sm:%s67_s7]   ;;  %v197_v3 = vld [vmem:[%s344_s0 - $0x3a] ss:$16 sm:%s72_s12]   ;;  %s15_s18 = smov 3  ;;  %s18_s21 = smov 12 }
   0x3   :  { %v70_v2 = vsel %vm20_vm0, %v196_v1, %v195_v0  ;;  %v198_v4 = vld [vmem:[%s344_s0 - $0x3a] ss:$16 sm:%s77_s13]   ;;  %v187_v6 = vld [vmem:[%s344_s0 + $0x3] ss:$16 sm:%s15_s18]   ;;  %s23_s22 = smov 48  ;;  %s28_s27 = smov 192 }
   0x4   :  { %v75_v5 = vsel %vm25_vm1, %v197_v3, %v70_v2  ;;  %v188_v8 = vld [vmem:[%s344_s0 + $0x3] ss:$16 sm:%s18_s21]   ;;  %v189_v9 = vld [vmem:[%s344_s0 - $0x39] ss:$16 sm:%s23_s22]   ;;  %s217_s28 = smov 64   ;;  %s88_s2 = smov 3 }
   0x5   :  { %v80_v7 = vsel %vm30_vm2, %v198_v4, %v75_v5  ;;  %v21_v10 = vsel %vm20_vm0, %v188_v8, %v187_v6  ;;  %v190_v11 = vld [vmem:[%s344_s0 - $0x39] ss:$16 sm:%s28_s27]   ;;  %s91_s3 = smov 12  ;;  %v199_v14 = vld [vmem:[%s344_s0 + $0xa] ss:$16 sm:%s88_s2]   ;;  %s96_s10 = smov 48 }
   0x6   :  { %81 = vrot.lane.b32.xlu1 %v80_v7, %s217_s28  ;;  %v26_v13 = vsel %vm25_vm1, %v189_v9, %v21_v10  ;;  %v200_v15 = vld [vmem:[%s344_s0 + $0xa] ss:$16 sm:%s91_s3]   ;;  %s101_s11 = smov 192  ;;  %4 = vst.msk [vmem:[#allocation0] ss:$8 sm:$0xf] %vm3_vm3, %v2_v12  }
   0x7   :  { %6 = vst.msk [vmem:[#allocation0 - $0x1f] ss:$8 sm:$0xf0] %vm3_vm3, %v2_v12   ;;  %v31_v16 = vsel %vm30_vm2, %v190_v11, %v26_v13  ;;  %v94_v17 = vsel %vm20_vm0, %v200_v15, %v199_v14  ;;  %v201_v18 = vld [vmem:[%s344_s0 - $0x32] ss:$16 sm:%s96_s10]   ;;  %s39_s16 = smov 3 }
   0x8   :  { %v202_v19 = vld [vmem:[%s344_s0 - $0x32] ss:$16 sm:%s101_s11]   ;;  %s42_s17 = smov 12  ;;  %s218_s18 = smov 96   ;;  %v99_v20 = vsel %vm25_vm1, %v201_v18, %v94_v17  ;;  %v191_v21 = vld [vmem:[%s344_s0 + $0xb] ss:$16 sm:%s39_s16]  }
   0x9   :  { %32 = vrot.lane.b32.xlu0 %v31_v16, %s218_s18  ;;  %s47_s21 = smov 48  ;;  %s52_s22 = smov 192  ;;  %v186_v22 = vld [vmem:[%s344_s0 + $0x20] ss:$4 sm:$0xff]   ;;  %v104_v23 = vsel %vm30_vm2, %v202_v19, %v99_v20  ;;  %v192_v24 = vld [vmem:[%s344_s0 + $0xb] ss:$16 sm:%s42_s17]  }
   0xa   :  { %v193_v25 = vld [vmem:[%s344_s0 - $0x31] ss:$16 sm:%s47_s21]   ;;  %s137_s30 = smov 3  ;;  %11 = vst.msk [vmem:[#allocation0 + $0x2] ss:$8 sm:$0xf] %vm3_vm3, %v186_v22   ;;  %105 = vrot.lane.b32.xlu1 %v104_v23, %s217_s28  ;;  %v45_v26 = vsel %vm20_vm0, %v192_v24, %v191_v21 }
   0xb   :  { %13 = vst.msk [vmem:[#allocation0 - $0x1d] ss:$8 sm:$0xf0] %vm3_vm3, %v186_v22   ;;  %v194_v27 = vld [vmem:[%s344_s0 - $0x31] ss:$16 sm:%s52_s22]   ;;  %s140_s3 = smov 12  ;;  %v50_v28 = vsel %vm25_vm1, %v193_v25, %v45_v26 }
   0xc   :  { %s145_s4 = smov 48  ;;  %v207_v29 = vld [vmem:[%s344_s0 + $0x9] ss:$16 sm:%s137_s30]   ;;  %s150_s9 = smov 192  ;;  %v55_v31 = vsel %vm30_vm2, %v194_v27, %v50_v28  ;;  %vm34_vm4 = vcmask 1048320   ;;  %vm83_vm5 = vcmask 785920  }
   0xd   :  { %v208_v30 = vld [vmem:[%s344_s0 + $0x9] ss:$16 sm:%s140_s3]   ;;  %s113_s10 = smov 3  ;;  %v209_v33 = vld [vmem:[%s344_s0 - $0x33] ss:$16 sm:%s145_s4]   ;;  %s116_s15 = smov 12 }
   0xe   :  { %v143_v32 = vsel %vm20_vm0, %v208_v30, %v207_v29  ;;  %v210_v34 = vld [vmem:[%s344_s0 - $0x33] ss:$16 sm:%s150_s9]   ;;  %s121_s16 = smov 48  ;;  %56 = vrot.lane.b32.xlu0 %v55_v31, %s218_s18  ;;  %s126_s19 = smov 192  ;;  %vm132_vm6 = vcmask 523520  }
   0xf   :  { %v148_v35 = vsel %vm25_vm1, %v209_v33, %v143_v32  ;;  %v203_v36 = vld [vmem:[%s344_s0 + $0x1] ss:$16 sm:%s113_s10]   ;;  %v205_v39 = vld [vmem:[%s344_s0 - $0x3b] ss:$16 sm:%s121_s16]   ;;  %s219_s24 = smov 32  }
  0x10   :  { %v153_v37 = vsel %vm30_vm2, %v210_v34, %v148_v35  ;;  %v204_v38 = vld [vmem:[%s344_s0 + $0x1] ss:$16 sm:%s116_s15]   ;;  %v206_v41 = vld [vmem:[%s344_s0 - $0x3b] ss:$16 sm:%s126_s19]  }
  0x11   :  { %154 = vrot.lane.b32.xlu1 %v153_v37, %s219_s24  ;;  %v119_v40 = vsel %vm20_vm0, %v204_v38, %v203_v36 }
  0x12   :  { %v124_v42 = vsel %vm25_vm1, %v205_v39, %v119_v40 }
  0x13   :  { %v129_v43 = vsel %vm30_vm2, %v206_v41, %v124_v42 }
  0x14   :  { %130 = vrot.lane.b32.xlu0 %v129_v43, %s219_s24 }
  0x78   :  { %v82_v44 = vpop.permute.xlu1 %81  }
  0x7b   :  { %v33_v45 = vpop.permute.xlu0 %32  }
  0x7c   :  { %35 = vst.msk [vmem:[#allocation0] sm:$0xf] %vm34_vm4, %v33_v45   ;;  %37 = vst.msk [vmem:[#allocation0 + $0x4] sm:$0xf0] %vm34_vm4, %v33_v45   ;;  %v106_v46 = vpop.permute.xlu1 %105  }
  0x7d   :  { %84 = vst.msk [vmem:[#allocation0] sm:$0xf] %vm83_vm5, %v82_v44   ;;  %86 = vst.msk [vmem:[#allocation0 + $0x4] sm:$0xf0] %vm83_vm5, %v82_v44  }
  0x80   :  { %v57_v47 = vpop.permute.xlu0 %56  }
  0x81   :  { %60 = vst.msk [vmem:[#allocation0 + $0x10] sm:$0xf] %vm34_vm4, %v57_v47   ;;  %62 = vst.msk [vmem:[#allocation0 + $0x14] sm:$0xf0] %vm34_vm4, %v57_v47  }
  0x82   :  { %109 = vst.msk [vmem:[#allocation0 + $0x10] sm:$0xf] %vm83_vm5, %v106_v46   ;;  %111 = vst.msk [vmem:[#allocation0 + $0x14] sm:$0xf0] %vm83_vm5, %v106_v46  }
  0x83   :  { %v155_v48 = vpop.permute.xlu1 %154  }
  0x84   :  { %158 = vst.msk [vmem:[#allocation0 + $0x10] sm:$0xf] %vm132_vm6, %v155_v48   ;;  %160 = vst.msk [vmem:[#allocation0 + $0x14] sm:$0xf0] %vm132_vm6, %v155_v48  }
  0x86   :  { %v131_v49 = vpop.permute.xlu0 %130  }
  0x87   :  { %133 = vst.msk [vmem:[#allocation0] sm:$0xf] %vm132_vm6, %v131_v49   ;;  %135 = vst.msk [vmem:[#allocation0 + $0x4] sm:$0xf0] %vm132_vm6, %v131_v49  }
  0x8b   :  { %v173_v50 = vld [vmem:[#allocation0 + $0x10] sm:$0xf]  ;;  %v179_v51 = vld [vmem:[#allocation0 + $0x18] sm:$0xf] }
  0x8c   :  { %212 = vst [vmem:[%s345_s1 + $0x8] sm:$0xf] %v173_v50  ;;  %213 = vst [vmem:[%s345_s1 + $0xc] sm:$0xf] %v179_v51 }
  0x8e   :  { %v164_v52 = vld [vmem:[#allocation0] sm:$0xf]  ;;  %v168_v53 = vld [vmem:[#allocation0 + $0x8] sm:$0xf] }
  0x8f   :  { %166 = vst [vmem:[%s345_s1] sm:$0xf] %v164_v52  ;;  %211 = vst [vmem:[%s345_s1 + $0x4] sm:$0xf] %v168_v53 }

// kernel: _lambda_.1
= control target key start
LH: loop header
LB: loop body
LE: loop exit
PB: predicated region body
PF: predicated region fallthrough
CT: control target
= control target key end

     0   :  { %s9402_s30 = smov 0   ;;  %s11937_s0 = inlined_call_operand.vmem [shape: f32[2,16,512], index: 0, kind: input, shape index: {}]   ;;  %s11938_s1 = inlined_call_operand.vmem [shape: bf16[3,512,512], index: 1, kind: input, shape index: {}]   ;;  %s11939_s2 = inlined_call_operand.vmem [shape: f32[1,512], index: 2, kind: input, shape index: {}]   ;;  %s11940_s3 = inlined_call_operand.vmem [shape: bf16[3,512,512], index: 3, kind: input, shape index: {}]   ;;  %s11941_s4 = inlined_call_operand.vmem [shape: f32[1,512], index: 4, kind: input, shape index: {}]   ;;  %s11942_s5 = inlined_call_operand.vmem [shape: f32[32,4], index: 5, kind: input, shape index: {}]   ;;  %s11943_s6 = inlined_call_operand.vmem [shape: f32[1,4], index: 6, kind: input, shape index: {}]   ;;  %s11944_s7 = inlined_call_operand.vmem [shape: f32[4,512], index: 7, kind: input, shape index: {}]   ;;  %s11945_s8 = inlined_call_operand.vmem [shape: f32[1,512], index: 8, kind: input, shape index: {}]   ;;  %s11946_s9 = inlined_call_operand.vmem [shape: f32[2,16,512], index: 9, kind: output, shape index: {}]  }
   0x1 LB: > { %s6755_s10 = sadd.s32 4294967295, %s9346_s30   ;;  %p6759_p0 = scmp.ge.s32.totalorder %s9346_s30, 1  ;;  %s9346_s30 = sphi %s9402_s30, %s19_s30  }
   0x2   : > { %p287_p1 = scmp.lt.s32.totalorder %s9346_s30, 3 }
   0x4   : > { %p288_p2 = pnand %p6759_p0, %p287_p1 }
   0x5   : > { %v8160_v0 = vld [vmem:[%s11938_s1 + $0x4] ss:$16 sps:$4 sm:$0xff] (!%p288_p2)   ;;  %v333_v1 = vlaneseq (!%p288_p2)  ;;  %v8162_v2 = vld [vmem:[%s11938_s1 + $0xc] ss:$16 sps:$4 sm:$0xff] (!%p288_p2)   ;;  %v8164_v3 = vld [vmem:[%s11938_s1] ss:$16 sps:$4 sm:$0xff] (!%p288_p2)  }
   0x6   : > { %291 = sbr.rel (%p288_p2) target bundleno = 1633 (0x661), region = 56  ;;  %1197 = vmatprep.subr.bf16.mxu0 (!%p288_p2), %v8160_v0  ;;  %v8165_v4 = vld [vmem:[%s11938_s1 + $0x8] ss:$16 sps:$4 sm:$0xff] (!%p288_p2)   ;;  %1283 = vmatprep.subr.bf16.mxu1 (!%p288_p2), %v8162_v2  ;;  %v8166_v5 = vld [vmem:[%s11938_s1 + $0x24] ss:$16 sps:$4 sm:$0xff] (!%p288_p2)   ;;  %v9348_v8 = vmov (!%p288_p2), 0.0  }
   0x7   : > { %vm335_vm0 = vcmp.lt.s32.totalorder (!%p288_p2), %v333_v1, 512  ;;  %1198 = vmatpush1.bf16.msra.mxu0 (!%p288_p2), %v8164_v3  ;;  %1284 = vmatpush1.bf16.msra.mxu1 (!%p288_p2), %v8165_v4  ;;  %v8168_v6 = vld [vmem:[%s11938_s1 + $0x2c] ss:$16 sps:$4 sm:$0xff] (!%p288_p2)   ;;  %v8170_v7 = vld [vmem:[%s11938_s1 + $0x20] ss:$16 sps:$4 sm:$0xff] (!%p288_p2)   ;;  %p323_p3 = scmp.lt.s32.totalorder (!%p288_p2), %s6755_s10, 1 }
   0x8   : > { %337 = vst.msk [vmem:[#allocation2] ss:$8 sm:$0xf] (!%p288_p2), %vm335_vm0, %v9348_v8  ;;  %340 = vst.msk [vmem:[#allocation2 + $0x41] ss:$8 sm:$0xf] (!%p288_p2), %vm335_vm0, %v9348_v8  ;;  %1199 = vmatprep.subr.bf16.mxu0 (!%p288_p2), %v8166_v5  ;;  %1285 = vmatprep.subr.bf16.mxu1 (!%p288_p2), %v8168_v6 }
   0x9   : > { %v8171_v9 = vld [vmem:[%s11938_s1 + $0x28] ss:$16 sps:$4 sm:$0xff] (!%p288_p2)   ;;  %v8172_v10 = vld [vmem:[%s11938_s1 + $0x44] ss:$16 sps:$4 sm:$0xff] (!%p288_p2)   ;;  %v8174_v11 = vld [vmem:[%s11938_s1 + $0x4c] ss:$16 sps:$4 sm:$0xff] (!%p288_p2)  }
   0xa   : > { %v8176_v12 = vld [vmem:[%s11938_s1 + $0x40] ss:$16 sps:$4 sm:$0xff] (!%p288_p2)   ;;  %v8177_v13 = vld [vmem:[%s11938_s1 + $0x48] ss:$16 sps:$4 sm:$0xff] (!%p288_p2)   ;;  %v8178_v14 = vld [vmem:[%s11938_s1 + $0x64] ss:$16 sps:$4 sm:$0xff] (!%p288_p2)  }
   0xb   : > { %1200 = vmatpush1.bf16.msra.mxu0 (!%p288_p2), %v8170_v7  ;;  %1286 = vmatpush1.bf16.msra.mxu1 (!%p288_p2), %v8171_v9  ;;  %v8180_v15 = vld [vmem:[%s11938_s1 + $0x6c] ss:$16 sps:$4 sm:$0xff] (!%p288_p2)   ;;  %v8182_v16 = vld [vmem:[%s11938_s1 + $0x60] ss:$16 sps:$4 sm:$0xff] (!%p288_p2)   ;;  %v8183_v17 = vld [vmem:[%s11938_s1 + $0x68] ss:$16 sps:$4 sm:$0xff] (!%p288_p2)  }
   0xc   : > { %1201 = vmatprep.subr.bf16.mxu0 (!%p288_p2), %v8172_v10  ;;  %1287 = vmatprep.subr.bf16.mxu1 (!%p288_p2), %v8174_v11  ;;  %v8184_v18 = vld [vmem:[%s11938_s1 + $0x84] ss:$16 sps:$4 sm:$0xff] (!%p288_p2)   ;;  %v8186_v19 = vld [vmem:[%s11938_s1 + $0x8c] ss:$16 sps:$4 sm:$0xff] (!%p288_p2)   ;;  %v8188_v20 = vld [vmem:[%s11938_s1 + $0x80] ss:$16 sps:$4 sm:$0xff] (!%p288_p2)  }
   0xd   : > { %v8189_v21 = vld [vmem:[%s11938_s1 + $0x88] ss:$16 sps:$4 sm:$0xff]   ;;  %v8190_v22 = vld [vmem:[%s11938_s1 + $0xa4] ss:$16 sps:$4 sm:$0xff]   ;;  %v8192_v23 = vld [vmem:[%s11938_s1 + $0xac] ss:$16 sps:$4 sm:$0xff]  }
   0xe   : > { %v8194_v24 = vld [vmem:[%s11938_s1 + $0xa0] ss:$16 sps:$4 sm:$0xff]   ;;  %v8195_v25 = vld [vmem:[%s11938_s1 + $0xa8] ss:$16 sps:$4 sm:$0xff]   ;;  %v8196_v26 = vld [vmem:[%s11938_s1 + $0xc4] ss:$16 sps:$4 sm:$0xff]  }
   0xf   : > { %1202 = vmatpush1.bf16.msra.mxu0 %v8176_v12  ;;  %1288 = vmatpush1.bf16.msra.mxu1 %v8177_v13  ;;  %v8198_v27 = vld [vmem:[%s11938_s1 + $0xcc] ss:$16 sps:$4 sm:$0xff]   ;;  %v8200_v28 = vld [vmem:[%s11938_s1 + $0xc0] ss:$16 sps:$4 sm:$0xff]   ;;  %v8201_v29 = vld [vmem:[%s11938_s1 + $0xc8] ss:$16 sps:$4 sm:$0xff]  }
  0x10   : > { %1203 = vmatprep.subr.bf16.mxu0 %v8178_v14  ;;  %1289 = vmatprep.subr.bf16.mxu1 %v8180_v15  ;;  %v8202_v30 = vld [vmem:[%s11938_s1 + $0xe4] ss:$16 sps:$4 sm:$0xff]   ;;  %v8204_v31 = vld [vmem:[%s11938_s1 + $0xec] ss:$16 sps:$4 sm:$0xff]   ;;  %v8206_v32 = vld [vmem:[%s11938_s1 + $0xe0] ss:$16 sps:$4 sm:$0xff]  }
  0x11   : > { %v8207_v33 = vld [vmem:[%s11938_s1 + $0xe8] ss:$16 sps:$4 sm:$0xff]   ;;  %v8208_v34 = vld [vmem:[%s11938_s1 + $0x104] ss:$16 sps:$4 sm:$0xff]   ;;  %v8210_v35 = vld [vmem:[%s11938_s1 + $0x10c] ss:$16 sps:$4 sm:$0xff]  }
  0x12   : > { %v8212_v36 = vld [vmem:[%s11938_s1 + $0x100] ss:$16 sps:$4 sm:$0xff]   ;;  %v8213_v37 = vld [vmem:[%s11938_s1 + $0x108] ss:$16 sps:$4 sm:$0xff]   ;;  %v8214_v38 = vld [vmem:[%s11938_s1 + $0x124] ss:$16 sps:$4 sm:$0xff]  }
  0x13   : > { %1204 = vmatpush1.bf16.msra.mxu0 %v8182_v16  ;;  %1290 = vmatpush1.bf16.msra.mxu1 %v8183_v17  ;;  %s11948_s10 = smov (!%p323_p3, %s6755_s10), 1  ;;  %v8216_v39 = vld [vmem:[%s11938_s1 + $0x12c] ss:$16 sps:$4 sm:$0xff]   ;;  %v8218_v40 = vld [vmem:[%s11938_s1 + $0x120] ss:$16 sps:$4 sm:$0xff]   ;;  %vm358_vm1 = vcmask 1040384  }
  0x14   : > { %1205 = vmatprep.subr.bf16.mxu0 %v8184_v18  ;;  %1291 = vmatprep.subr.bf16.mxu1 %v8186_v19  ;;  %v8219_v41 = vld [vmem:[%s11938_s1 + $0x128] ss:$16 sps:$4 sm:$0xff]   ;;  %v8220_v42 = vld [vmem:[%s11938_s1 + $0x144] ss:$16 sps:$4 sm:$0xff]   ;;  %s8050_s17 = sshll.u32 %s11948_s10, 6  ;;  %vm2552_vm3 = vcmask 1046528  }
  0x15   : > { %v8222_v43 = vld [vmem:[%s11938_s1 + $0x14c] ss:$16 sps:$4 sm:$0xff]   ;;  %v8224_v44 = vld [vmem:[%s11938_s1 + $0x140] ss:$16 sps:$4 sm:$0xff]   ;;  %v8225_v45 = vld [vmem:[%s11938_s1 + $0x148] ss:$16 sps:$4 sm:$0xff]   ;;  %s9555_s26 = scalar_lea.vmem %s11937_s0, %s8050_s17  ;;  %s11909_s20 = scalar_lea.vmem %s11946_s9, %s8050_s17 }
  0x16   : > { %v8226_v46 = vld [vmem:[%s11938_s1 + $0x164] ss:$16 sps:$4 sm:$0xff]   ;;  %v8228_v47 = vld [vmem:[%s11938_s1 + $0x16c] ss:$16 sps:$4 sm:$0xff]   ;;  %v8230_v51 = vld [vmem:[%s11938_s1 + $0x160] ss:$16 sps:$4 sm:$0xff]  }
  0x17   : > { %1206 = vmatpush1.bf16.msra.mxu0 %v8188_v20  ;;  %1292 = vmatpush1.bf16.msra.mxu1 %v8189_v21  ;;  %v343_v48 = vld [vmem:[%s9555_s26 + $0x8] sm:$0xff]  ;;  %v8232_v54 = vld [vmem:[%s11938_s1 + $0x184] ss:$16 sps:$4 sm:$0xff]   ;;  %v8236_v58 = vld [vmem:[%s11938_s1 + $0x180] ss:$16 sps:$4 sm:$0xff]   ;;  %s9349_s15 = smov 32  }
  0x18   : > { %1207 = vmatprep.subr.bf16.mxu0 %v8190_v22  ;;  %1293 = vmatprep.subr.bf16.mxu1 %v8192_v23  ;;  %v347_v49 = vld [vmem:[%s9555_s26 + $0x28] sm:$0xff]  ;;  %v360_v50 = vrot.slane %v343_v48, 7  ;;  %v342_v56 = vld [vmem:[%s9555_s26] sm:$0xff]  ;;  %vm1526_vm2 = vsmask.f32 7424  ;;  %s9350_s16 = smov 96  }
  0x19   : > { %v8231_v52 = vld [vmem:[%s11938_s1 + $0x168] ss:$16 sps:$4 sm:$0xff]   ;;  %v365_v53 = vrot.slane %v347_v49, 7  ;;  %v8234_v55 = vld [vmem:[%s11938_s1 + $0x18c] ss:$16 sps:$4 sm:$0xff]   ;;  %v346_v57 = vld [vmem:[%s9555_s26 + $0x20] sm:$0xff] }
  0x1a   : > { %384 = vst [vmem:[#allocation2 + $0x8] sm:$0xfe] %v360_v50  ;;  %v359_v59 = vrot.slane %v342_v56, 7  ;;  %v363_v60 = vrot.slane %v346_v57, 7  ;;  %v8237_v61 = vld [vmem:[%s11938_s1 + $0x188] ss:$16 sps:$4 sm:$0xff]  }
  0x1b   : > { %1208 = vmatpush1.bf16.msra.mxu0 %v8194_v24  ;;  %1294 = vmatpush1.bf16.msra.mxu1 %v8195_v25  ;;  %392 = vst [vmem:[#allocation2 + $0x48] sm:$0x1] %v365_v53  ;;  %v8238_v62 = vld [vmem:[%s11938_s1 + $0x1a4] ss:$16 sps:$4 sm:$0xff]   ;;  %v8240_v63 = vld [vmem:[%s11938_s1 + $0x1ac] ss:$16 sps:$4 sm:$0xff]   ;;  %v9592_v0 = vsel %vm358_vm1, %v360_v50, %v365_v53 }
  0x1c   : > { %1209 = vmatprep.subr.bf16.mxu0 %v8196_v26  ;;  %1295 = vmatprep.subr.bf16.mxu1 %v8198_v27  ;;  %383 = vst [vmem:[#allocation2] sm:$0xfe] %v359_v59  ;;  %391 = vst [vmem:[#allocation2 + $0x40] sm:$0x1] %v363_v60  ;;  %v8242_v2 = vld [vmem:[%s11938_s1 + $0x1a0] ss:$16 sps:$4 sm:$0xff]   ;;  %v9626_v14 = vsel %vm358_vm1, %v359_v59, %v363_v60 }
  0x1d   : > { %v8243_v3 = vld [vmem:[%s11938_s1 + $0x1a8] ss:$16 sps:$4 sm:$0xff]   ;;  %v8244_v5 = vld [vmem:[%s11938_s1 + $0x1c4] ss:$16 sps:$4 sm:$0xff]   ;;  %v8246_v6 = vld [vmem:[%s11938_s1 + $0x1cc] ss:$16 sps:$4 sm:$0xff]  }
  0x1e   : > { %v8248_v8 = vld [vmem:[%s11938_s1 + $0x1c0] ss:$16 sps:$4 sm:$0xff]   ;;  %v8249_v9 = vld [vmem:[%s11938_s1 + $0x1c8] ss:$16 sps:$4 sm:$0xff]   ;;  %v8250_v10 = vld [vmem:[%s11938_s1 + $0x1e4] ss:$16 sps:$4 sm:$0xff]  }
  0x1f   : > { %1210 = vmatpush1.bf16.msra.mxu0 %v8200_v28  ;;  %1296 = vmatpush1.bf16.msra.mxu1 %v8201_v29  ;;  %v8252_v11 = vld [vmem:[%s11938_s1 + $0x1ec] ss:$16 sps:$4 sm:$0xff]   ;;  %v8254_v12 = vld [vmem:[%s11938_s1 + $0x1e0] ss:$16 sps:$4 sm:$0xff]   ;;  %v8255_v13 = vld [vmem:[%s11938_s1 + $0x1e8] ss:$16 sps:$4 sm:$0xff]  }
  0x20   : > { %1211 = vmatprep.subr.bf16.mxu0 %v8202_v30  ;;  %1297 = vmatprep.subr.bf16.mxu1 %v8204_v31  ;;  %v8258_v16 = vld [vmem:[%s11938_s1 + $0x204] ss:$16 sps:$4 sm:$0xff]   ;;  %v8261_v17 = vld [vmem:[%s11938_s1 + $0x20c] ss:$16 sps:$4 sm:$0xff]   ;;  %v8256_v19 = vld [vmem:[%s11938_s1 + $0x200] ss:$16 sps:$4 sm:$0xff]  }
  0x21   : > { %v418_v4 = vld [vmem:[#allocation2 + $0x8] sm:$0xff]  ;;  %v8264_v21 = vld [vmem:[%s11938_s1 + $0x224] ss:$16 sps:$4 sm:$0xff]   ;;  %v8262_v23 = vld [vmem:[%s11938_s1 + $0x220] ss:$16 sps:$4 sm:$0xff]   ;;  %s9351_s18 = smov 64  }
  0x22   : > { %v426_v7 = vpack.c.bf16 %v9592_v0, %v418_v4  ;;  %v8259_v20 = vld [vmem:[%s11938_s1 + $0x208] ss:$16 sps:$4 sm:$0xff]   ;;  %v8267_v22 = vld [vmem:[%s11938_s1 + $0x22c] ss:$16 sps:$4 sm:$0xff]   ;;  %v8270_v25 = vld [vmem:[%s11938_s1 + $0x244] ss:$16 sps:$4 sm:$0xff]  }
  0x23   : > { %1212 = vmatpush1.bf16.msra.mxu0 %v8206_v32  ;;  %1298 = vmatpush1.bf16.msra.mxu1 %v8207_v33  ;;  %v417_v15 = vld [vmem:[#allocation2] sm:$0xff]  ;;  %v8265_v24 = vld [vmem:[%s11938_s1 + $0x228] ss:$16 sps:$4 sm:$0xff]   ;;  %v8273_v26 = vld [vmem:[%s11938_s1 + $0x24c] ss:$16 sps:$4 sm:$0xff]   ;;  %vm6545_vm4 = vcmask 31744  }
  0x24   : > { %1213 = vmatprep.subr.bf16.mxu0 %v8208_v34  ;;  %1299 = vmatprep.subr.bf16.mxu1 %v8210_v35  ;;  %v425_v18 = vpack.c.bf16 %v9626_v14, %v417_v15  ;;  %v8268_v27 = vld [vmem:[%s11938_s1 + $0x240] ss:$16 sps:$4 sm:$0xff]   ;;  %v8271_v28 = vld [vmem:[%s11938_s1 + $0x248] ss:$16 sps:$4 sm:$0xff]   ;;  %v8276_v29 = vld [vmem:[%s11938_s1 + $0x264] ss:$16 sps:$4 sm:$0xff]  }
  0x25   : > { %1229 = vmatprep.mubr.bf16.mxu0 %v426_v7  ;;  %1315 = vmatprep.mubr.bf16.mxu1 %v426_v7  ;;  %v8279_v30 = vld [vmem:[%s11938_s1 + $0x26c] ss:$16 sps:$4 sm:$0xff]   ;;  %v8274_v31 = vld [vmem:[%s11938_s1 + $0x260] ss:$16 sps:$4 sm:$0xff]   ;;  %v8277_v32 = vld [vmem:[%s11938_s1 + $0x268] ss:$16 sps:$4 sm:$0xff]  }
  0x26   : > { %v8282_v33 = vld [vmem:[%s11938_s1 + $0x284] ss:$16 sps:$4 sm:$0xff]   ;;  %v8285_v34 = vld [vmem:[%s11938_s1 + $0x28c] ss:$16 sps:$4 sm:$0xff]   ;;  %v8280_v35 = vld [vmem:[%s11938_s1 + $0x280] ss:$16 sps:$4 sm:$0xff]  }
  0x27   : > { %1214 = vmatpush1.bf16.msra.mxu0 %v8212_v36  ;;  %1300 = vmatpush1.bf16.msra.mxu1 %v8213_v37  ;;  %v8283_v36 = vld [vmem:[%s11938_s1 + $0x288] ss:$16 sps:$4 sm:$0xff]   ;;  %v8288_v37 = vld [vmem:[%s11938_s1 + $0x2a4] ss:$16 sps:$4 sm:$0xff]   ;;  %v8303_v50 = vld [vmem:[%s11938_s1 + $0x2ec] ss:$16 sps:$4 sm:$0xff]  }
  0x28   : > { %1215 = vmatprep.subr.bf16.mxu0 %v8214_v38  ;;  %1301 = vmatprep.subr.bf16.mxu1 %v8216_v39  ;;  %v8291_v38 = vld [vmem:[%s11938_s1 + $0x2ac] ss:$16 sps:$4 sm:$0xff]   ;;  %v8286_v39 = vld [vmem:[%s11938_s1 + $0x2a0] ss:$16 sps:$4 sm:$0xff]   ;;  %v8306_v57 = vld [vmem:[%s11938_s1 + $0x304] ss:$16 sps:$4 sm:$0xff]  }
  0x29   : > { %v8304_v59 = vld [vmem:[%s11938_s1 + $0x300] ss:$16 sps:$4 sm:$0xff]   ;;  %v8321_v7 = vld [vmem:[%s11938_s1 + $0x34c] ss:$16 sps:$4 sm:$0xff]   ;;  %v8330_v15 = vld [vmem:[%s11938_s1 + $0x384] ss:$16 sps:$4 sm:$0xff]  }
  0x2a   : > { %v8310_v4 = vld [vmem:[%s11938_s1 + $0x320] ss:$16 sps:$4 sm:$0xff]   ;;  %vm6581_vm5 = vcmask 1043456  }
  0x2b   : > { %1216 = vmatpush1.bf16.msra.mxu0 %v8218_v40  ;;  %1302 = vmatpush1.bf16.msra.mxu1 %v8219_v41  ;;  %v8289_v40 = vld [vmem:[%s11938_s1 + $0x2a8] ss:$16 sps:$4 sm:$0xff]   ;;  %v8294_v41 = vld [vmem:[%s11938_s1 + $0x2c4] ss:$16 sps:$4 sm:$0xff]  }
  0x2c   : > { %1217 = vmatprep.subr.bf16.mxu0 %v8220_v42  ;;  %1303 = vmatprep.subr.bf16.mxu1 %v8222_v43  ;;  %v8297_v42 = vld [vmem:[%s11938_s1 + $0x2cc] ss:$16 sps:$4 sm:$0xff]   ;;  %v8292_v43 = vld [vmem:[%s11938_s1 + $0x2c0] ss:$16 sps:$4 sm:$0xff]  }
  0x2f   : > { %1218 = vmatpush1.bf16.msra.mxu0 %v8224_v44  ;;  %1304 = vmatpush1.bf16.msra.mxu1 %v8225_v45  ;;  %v8295_v44 = vld [vmem:[%s11938_s1 + $0x2c8] ss:$16 sps:$4 sm:$0xff]  }
  0x30   : > { %1219 = vmatprep.subr.bf16.mxu0 %v8226_v46  ;;  %1305 = vmatprep.subr.bf16.mxu1 %v8228_v47  ;;  %v345_v45 = vld [vmem:[%s9555_s26 + $0x18] sm:$0xff]  ;;  %v8300_v47 = vld [vmem:[%s11938_s1 + $0x2e4] ss:$16 sps:$4 sm:$0xff]  }
  0x31   : > { %v349_v46 = vld [vmem:[%s9555_s26 + $0x38] sm:$0xff]  ;;  %v362_v48 = vrot.slane %v345_v45, 7 }
  0x32   : > { %v369_v49 = vrot.slane %v349_v46, 7  ;;  %v8369_v45 = vld [vmem:[%s11938_s1 + $0x44c] ss:$16 sps:$4 sm:$0xff]  }
  0x33   : > { %1220 = vmatpush1.bf16.msra.mxu0 %v8230_v51  ;;  %1306 = vmatpush1.bf16.msra.mxu1 %v8231_v52  ;;  %386 = vst [vmem:[#allocation2 + $0x18] sm:$0xfe] %v362_v48  ;;  %v9722_v51 = vld [vmem:[%s9555_s26 + $0x10] sm:$0xff] }
  0x34   : > { %1221 = vmatprep.subr.bf16.mxu0 %v8232_v54  ;;  %1307 = vmatprep.subr.bf16.mxu1 %v8234_v55  ;;  %394 = vst [vmem:[#allocation2 + $0x58] sm:$0x1] %v369_v49  ;;  %v9725_v52 = vld [vmem:[%s9555_s26 + $0x30] sm:$0xff]  ;;  %v361_v53 = vrot.slane %v9722_v51, 7  ;;  %v8301_v55 = vld [vmem:[%s11938_s1 + $0x2e8] ss:$16 sps:$4 sm:$0xff]   ;;  %v9749_v60 = vsel %vm358_vm1, %v362_v48, %v369_v49 }
  0x35   : > { %v8298_v54 = vld [vmem:[%s11938_s1 + $0x2e0] ss:$16 sps:$4 sm:$0xff]   ;;  %v367_v56 = vrot.slane %v9725_v52, 7  ;;  %v8367_v52 = vld [vmem:[%s11938_s1 + $0x448] ss:$16 sps:$4 sm:$0xff]  }
  0x36   : > { %385 = vst [vmem:[#allocation2 + $0x10] sm:$0xfe] %v361_v53  ;;  %v8364_v51 = vld [vmem:[%s11938_s1 + $0x440] ss:$16 sps:$4 sm:$0xff]  }
  0x37   : > { %1222 = vmatpush1.bf16.msra.mxu0 %v8236_v58  ;;  %1308 = vmatpush1.bf16.msra.mxu1 %v8237_v61  ;;  %v8309_v58 = vld [vmem:[%s11938_s1 + $0x30c] ss:$16 sps:$4 sm:$0xff]   ;;  %393 = vst [vmem:[#allocation2 + $0x50] sm:$0x1] %v367_v56  ;;  %v8307_v61 = vld [vmem:[%s11938_s1 + $0x308] ss:$16 sps:$4 sm:$0xff]  }
  0x38   : > { %1223 = vmatprep.subr.bf16.mxu0 %v8238_v62  ;;  %1309 = vmatprep.subr.bf16.mxu1 %v8240_v63  ;;  %v8312_v62 = vld [vmem:[%s11938_s1 + $0x324] ss:$16 sps:$4 sm:$0xff]   ;;  %v8315_v63 = vld [vmem:[%s11938_s1 + $0x32c] ss:$16 sps:$4 sm:$0xff]  }
  0x3b   : > { %1224 = vmatpush1.bf16.msra.mxu0 %v8242_v2  ;;  %1310 = vmatpush1.bf16.msra.mxu1 %v8243_v3  ;;  %v420_v2 = vld [vmem:[#allocation2 + $0x18] sm:$0xff] }
  0x3c   : > { %1225 = vmatprep.subr.bf16.mxu0 %v8244_v5  ;;  %1311 = vmatprep.subr.bf16.mxu1 %v8246_v6  ;;  %v428_v3 = vpack.c.bf16 %v9749_v60, %v420_v2  ;;  %v8313_v5 = vld [vmem:[%s11938_s1 + $0x328] ss:$16 sps:$4 sm:$0xff]   ;;  %v8318_v6 = vld [vmem:[%s11938_s1 + $0x344] ss:$16 sps:$4 sm:$0xff]   ;;  %v8376_v2 = vld [vmem:[%s11938_s1 + $0x480] ss:$16 sps:$4 sm:$0xff]  }
  0x3f   : > { %1226 = vmatpush1.bf16.msra.mxu0 %v8248_v8  ;;  %1312 = vmatpush1.bf16.msra.mxu1 %v8249_v9  ;;  %v8316_v8 = vld [vmem:[%s11938_s1 + $0x340] ss:$16 sps:$4 sm:$0xff]   ;;  %v8319_v9 = vld [vmem:[%s11938_s1 + $0x348] ss:$16 sps:$4 sm:$0xff]  }
  0x40   : > { %1227 = vmatprep.subr.bf16.mxu0 %v8250_v10  ;;  %1313 = vmatprep.subr.bf16.mxu1 %v8252_v11  ;;  %v8324_v10 = vld [vmem:[%s11938_s1 + $0x364] ss:$16 sps:$4 sm:$0xff]   ;;  %v8327_v11 = vld [vmem:[%s11938_s1 + $0x36c] ss:$16 sps:$4 sm:$0xff]  }
  0x43   : > { %1228 = vmatpush1.bf16.msra.mxu0 %v8254_v12  ;;  %1314 = vmatpush1.bf16.msra.mxu1 %v8255_v13  ;;  %v8322_v12 = vld [vmem:[%s11938_s1 + $0x360] ss:$16 sps:$4 sm:$0xff]   ;;  %v8325_v13 = vld [vmem:[%s11938_s1 + $0x368] ss:$16 sps:$4 sm:$0xff]  }
  0x44   : > { %1240 = vmatprep.subr.bf16.mxu0 %v8258_v16  ;;  %1326 = vmatprep.subr.bf16.mxu1 %v8261_v17  ;;  %v8333_v16 = vld [vmem:[%s11938_s1 + $0x38c] ss:$16 sps:$4 sm:$0xff]   ;;  %v8328_v17 = vld [vmem:[%s11938_s1 + $0x380] ss:$16 sps:$4 sm:$0xff]  }
  0x46   : > { %1230 = vmatmul.mubr.bf16.vlgmr.msra.gmra.mrb[0].mxu0 %v425_v18  ;;  %1316 = vmatmul.mubr.bf16.vlgmr.msra.gmra.mrb[0].mxu1 %v425_v18  ;;  %v8331_v18 = vld [vmem:[%s11938_s1 + $0x388] ss:$16 sps:$4 sm:$0xff]  }
  0x47   : > { %1241 = vmatpush1.bf16.msra.mxu0 %v8256_v19  ;;  %1327 = vmatpush1.bf16.msra.mxu1 %v8259_v20  ;;  %v8336_v19 = vld [vmem:[%s11938_s1 + $0x3a4] ss:$16 sps:$4 sm:$0xff]   ;;  %v8339_v20 = vld [vmem:[%s11938_s1 + $0x3ac] ss:$16 sps:$4 sm:$0xff]  }
  0x48   : > { %1242 = vmatprep.subr.bf16.mxu0 %v8264_v21  ;;  %1328 = vmatprep.subr.bf16.mxu1 %v8267_v22  ;;  %v8334_v21 = vld [vmem:[%s11938_s1 + $0x3a0] ss:$16 sps:$4 sm:$0xff]   ;;  %v8337_v22 = vld [vmem:[%s11938_s1 + $0x3a8] ss:$16 sps:$4 sm:$0xff]  }
  0x49   : > { %1272 = vmatprep.mubr.bf16.mxu0 %v428_v3  ;;  %1358 = vmatprep.mubr.bf16.mxu1 %v428_v3  ;;  %v8379_v3 = vld [vmem:[%s11938_s1 + $0x488] ss:$16 sps:$4 sm:$0xff]  }
  0x4b   : > { %1243 = vmatpush1.bf16.msra.mxu0 %v8262_v23  ;;  %1329 = vmatpush1.bf16.msra.mxu1 %v8265_v24  ;;  %v8342_v23 = vld [vmem:[%s11938_s1 + $0x3c4] ss:$16 sps:$4 sm:$0xff]   ;;  %v8345_v24 = vld [vmem:[%s11938_s1 + $0x3cc] ss:$16 sps:$4 sm:$0xff]  }
  0x4c   : > { %1244 = vmatprep.subr.bf16.mxu0 %v8270_v25  ;;  %1330 = vmatprep.subr.bf16.mxu1 %v8273_v26  ;;  %v8340_v25 = vld [vmem:[%s11938_s1 + $0x3c0] ss:$16 sps:$4 sm:$0xff]   ;;  %v8343_v26 = vld [vmem:[%s11938_s1 + $0x3c8] ss:$16 sps:$4 sm:$0xff]  }
  0x4f   : > { %1245 = vmatpush1.bf16.msra.mxu0 %v8268_v27  ;;  %1331 = vmatpush1.bf16.msra.mxu1 %v8271_v28  ;;  %v8348_v27 = vld [vmem:[%s11938_s1 + $0x3e4] ss:$16 sps:$4 sm:$0xff]   ;;  %v8351_v28 = vld [vmem:[%s11938_s1 + $0x3ec] ss:$16 sps:$4 sm:$0xff]  }
  0x50   : > { %1246 = vmatprep.subr.bf16.mxu0 %v8276_v29  ;;  %1332 = vmatprep.subr.bf16.mxu1 %v8279_v30  ;;  %v8346_v29 = vld [vmem:[%s11938_s1 + $0x3e0] ss:$16 sps:$4 sm:$0xff]   ;;  %v8349_v30 = vld [vmem:[%s11938_s1 + $0x3e8] ss:$16 sps:$4 sm:$0xff]  }
  0x53   : > { %1247 = vmatpush1.bf16.msra.mxu0 %v8274_v31  ;;  %1333 = vmatpush1.bf16.msra.mxu1 %v8277_v32  ;;  %v8354_v31 = vld [vmem:[%s11938_s1 + $0x404] ss:$16 sps:$4 sm:$0xff]   ;;  %v9847_v32 = vsel %vm358_vm1, %v361_v53, %v367_v56 }
  0x54   : > { %1248 = vmatprep.subr.bf16.mxu0 %v8282_v33  ;;  %1334 = vmatprep.subr.bf16.mxu1 %v8285_v34  ;;  %v419_v33 = vld [vmem:[#allocation2 + $0x10] sm:$0xff]  ;;  %v8357_v34 = vld [vmem:[%s11938_s1 + $0x40c] ss:$16 sps:$4 sm:$0xff]  }
  0x55   : > { %v8372_v53 = vld [vmem:[%s11938_s1 + $0x464] ss:$16 sps:$4 sm:$0xff]  }
  0x57   : > { %1249 = vmatpush1.bf16.msra.mxu0 %v8280_v35  ;;  %1335 = vmatpush1.bf16.msra.mxu1 %v8283_v36  ;;  %v8352_v35 = vld [vmem:[%s11938_s1 + $0x400] ss:$16 sps:$4 sm:$0xff]   ;;  %v8355_v36 = vld [vmem:[%s11938_s1 + $0x408] ss:$16 sps:$4 sm:$0xff]  }
  0x58   : > { %1250 = vmatprep.subr.bf16.mxu0 %v8288_v37  ;;  %1336 = vmatprep.subr.bf16.mxu1 %v8291_v38  ;;  %v427_v37 = vpack.c.bf16 %v9847_v32, %v419_v33  ;;  %v8360_v38 = vld [vmem:[%s11938_s1 + $0x424] ss:$16 sps:$4 sm:$0xff]   ;;  %v8421_v33 = vld [vmem:[%s11938_s1 + $0x568] ss:$16 sps:$4 sm:$0xff]  }
  0x5b   : > { %1251 = vmatpush1.bf16.msra.mxu0 %v8286_v39  ;;  %1337 = vmatpush1.bf16.msra.mxu1 %v8289_v40  ;;  %v8363_v39 = vld [vmem:[%s11938_s1 + $0x42c] ss:$16 sps:$4 sm:$0xff]   ;;  %v8358_v40 = vld [vmem:[%s11938_s1 + $0x420] ss:$16 sps:$4 sm:$0xff]  }
  0x5c   : > { %1252 = vmatprep.subr.bf16.mxu0 %v8294_v41  ;;  %1338 = vmatprep.subr.bf16.mxu1 %v8297_v42  ;;  %v8361_v41 = vld [vmem:[%s11938_s1 + $0x428] ss:$16 sps:$4 sm:$0xff]  }
  0x5d   : > { %v1378_v42 = vld [vmem:[#allocation2 + $0x8] sm:$0xfe] }
  0x5e   : > { %v1390_v46 = vpack.c.bf16 %v9592_v0, %v1378_v42  ;;  %v1385_v42 = vld [vmem:[#allocation2 + $0x40] sm:$0x1] }
  0x5f   : > { %1253 = vmatpush1.bf16.msra.mxu0 %v8292_v43  ;;  %1339 = vmatpush1.bf16.msra.mxu1 %v8295_v44  ;;  %v1386_v43 = vld [vmem:[#allocation2 + $0x48] sm:$0x1]  ;;  %v8366_v44 = vld [vmem:[%s11938_s1 + $0x444] ss:$16 sps:$4 sm:$0xff]  }
  0x60   : > { %1254 = vmatprep.subr.bf16.mxu0 %v8300_v47  ;;  %1340 = vmatprep.subr.bf16.mxu1 %v8303_v50  ;;  %v1394_v47 = vpack.c.bf16 %v1386_v43, %v1386_v43  ;;  %v1540_v48 = vshrl.u32 %v1390_v46, 16  ;;  %v1542_v49 = vshll.u32 %v1390_v46, 16  ;;  %v1380_v43 = vld [vmem:[#allocation2 + $0x18] sm:$0xfe] }
  0x61   : > { %v8433_v46 = vld [vmem:[%s11938_s1 + $0x5a8] ss:$16 sps:$4 sm:$0xff]  }
  0x62   : > { %v1547_v50 = vshll.u32 %v1394_v47, 16  ;;  %v1393_v47 = vpack.c.bf16 %v1385_v42, %v1385_v42  ;;  %v8495_v42 = vld [vmem:[%s11938_s1 + $0x6ec] ss:$16 sps:$4 sm:$0xff]  }
  0x63   : > { %1255 = vmatpush1.bf16.msra.mxu0 %v8298_v54  ;;  %1341 = vmatpush1.bf16.msra.mxu1 %v8301_v55  ;;  %v8375_v54 = vld [vmem:[%s11938_s1 + $0x46c] ss:$16 sps:$4 sm:$0xff]   ;;  %v1544_v55 = vrot.slane %v1542_v49, 1  ;;  %v1388_v49 = vld [vmem:[#allocation2 + $0x58] sm:$0x1] }
  0x64   : > { %1256 = vmatprep.subr.bf16.mxu0 %v8306_v57  ;;  %1342 = vmatprep.subr.bf16.mxu1 %v8309_v58  ;;  %v1549_v56 = vrot.slane %v1547_v50, 1  ;;  %v8370_v57 = vld [vmem:[%s11938_s1 + $0x460] ss:$16 sps:$4 sm:$0xff]   ;;  %v8438_v50 = vld [vmem:[%s11938_s1 + $0x5c4] ss:$16 sps:$4 sm:$0xff]  }
  0x65   : > { %v1545_v58 = vor.u32 %v1544_v55, %v1540_v48  ;;  %v8439_v55 = vld [vmem:[%s11938_s1 + $0x5c8] ss:$16 sps:$4 sm:$0xff]  }
  0x67   : > { %1257 = vmatpush1.bf16.msra.mxu0 %v8304_v59  ;;  %1343 = vmatpush1.bf16.msra.mxu1 %v8307_v61  ;;  %v8373_v59 = vld [vmem:[%s11938_s1 + $0x468] ss:$16 sps:$4 sm:$0xff]   ;;  %v8378_v61 = vld [vmem:[%s11938_s1 + $0x484] ss:$16 sps:$4 sm:$0xff]  }
  0x68   : > { %1258 = vmatprep.subr.bf16.mxu0 %v8312_v62  ;;  %1344 = vmatprep.subr.bf16.mxu1 %v8315_v63  ;;  %v8381_v62 = vld [vmem:[%s11938_s1 + $0x48c] ss:$16 sps:$4 sm:$0xff]   ;;  %v1550_v63 = vsel %vm1526_vm2, %v1545_v58, %v1549_v56  ;;  %v1535_v58 = vshll.u32 %v1393_v47, 16  ;;  %v8496_v47 = vld [vmem:[%s11938_s1 + $0x700] ss:$16 sps:$4 sm:$0xff]  }
  0x6b   : > { %1259 = vmatpush1.bf16.msra.mxu0 %v8310_v4  ;;  %1345 = vmatpush1.bf16.msra.mxu1 %v8313_v5  ;;  %v8384_v4 = vld [vmem:[%s11938_s1 + $0x4a4] ss:$16 sps:$4 sm:$0xff]   ;;  %v8387_v5 = vld [vmem:[%s11938_s1 + $0x4ac] ss:$16 sps:$4 sm:$0xff]  }
  0x6c   : > { %1260 = vmatprep.subr.bf16.mxu0 %v8318_v6  ;;  %1346 = vmatprep.subr.bf16.mxu1 %v8321_v7  ;;  %v8382_v6 = vld [vmem:[%s11938_s1 + $0x4a0] ss:$16 sps:$4 sm:$0xff]   ;;  %v8385_v7 = vld [vmem:[%s11938_s1 + $0x4a8] ss:$16 sps:$4 sm:$0xff]  }
  0x6f   : > { %1261 = vmatpush1.bf16.msra.mxu0 %v8316_v8  ;;  %1347 = vmatpush1.bf16.msra.mxu1 %v8319_v9  ;;  %v8390_v8 = vld [vmem:[%s11938_s1 + $0x4c4] ss:$16 sps:$4 sm:$0xff]   ;;  %v8393_v9 = vld [vmem:[%s11938_s1 + $0x4cc] ss:$16 sps:$4 sm:$0xff]  }
  0x70   : > { %1262 = vmatprep.subr.bf16.mxu0 %v8324_v10  ;;  %1348 = vmatprep.subr.bf16.mxu1 %v8327_v11  ;;  %v8388_v10 = vld [vmem:[%s11938_s1 + $0x4c0] ss:$16 sps:$4 sm:$0xff]   ;;  %v8391_v11 = vld [vmem:[%s11938_s1 + $0x4c8] ss:$16 sps:$4 sm:$0xff]  }
  0x73   : > { %1263 = vmatpush1.bf16.msra.mxu0 %v8322_v12  ;;  %1349 = vmatpush1.bf16.msra.mxu1 %v8325_v13  ;;  %v8396_v12 = vld [vmem:[%s11938_s1 + $0x4e4] ss:$16 sps:$4 sm:$0xff]   ;;  %v8399_v13 = vld [vmem:[%s11938_s1 + $0x4ec] ss:$16 sps:$4 sm:$0xff]  }
  0x74   : > { %1264 = vmatprep.subr.bf16.mxu0 %v8330_v15  ;;  %1350 = vmatprep.subr.bf16.mxu1 %v8333_v16  ;;  %v8394_v15 = vld [vmem:[%s11938_s1 + $0x4e0] ss:$16 sps:$4 sm:$0xff]   ;;  %v8397_v16 = vld [vmem:[%s11938_s1 + $0x4e8] ss:$16 sps:$4 sm:$0xff]  }
  0x77   : > { %1265 = vmatpush1.bf16.msra.mxu0 %v8328_v17  ;;  %1351 = vmatpush1.bf16.msra.mxu1 %v8331_v18  ;;  %v8402_v17 = vld [vmem:[%s11938_s1 + $0x504] ss:$16 sps:$4 sm:$0xff]   ;;  %v8405_v18 = vld [vmem:[%s11938_s1 + $0x50c] ss:$16 sps:$4 sm:$0xff]  }
  0x78   : > { %1266 = vmatprep.subr.bf16.mxu0 %v8336_v19  ;;  %1352 = vmatprep.subr.bf16.mxu1 %v8339_v20  ;;  %v8400_v19 = vld [vmem:[%s11938_s1 + $0x500] ss:$16 sps:$4 sm:$0xff]   ;;  %v8403_v20 = vld [vmem:[%s11938_s1 + $0x508] ss:$16 sps:$4 sm:$0xff]  }
  0x7b   : > { %1267 = vmatpush1.bf16.msra.mxu0 %v8334_v21  ;;  %1353 = vmatpush1.bf16.msra.mxu1 %v8337_v22  ;;  %v8408_v21 = vld [vmem:[%s11938_s1 + $0x524] ss:$16 sps:$4 sm:$0xff]   ;;  %v8411_v22 = vld [vmem:[%s11938_s1 + $0x52c] ss:$16 sps:$4 sm:$0xff]  }
  0x7c   : > { %1268 = vmatprep.subr.bf16.mxu0 %v8342_v23  ;;  %1354 = vmatprep.subr.bf16.mxu1 %v8345_v24  ;;  %v8406_v23 = vld [vmem:[%s11938_s1 + $0x520] ss:$16 sps:$4 sm:$0xff]   ;;  %v8409_v24 = vld [vmem:[%s11938_s1 + $0x528] ss:$16 sps:$4 sm:$0xff]  }
  0x7f   : > { %1269 = vmatpush1.bf16.msra.mxu0 %v8340_v25  ;;  %1355 = vmatpush1.bf16.msra.mxu1 %v8343_v26  ;;  %v8414_v25 = vld [vmem:[%s11938_s1 + $0x544] ss:$16 sps:$4 sm:$0xff]   ;;  %v8417_v26 = vld [vmem:[%s11938_s1 + $0x54c] ss:$16 sps:$4 sm:$0xff]  }
  0x80   : > { %1270 = vmatprep.subr.bf16.mxu0 %v8348_v27  ;;  %1356 = vmatprep.subr.bf16.mxu1 %v8351_v28  ;;  %v8412_v27 = vld [vmem:[%s11938_s1 + $0x540] ss:$16 sps:$4 sm:$0xff]   ;;  %v8415_v28 = vld [vmem:[%s11938_s1 + $0x548] ss:$16 sps:$4 sm:$0xff]  }
  0x83   : > { %1271 = vmatpush1.bf16.msra.mxu0 %v8346_v29  ;;  %1357 = vmatpush1.bf16.msra.mxu1 %v8349_v30  ;;  %v8420_v29 = vld [vmem:[%s11938_s1 + $0x564] ss:$16 sps:$4 sm:$0xff]   ;;  %v8423_v30 = vld [vmem:[%s11938_s1 + $0x56c] ss:$16 sps:$4 sm:$0xff]  }
  0x84   : > { %2219 = vmatprep.subr.bf16.mxu0 %v8354_v31  ;;  %2305 = vmatprep.subr.bf16.mxu1 %v8357_v34  ;;  %v8418_v31 = vld [vmem:[%s11938_s1 + $0x560] ss:$16 sps:$4 sm:$0xff]   ;;  %v8426_v34 = vld [vmem:[%s11938_s1 + $0x584] ss:$16 sps:$4 sm:$0xff]  }
  0x86   : > { %1273 = vmatmul.mubr.bf16.vlgmr.msra.gmra.mrb[0].mxu0 %v427_v37  ;;  %1359 = vmatmul.mubr.bf16.vlgmr.msra.gmra.mrb[0].mxu1 %v427_v37  ;;  %v8424_v37 = vld [vmem:[%s11938_s1 + $0x580] ss:$16 sps:$4 sm:$0xff]  }
  0x87   : > { %2220 = vmatpush1.bf16.msra.mxu0 %v8352_v35  ;;  %2306 = vmatpush1.bf16.msra.mxu1 %v8355_v36  ;;  %v8429_v35 = vld [vmem:[%s11938_s1 + $0x58c] ss:$16 sps:$4 sm:$0xff]   ;;  %v1377_v36 = vld [vmem:[#allocation2] sm:$0xfe] }
  0x88   : > { %2221 = vmatprep.subr.bf16.mxu0 %v8360_v38  ;;  %2307 = vmatprep.subr.bf16.mxu1 %v8363_v39  ;;  %v8427_v38 = vld [vmem:[%s11938_s1 + $0x588] ss:$16 sps:$4 sm:$0xff]   ;;  %v8432_v39 = vld [vmem:[%s11938_s1 + $0x5a4] ss:$16 sps:$4 sm:$0xff]  }
  0x89   : > { %2251 = vmatprep.mubr.bf16.mxu0 %v1550_v63  ;;  %2337 = vmatprep.mubr.bf16.mxu1 %v1550_v63 }
  0x8b   : > { %2222 = vmatpush1.bf16.msra.mxu0 %v8358_v40  ;;  %2308 = vmatpush1.bf16.msra.mxu1 %v8361_v41  ;;  %v8435_v40 = vld [vmem:[%s11938_s1 + $0x5ac] ss:$16 sps:$4 sm:$0xff]   ;;  %v1389_v41 = vpack.c.bf16 %v9626_v14, %v1377_v36  ;;  %v8481_v36 = vld [vmem:[%s11938_s1 + $0x6a8] ss:$16 sps:$4 sm:$0xff]  }
  0x8c   : > { %2223 = vmatprep.subr.bf16.mxu0 %v8366_v44  ;;  %2309 = vmatprep.subr.bf16.mxu1 %v8369_v45  ;;  %v8430_v44 = vld [vmem:[%s11938_s1 + $0x5a0] ss:$16 sps:$4 sm:$0xff]   ;;  %v1392_v45 = vpack.c.bf16 %v9749_v60, %v1380_v43 }
  0x8d   : > { %v1530_v48 = vshll.u32 %v1389_v41, 16  ;;  %v1528_v56 = vshrl.u32 %v1389_v41, 16  ;;  %v8492_v41 = vld [vmem:[%s11938_s1 + $0x6e4] ss:$16 sps:$4 sm:$0xff]   ;;  %v8490_v43 = vld [vmem:[%s11938_s1 + $0x6e0] ss:$16 sps:$4 sm:$0xff]  }
  0x8f   : > { %2224 = vmatpush1.bf16.msra.mxu0 %v8364_v51  ;;  %2310 = vmatpush1.bf16.msra.mxu1 %v8367_v52  ;;  %v8441_v51 = vld [vmem:[%s11938_s1 + $0x5cc] ss:$16 sps:$4 sm:$0xff]   ;;  %v8436_v52 = vld [vmem:[%s11938_s1 + $0x5c0] ss:$16 sps:$4 sm:$0xff]  }
  0x90   : > { %2225 = vmatprep.subr.bf16.mxu0 %v8372_v53  ;;  %2311 = vmatprep.subr.bf16.mxu1 %v8375_v54  ;;  %v1396_v53 = vpack.c.bf16 %v1388_v49, %v1388_v49  ;;  %v1566_v54 = vshll.u32 %v1392_v45, 16  ;;  %v8504_v49 = vld [vmem:[%s11938_s1 + $0x724] ss:$16 sps:$4 sm:$0xff]  }
  0x92   : > { %v1568_v63 = vrot.slane %v1566_v54, 1  ;;  %v8513_v54 = vld [vmem:[%s11938_s1 + $0x74c] ss:$16 sps:$4 sm:$0xff]  }
  0x93   : > { %2226 = vmatpush1.bf16.msra.mxu0 %v8370_v57  ;;  %2312 = vmatpush1.bf16.msra.mxu1 %v8373_v59  ;;  %v1532_v57 = vrot.slane %v1530_v48, 1  ;;  %v8444_v59 = vld [vmem:[%s11938_s1 + $0x5e4] ss:$16 sps:$4 sm:$0xff]   ;;  %v8499_v48 = vld [vmem:[%s11938_s1 + $0x708] ss:$16 sps:$4 sm:$0xff]  }
  0x94   : > { %2227 = vmatprep.subr.bf16.mxu0 %v8378_v61  ;;  %2313 = vmatprep.subr.bf16.mxu1 %v8381_v62  ;;  %v8447_v61 = vld [vmem:[%s11938_s1 + $0x5ec] ss:$16 sps:$4 sm:$0xff]   ;;  %v1564_v62 = vshrl.u32 %v1392_v45, 16  ;;  %v8498_v45 = vld [vmem:[%s11938_s1 + $0x704] ss:$16 sps:$4 sm:$0xff]  }
  0x97   : > { %2228 = vmatpush1.bf16.msra.mxu0 %v8376_v2  ;;  %2314 = vmatpush1.bf16.msra.mxu1 %v8379_v3  ;;  %v1571_v2 = vshll.u32 %v1396_v53, 16  ;;  %v8442_v3 = vld [vmem:[%s11938_s1 + $0x5e0] ss:$16 sps:$4 sm:$0xff]   ;;  %v8510_v53 = vld [vmem:[%s11938_s1 + $0x744] ss:$16 sps:$4 sm:$0xff]  }
  0x98   : > { %2229 = vmatprep.subr.bf16.mxu0 %v8384_v4  ;;  %2315 = vmatprep.subr.bf16.mxu1 %v8387_v5  ;;  %v8445_v4 = vld [vmem:[%s11938_s1 + $0x5e8] ss:$16 sps:$4 sm:$0xff]   ;;  %v1533_v5 = vor.u32 %v1532_v57, %v1528_v56  ;;  %v8516_v57 = vld [vmem:[%s11938_s1 + $0x764] ss:$16 sps:$4 sm:$0xff]  }
  0x99   : > { %v8511_v56 = vld [vmem:[%s11938_s1 + $0x748] ss:$16 sps:$4 sm:$0xff]  }
  0x9b   : > { %2230 = vmatpush1.bf16.msra.mxu0 %v8382_v6  ;;  %2316 = vmatpush1.bf16.msra.mxu1 %v8385_v7  ;;  %v1537_v6 = vrot.slane %v1535_v58, 1  ;;  %v8450_v7 = vld [vmem:[%s11938_s1 + $0x604] ss:$16 sps:$4 sm:$0xff]   ;;  %v8519_v58 = vld [vmem:[%s11938_s1 + $0x76c] ss:$16 sps:$4 sm:$0xff]  }
  0x9c   : > { %2231 = vmatprep.subr.bf16.mxu0 %v8390_v8  ;;  %2317 = vmatprep.subr.bf16.mxu1 %v8393_v9  ;;  %v8453_v8 = vld [vmem:[%s11938_s1 + $0x60c] ss:$16 sps:$4 sm:$0xff]   ;;  %v1569_v9 = vor.u32 %v1568_v63, %v1564_v62  ;;  %v8522_v62 = vld [vmem:[%s11938_s1 + $0x784] ss:$16 sps:$4 sm:$0xff]  }
  0x9d   : > { %v8525_v63 = vld [vmem:[%s11938_s1 + $0x78c] ss:$16 sps:$4 sm:$0xff]  }
  0x9f   : > { %2232 = vmatpush1.bf16.msra.mxu0 %v8388_v10  ;;  %2318 = vmatpush1.bf16.msra.mxu1 %v8391_v11  ;;  %v1573_v10 = vrot.slane %v1571_v2, 1  ;;  %v8448_v11 = vld [vmem:[%s11938_s1 + $0x600] ss:$16 sps:$4 sm:$0xff]  }
  0xa0   : > { %2233 = vmatprep.subr.bf16.mxu0 %v8396_v12  ;;  %2319 = vmatprep.subr.bf16.mxu1 %v8399_v13  ;;  %v8451_v12 = vld [vmem:[%s11938_s1 + $0x608] ss:$16 sps:$4 sm:$0xff]   ;;  %v1538_v13 = vsel %vm1526_vm2, %v1533_v5, %v1537_v6  ;;  %v1379_v2 = vld [vmem:[#allocation2 + $0x10] sm:$0xfe]  ;;  %v1387_v6 = vld [vmem:[#allocation2 + $0x50] sm:$0x1] }
  0xa1   : > { %v8528_v5 = vld [vmem:[%s11938_s1 + $0x7a4] ss:$16 sps:$4 sm:$0xff]  }
  0xa3   : > { %2234 = vmatpush1.bf16.msra.mxu0 %v8394_v15  ;;  %2320 = vmatpush1.bf16.msra.mxu1 %v8397_v16  ;;  %v8456_v15 = vld [vmem:[%s11938_s1 + $0x624] ss:$16 sps:$4 sm:$0xff]   ;;  %v8459_v16 = vld [vmem:[%s11938_s1 + $0x62c] ss:$16 sps:$4 sm:$0xff]  }
  0xa4   : > { %2235 = vmatprep.subr.bf16.mxu0 %v8402_v17  ;;  %2321 = vmatprep.subr.bf16.mxu1 %v8405_v18  ;;  %v1574_v17 = vsel %vm1526_vm2, %v1569_v9, %v1573_v10  ;;  %v8454_v18 = vld [vmem:[%s11938_s1 + $0x620] ss:$16 sps:$4 sm:$0xff]   ;;  %v1395_v10 = vpack.c.bf16 %v1387_v6, %v1387_v6  ;;  %v8594_v6 = vld [vmem:[%s11938_s1 + $0x904] ss:$16 sps:$4 sm:$0xff]  }
  0xa5   : > { %v8526_v9 = vld [vmem:[%s11938_s1 + $0x7a0] ss:$16 sps:$4 sm:$0xff]  }
  0xa7   : > { %2236 = vmatpush1.bf16.msra.mxu0 %v8400_v19  ;;  %2322 = vmatpush1.bf16.msra.mxu1 %v8403_v20  ;;  %v8457_v19 = vld [vmem:[%s11938_s1 + $0x628] ss:$16 sps:$4 sm:$0xff]   ;;  %v8462_v20 = vld [vmem:[%s11938_s1 + $0x644] ss:$16 sps:$4 sm:$0xff]  }
  0xa8   : > { %2237 = vmatprep.subr.bf16.mxu0 %v8408_v21  ;;  %2323 = vmatprep.subr.bf16.mxu1 %v8411_v22  ;;  %v8465_v21 = vld [vmem:[%s11938_s1 + $0x64c] ss:$16 sps:$4 sm:$0xff]   ;;  %v8460_v22 = vld [vmem:[%s11938_s1 + $0x640] ss:$16 sps:$4 sm:$0xff]  }
  0xab   : > { %2238 = vmatpush1.bf16.msra.mxu0 %v8406_v23  ;;  %2324 = vmatpush1.bf16.msra.mxu1 %v8409_v24  ;;  %v8463_v23 = vld [vmem:[%s11938_s1 + $0x648] ss:$16 sps:$4 sm:$0xff]   ;;  %v8468_v24 = vld [vmem:[%s11938_s1 + $0x664] ss:$16 sps:$4 sm:$0xff]  }
  0xac   : > { %2239 = vmatprep.subr.bf16.mxu0 %v8414_v25  ;;  %2325 = vmatprep.subr.bf16.mxu1 %v8417_v26  ;;  %v8471_v25 = vld [vmem:[%s11938_s1 + $0x66c] ss:$16 sps:$4 sm:$0xff]   ;;  %v8466_v26 = vld [vmem:[%s11938_s1 + $0x660] ss:$16 sps:$4 sm:$0xff]  }
  0xaf   : > { %2240 = vmatpush1.bf16.msra.mxu0 %v8412_v27  ;;  %2326 = vmatpush1.bf16.msra.mxu1 %v8415_v28  ;;  %v8469_v27 = vld [vmem:[%s11938_s1 + $0x668] ss:$16 sps:$4 sm:$0xff]   ;;  %v8474_v28 = vld [vmem:[%s11938_s1 + $0x684] ss:$16 sps:$4 sm:$0xff]  }
  0xb0   : > { %2241 = vmatprep.subr.bf16.mxu0 %v8420_v29  ;;  %2327 = vmatprep.subr.bf16.mxu1 %v8423_v30  ;;  %v8477_v29 = vld [vmem:[%s11938_s1 + $0x68c] ss:$16 sps:$4 sm:$0xff]   ;;  %v8472_v30 = vld [vmem:[%s11938_s1 + $0x680] ss:$16 sps:$4 sm:$0xff]  }
  0xb3   : > { %2242 = vmatpush1.bf16.msra.mxu0 %v8418_v31  ;;  %2328 = vmatpush1.bf16.msra.mxu1 %v8421_v33  ;;  %v8475_v31 = vld [vmem:[%s11938_s1 + $0x688] ss:$16 sps:$4 sm:$0xff]   ;;  %v8480_v33 = vld [vmem:[%s11938_s1 + $0x6a4] ss:$16 sps:$4 sm:$0xff]  }
  0xb4   : > { %2243 = vmatprep.subr.bf16.mxu0 %v8426_v34  ;;  %2329 = vmatprep.subr.bf16.mxu1 %v8429_v35  ;;  %v8483_v34 = vld [vmem:[%s11938_s1 + $0x6ac] ss:$16 sps:$4 sm:$0xff]   ;;  %v8478_v35 = vld [vmem:[%s11938_s1 + $0x6a0] ss:$16 sps:$4 sm:$0xff]  }
  0xb7   : > { %2244 = vmatpush1.bf16.msra.mxu0 %v8424_v37  ;;  %2330 = vmatpush1.bf16.msra.mxu1 %v8427_v38  ;;  %v8486_v37 = vld [vmem:[%s11938_s1 + $0x6c4] ss:$16 sps:$4 sm:$0xff]   ;;  %v8489_v38 = vld [vmem:[%s11938_s1 + $0x6cc] ss:$16 sps:$4 sm:$0xff]  }
  0xb8   : > { %2245 = vmatprep.subr.bf16.mxu0 %v8432_v39  ;;  %2331 = vmatprep.subr.bf16.mxu1 %v8435_v40  ;;  %v8484_v39 = vld [vmem:[%s11938_s1 + $0x6c0] ss:$16 sps:$4 sm:$0xff]   ;;  %v8487_v40 = vld [vmem:[%s11938_s1 + $0x6c8] ss:$16 sps:$4 sm:$0xff]  }
  0xbb   : > { %2246 = vmatpush1.bf16.msra.mxu0 %v8430_v44  ;;  %2332 = vmatpush1.bf16.msra.mxu1 %v8433_v46  ;;  %v8493_v44 = vld [vmem:[%s11938_s1 + $0x6e8] ss:$16 sps:$4 sm:$0xff]   ;;  %v8501_v46 = vld [vmem:[%s11938_s1 + $0x70c] ss:$16 sps:$4 sm:$0xff]  }
  0xbc   : > { %2247 = vmatprep.subr.bf16.mxu0 %v8438_v50  ;;  %2333 = vmatprep.subr.bf16.mxu1 %v8441_v51  ;;  %v8507_v50 = vld [vmem:[%s11938_s1 + $0x72c] ss:$16 sps:$4 sm:$0xff]   ;;  %v8502_v51 = vld [vmem:[%s11938_s1 + $0x720] ss:$16 sps:$4 sm:$0xff]  }
  0xbf   : > { %2248 = vmatpush1.bf16.msra.mxu0 %v8436_v52  ;;  %2334 = vmatpush1.bf16.msra.mxu1 %v8439_v55  ;;  %v8505_v52 = vld [vmem:[%s11938_s1 + $0x728] ss:$16 sps:$4 sm:$0xff]   ;;  %v8508_v55 = vld [vmem:[%s11938_s1 + $0x740] ss:$16 sps:$4 sm:$0xff]  }
  0xc0   : > { %2249 = vmatprep.subr.bf16.mxu0 %v8444_v59  ;;  %2335 = vmatprep.subr.bf16.mxu1 %v8447_v61  ;;  %v8514_v59 = vld [vmem:[%s11938_s1 + $0x760] ss:$16 sps:$4 sm:$0xff]   ;;  %v8517_v61 = vld [vmem:[%s11938_s1 + $0x768] ss:$16 sps:$4 sm:$0xff]  }
  0xc3   : > { %2250 = vmatpush1.bf16.msra.mxu0 %v8442_v3  ;;  %2336 = vmatpush1.bf16.msra.mxu1 %v8445_v4  ;;  %v8520_v3 = vld [vmem:[%s11938_s1 + $0x780] ss:$16 sps:$4 sm:$0xff]   ;;  %v8523_v4 = vld [vmem:[%s11938_s1 + $0x788] ss:$16 sps:$4 sm:$0xff]  }
  0xc4   : > { %2262 = vmatprep.subr.bf16.mxu0 %v8450_v7  ;;  %2348 = vmatprep.subr.bf16.mxu1 %v8453_v8  ;;  %v1391_v7 = vpack.c.bf16 %v9847_v32, %v1379_v2  ;;  %v8531_v8 = vld [vmem:[%s11938_s1 + $0x7ac] ss:$16 sps:$4 sm:$0xff]   ;;  %v8588_v2 = vld [vmem:[%s11938_s1 + $0x8e4] ss:$16 sps:$4 sm:$0xff]  }
  0xc6   : > { %2252 = vmatmul.mubr.bf16.vlgmr.msra.gmra.mrb[0].mxu0 %v1538_v13  ;;  %2338 = vmatmul.mubr.bf16.vlgmr.msra.gmra.mrb[0].mxu1 %v1538_v13  ;;  %v1554_v13 = vshll.u32 %v1391_v7, 16 }
  0xc7   : > { %2263 = vmatpush1.bf16.msra.mxu0 %v8448_v11  ;;  %2349 = vmatpush1.bf16.msra.mxu1 %v8451_v12  ;;  %v8529_v11 = vld [vmem:[%s11938_s1 + $0x7a8] ss:$16 sps:$4 sm:$0xff]   ;;  %v8534_v12 = vld [vmem:[%s11938_s1 + $0x7c4] ss:$16 sps:$4 sm:$0xff]  }
  0xc8   : > { %2264 = vmatprep.subr.bf16.mxu0 %v8456_v15  ;;  %2350 = vmatprep.subr.bf16.mxu1 %v8459_v16  ;;  %v8537_v15 = vld [vmem:[%s11938_s1 + $0x7cc] ss:$16 sps:$4 sm:$0xff]   ;;  %v8532_v16 = vld [vmem:[%s11938_s1 + $0x7c0] ss:$16 sps:$4 sm:$0xff]  }
  0xc9   : > { %2294 = vmatprep.mubr.bf16.mxu0 %v1574_v17  ;;  %2380 = vmatprep.mubr.bf16.mxu1 %v1574_v17  ;;  %v8535_v17 = vld [vmem:[%s11938_s1 + $0x7c8] ss:$16 sps:$4 sm:$0xff]  }
  0xcb   : > { %2265 = vmatpush1.bf16.msra.mxu0 %v8454_v18  ;;  %2351 = vmatpush1.bf16.msra.mxu1 %v8457_v19  ;;  %v8540_v18 = vld [vmem:[%s11938_s1 + $0x7e4] ss:$16 sps:$4 sm:$0xff]   ;;  %v1552_v19 = vshrl.u32 %v1391_v7, 16  ;;  %v8597_v7 = vld [vmem:[%s11938_s1 + $0x90c] ss:$16 sps:$4 sm:$0xff]  }
  0xcc   : > { %2266 = vmatprep.subr.bf16.mxu0 %v8462_v20  ;;  %2352 = vmatprep.subr.bf16.mxu1 %v8465_v21  ;;  %v1559_v20 = vshll.u32 %v1395_v10, 16  ;;  %v1556_v21 = vrot.slane %v1554_v13, 1  ;;  %v8600_v10 = vld [vmem:[%s11938_s1 + $0x924] ss:$16 sps:$4 sm:$0xff]   ;;  %v8601_v13 = vld [vmem:[%s11938_s1 + $0x928] ss:$16 sps:$4 sm:$0xff]  }
  0xcf   : > { %2267 = vmatpush1.bf16.msra.mxu0 %v8460_v22  ;;  %2353 = vmatpush1.bf16.msra.mxu1 %v8463_v23  ;;  %v2400_v22 = vld [vmem:[#allocation2 + $0x8] sm:$0xfc]  ;;  %v2404_v23 = vld [vmem:[#allocation2 + $0x48] sm:$0x3] }
  0xd0   : > { %2268 = vmatprep.subr.bf16.mxu0 %v8468_v24  ;;  %2354 = vmatprep.subr.bf16.mxu1 %v8471_v25  ;;  %v8543_v24 = vld [vmem:[%s11938_s1 + $0x7ec] ss:$16 sps:$4 sm:$0xff]   ;;  %v8538_v25 = vld [vmem:[%s11938_s1 + $0x7e0] ss:$16 sps:$4 sm:$0xff]  }
  0xd3   : > { %2269 = vmatpush1.bf16.msra.mxu0 %v8466_v26  ;;  %2355 = vmatpush1.bf16.msra.mxu1 %v8469_v27  ;;  %v2408_v26 = vpack.c.bf16 %v9592_v0, %v2400_v22  ;;  %v2412_v27 = vpack.c.bf16 %v2404_v23, %v2404_v23  ;;  %v8544_v0 = vld [vmem:[%s11938_s1 + $0x800] ss:$16 sps:$4 sm:$0xff]   ;;  %v8613_v22 = vld [vmem:[%s11938_s1 + $0x968] ss:$16 sps:$4 sm:$0xff]   ;;  %v8618_v23 = vld [vmem:[%s11938_s1 + $0x984] ss:$16 sps:$4 sm:$0xff]  }
  0xd4   : > { %2270 = vmatprep.subr.bf16.mxu0 %v8474_v28  ;;  %2356 = vmatprep.subr.bf16.mxu1 %v8477_v29  ;;  %v8541_v28 = vld [vmem:[%s11938_s1 + $0x7e8] ss:$16 sps:$4 sm:$0xff]   ;;  %v8546_v29 = vld [vmem:[%s11938_s1 + $0x804] ss:$16 sps:$4 sm:$0xff]  }
  0xd7   : > { %2271 = vmatpush1.bf16.msra.mxu0 %v8472_v30  ;;  %2357 = vmatpush1.bf16.msra.mxu1 %v8475_v31  ;;  %v1557_v30 = vor.u32 %v1556_v21, %v1552_v19  ;;  %v1561_v31 = vrot.slane %v1559_v20, 1  ;;  %v8612_v19 = vld [vmem:[%s11938_s1 + $0x964] ss:$16 sps:$4 sm:$0xff]   ;;  %v8615_v20 = vld [vmem:[%s11938_s1 + $0x96c] ss:$16 sps:$4 sm:$0xff]  }
  0xd8   : > { %2272 = vmatprep.subr.bf16.mxu0 %v8480_v33  ;;  %2358 = vmatprep.subr.bf16.mxu1 %v8483_v34  ;;  %v8549_v33 = vld [vmem:[%s11938_s1 + $0x80c] ss:$16 sps:$4 sm:$0xff]   ;;  %v2556_v34 = vrot.slane %v2408_v26, 1  ;;  %v8610_v21 = vld [vmem:[%s11938_s1 + $0x960] ss:$16 sps:$4 sm:$0xff]  }
  0xd9   : > { %v8619_v26 = vld [vmem:[%s11938_s1 + $0x988] ss:$16 sps:$4 sm:$0xff]  }
  0xdb   : > { %2273 = vmatpush1.bf16.msra.mxu0 %v8478_v35  ;;  %2359 = vmatpush1.bf16.msra.mxu1 %v8481_v36  ;;  %v2557_v35 = vrot.slane %v2412_v27, 1  ;;  %v8547_v36 = vld [vmem:[%s11938_s1 + $0x808] ss:$16 sps:$4 sm:$0xff]   ;;  %v8624_v27 = vld [vmem:[%s11938_s1 + $0x9a4] ss:$16 sps:$4 sm:$0xff]  }
  0xdc   : > { %2274 = vmatprep.subr.bf16.mxu0 %v8486_v37  ;;  %2360 = vmatprep.subr.bf16.mxu1 %v8489_v38  ;;  %v1562_v37 = vsel %vm1526_vm2, %v1557_v30, %v1561_v31  ;;  %v8552_v38 = vld [vmem:[%s11938_s1 + $0x824] ss:$16 sps:$4 sm:$0xff]   ;;  %v8625_v30 = vld [vmem:[%s11938_s1 + $0x9a8] ss:$16 sps:$4 sm:$0xff]  }
  0xdd   : > { %v8630_v31 = vld [vmem:[%s11938_s1 + $0x9c4] ss:$16 sps:$4 sm:$0xff]  }
  0xdf   : > { %2275 = vmatpush1.bf16.msra.mxu0 %v8484_v39  ;;  %2361 = vmatpush1.bf16.msra.mxu1 %v8487_v40  ;;  %v8555_v39 = vld [vmem:[%s11938_s1 + $0x82c] ss:$16 sps:$4 sm:$0xff]   ;;  %v8550_v40 = vld [vmem:[%s11938_s1 + $0x820] ss:$16 sps:$4 sm:$0xff]  }
  0xe0   : > { %2276 = vmatprep.subr.bf16.mxu0 %v8492_v41  ;;  %2362 = vmatprep.subr.bf16.mxu1 %v8495_v42  ;;  %v2558_v41 = vsel %vm2552_vm3, %v2556_v34, %v2557_v35  ;;  %v8553_v42 = vld [vmem:[%s11938_s1 + $0x828] ss:$16 sps:$4 sm:$0xff]   ;;  %v2403_v34 = vld [vmem:[#allocation2 + $0x40] sm:$0x3] }
  0xe1   : > { %v8628_v35 = vld [vmem:[%s11938_s1 + $0x9c0] ss:$16 sps:$4 sm:$0xff]  }
  0xe3   : > { %2277 = vmatpush1.bf16.msra.mxu0 %v8490_v43  ;;  %2363 = vmatpush1.bf16.msra.mxu1 %v8493_v44  ;;  %v8558_v43 = vld [vmem:[%s11938_s1 + $0x844] ss:$16 sps:$4 sm:$0xff]   ;;  %v8561_v44 = vld [vmem:[%s11938_s1 + $0x84c] ss:$16 sps:$4 sm:$0xff]  }
  0xe4   : > { %2278 = vmatprep.subr.bf16.mxu0 %v8498_v45  ;;  %2364 = vmatprep.subr.bf16.mxu1 %v8501_v46  ;;  %v8556_v45 = vld [vmem:[%s11938_s1 + $0x840] ss:$16 sps:$4 sm:$0xff]   ;;  %v8559_v46 = vld [vmem:[%s11938_s1 + $0x848] ss:$16 sps:$4 sm:$0xff]  }
  0xe7   : > { %2279 = vmatpush1.bf16.msra.mxu0 %v8496_v47  ;;  %2365 = vmatpush1.bf16.msra.mxu1 %v8499_v48  ;;  %v8564_v47 = vld [vmem:[%s11938_s1 + $0x864] ss:$16 sps:$4 sm:$0xff]   ;;  %v8567_v48 = vld [vmem:[%s11938_s1 + $0x86c] ss:$16 sps:$4 sm:$0xff]  }
  0xe8   : > { %2280 = vmatprep.subr.bf16.mxu0 %v8504_v49  ;;  %2366 = vmatprep.subr.bf16.mxu1 %v8507_v50  ;;  %v8562_v49 = vld [vmem:[%s11938_s1 + $0x860] ss:$16 sps:$4 sm:$0xff]   ;;  %v8565_v50 = vld [vmem:[%s11938_s1 + $0x868] ss:$16 sps:$4 sm:$0xff]  }
  0xeb   : > { %2281 = vmatpush1.bf16.msra.mxu0 %v8502_v51  ;;  %2367 = vmatpush1.bf16.msra.mxu1 %v8505_v52  ;;  %v8570_v51 = vld [vmem:[%s11938_s1 + $0x884] ss:$16 sps:$4 sm:$0xff]   ;;  %v8573_v52 = vld [vmem:[%s11938_s1 + $0x88c] ss:$16 sps:$4 sm:$0xff]  }
  0xec   : > { %2282 = vmatprep.subr.bf16.mxu0 %v8510_v53  ;;  %2368 = vmatprep.subr.bf16.mxu1 %v8513_v54  ;;  %v8568_v53 = vld [vmem:[%s11938_s1 + $0x880] ss:$16 sps:$4 sm:$0xff]   ;;  %v8571_v54 = vld [vmem:[%s11938_s1 + $0x888] ss:$16 sps:$4 sm:$0xff]  }
  0xef   : > { %2283 = vmatpush1.bf16.msra.mxu0 %v8508_v55  ;;  %2369 = vmatpush1.bf16.msra.mxu1 %v8511_v56  ;;  %v8576_v55 = vld [vmem:[%s11938_s1 + $0x8a4] ss:$16 sps:$4 sm:$0xff]   ;;  %v8579_v56 = vld [vmem:[%s11938_s1 + $0x8ac] ss:$16 sps:$4 sm:$0xff]  }
  0xf0   : > { %2284 = vmatprep.subr.bf16.mxu0 %v8516_v57  ;;  %2370 = vmatprep.subr.bf16.mxu1 %v8519_v58  ;;  %v8574_v57 = vld [vmem:[%s11938_s1 + $0x8a0] ss:$16 sps:$4 sm:$0xff]   ;;  %v8577_v58 = vld [vmem:[%s11938_s1 + $0x8a8] ss:$16 sps:$4 sm:$0xff]  }
  0xf3   : > { %2285 = vmatpush1.bf16.msra.mxu0 %v8514_v59  ;;  %2371 = vmatpush1.bf16.msra.mxu1 %v8517_v61  ;;  %v8582_v59 = vld [vmem:[%s11938_s1 + $0x8c4] ss:$16 sps:$4 sm:$0xff]   ;;  %v8585_v61 = vld [vmem:[%s11938_s1 + $0x8cc] ss:$16 sps:$4 sm:$0xff]  }
  0xf4   : > { %2286 = vmatprep.subr.bf16.mxu0 %v8522_v62  ;;  %2372 = vmatprep.subr.bf16.mxu1 %v8525_v63  ;;  %v8580_v62 = vld [vmem:[%s11938_s1 + $0x8c0] ss:$16 sps:$4 sm:$0xff]   ;;  %v8583_v63 = vld [vmem:[%s11938_s1 + $0x8c8] ss:$16 sps:$4 sm:$0xff]  }
  0xf7   : > { %2287 = vmatpush1.bf16.msra.mxu0 %v8520_v3  ;;  %2373 = vmatpush1.bf16.msra.mxu1 %v8523_v4  ;;  %v8591_v3 = vld [vmem:[%s11938_s1 + $0x8ec] ss:$16 sps:$4 sm:$0xff]   ;;  %v8586_v4 = vld [vmem:[%s11938_s1 + $0x8e0] ss:$16 sps:$4 sm:$0xff]  }
  0xf8   : > { %2288 = vmatprep.subr.bf16.mxu0 %v8528_v5  ;;  %2374 = vmatprep.subr.bf16.mxu1 %v8531_v8  ;;  %v8589_v5 = vld [vmem:[%s11938_s1 + $0x8e8] ss:$16 sps:$4 sm:$0xff]   ;;  %v8592_v8 = vld [vmem:[%s11938_s1 + $0x900] ss:$16 sps:$4 sm:$0xff]  }
  0xfb   : > { %2289 = vmatpush1.bf16.msra.mxu0 %v8526_v9  ;;  %2375 = vmatpush1.bf16.msra.mxu1 %v8529_v11  ;;  %v8595_v9 = vld [vmem:[%s11938_s1 + $0x908] ss:$16 sps:$4 sm:$0xff]   ;;  %v8603_v11 = vld [vmem:[%s11938_s1 + $0x92c] ss:$16 sps:$4 sm:$0xff]  }
  0xfc   : > { %2290 = vmatprep.subr.bf16.mxu0 %v8534_v12  ;;  %2376 = vmatprep.subr.bf16.mxu1 %v8537_v15  ;;  %v8598_v12 = vld [vmem:[%s11938_s1 + $0x920] ss:$16 sps:$4 sm:$0xff]   ;;  %v8606_v15 = vld [vmem:[%s11938_s1 + $0x944] ss:$16 sps:$4 sm:$0xff]  }
  0xff   : > { %2291 = vmatpush1.bf16.msra.mxu0 %v8532_v16  ;;  %2377 = vmatpush1.bf16.msra.mxu1 %v8535_v17  ;;  %v8609_v16 = vld [vmem:[%s11938_s1 + $0x94c] ss:$16 sps:$4 sm:$0xff]   ;;  %v8604_v17 = vld [vmem:[%s11938_s1 + $0x940] ss:$16 sps:$4 sm:$0xff]  }
 0x100   : > { %2292 = vmatprep.subr.bf16.mxu0 %v8540_v18  ;;  %2378 = vmatprep.subr.bf16.mxu1 %v8543_v24  ;;  %v8607_v18 = vld [vmem:[%s11938_s1 + $0x948] ss:$16 sps:$4 sm:$0xff]   ;;  %v8621_v24 = vld [vmem:[%s11938_s1 + $0x98c] ss:$16 sps:$4 sm:$0xff]  }
 0x103   : > { %2293 = vmatpush1.bf16.msra.mxu0 %v8538_v25  ;;  %2379 = vmatpush1.bf16.msra.mxu1 %v8541_v28  ;;  %v8616_v25 = vld [vmem:[%s11938_s1 + $0x980] ss:$16 sps:$4 sm:$0xff]   ;;  %v8627_v28 = vld [vmem:[%s11938_s1 + $0x9ac] ss:$16 sps:$4 sm:$0xff]  }
 0x104   : > { %3209 = vmatprep.subr.bf16.mxu0 %v8546_v29  ;;  %3295 = vmatprep.subr.bf16.mxu1 %v8549_v33  ;;  %v8622_v29 = vld [vmem:[%s11938_s1 + $0x9a0] ss:$16 sps:$4 sm:$0xff]   ;;  %v8633_v33 = vld [vmem:[%s11938_s1 + $0x9cc] ss:$16 sps:$4 sm:$0xff]  }
 0x106   : > { %2295 = vmatmul.mubr.bf16.vlgmr.msra.gmra.mrb[0].mxu0 %v1562_v37  ;;  %2381 = vmatmul.mubr.bf16.vlgmr.msra.gmra.mrb[0].mxu1 %v1562_v37  ;;  %v2402_v37 = vld [vmem:[#allocation2 + $0x18] sm:$0xfc] }
 0x107   : > { %3210 = vmatpush1.bf16.msra.mxu0 %v8544_v0  ;;  %3296 = vmatpush1.bf16.msra.mxu1 %v8547_v36  ;;  %v2399_v0 = vld [vmem:[#allocation2] sm:$0xfc]  ;;  %v8631_v36 = vld [vmem:[%s11938_s1 + $0x9c8] ss:$16 sps:$4 sm:$0xff]  }
 0x108   : > { %3211 = vmatprep.subr.bf16.mxu0 %v8552_v38  ;;  %3297 = vmatprep.subr.bf16.mxu1 %v8555_v39  ;;  %v2406_v38 = vld [vmem:[#allocation2 + $0x58] sm:$0x3]  ;;  %v8636_v39 = vld [vmem:[%s11938_s1 + $0x9e4] ss:$16 sps:$4 sm:$0xff]  }
 0x109   : > { %3241 = vmatprep.mubr.bf16.mxu0 %v2558_v41  ;;  %3327 = vmatprep.mubr.bf16.mxu1 %v2558_v41  ;;  %v2407_v41 = vpack.c.bf16 %v9626_v14, %v2399_v0  ;;  %v2410_v14 = vpack.c.bf16 %v9749_v60, %v2402_v37  ;;  %v8651_v60 = vld [vmem:[%s11938_s1 + $0xa2c] ss:$16 sps:$4 sm:$0xff]   ;;  %v8700_v0 = vld [vmem:[%s11938_s1 + $0xb40] ss:$16 sps:$4 sm:$0xff]  }
 0x10a   : > { %v8706_v37 = vld [vmem:[%s11938_s1 + $0xb60] ss:$16 sps:$4 sm:$0xff]  }
 0x10b   : > { %3212 = vmatpush1.bf16.msra.mxu0 %v8550_v40  ;;  %3298 = vmatpush1.bf16.msra.mxu1 %v8553_v42  ;;  %v8639_v40 = vld [vmem:[%s11938_s1 + $0x9ec] ss:$16 sps:$4 sm:$0xff]   ;;  %v2411_v42 = vpack.c.bf16 %v2403_v34, %v2403_v34  ;;  %v8703_v34 = vld [vmem:[%s11938_s1 + $0xb48] ss:$16 sps:$4 sm:$0xff]  }
 0x10c   : > { %3213 = vmatprep.subr.bf16.mxu0 %v8558_v43  ;;  %3299 = vmatprep.subr.bf16.mxu1 %v8561_v44  ;;  %v8634_v43 = vld [vmem:[%s11938_s1 + $0x9e0] ss:$16 sps:$4 sm:$0xff]   ;;  %v8637_v44 = vld [vmem:[%s11938_s1 + $0x9e8] ss:$16 sps:$4 sm:$0xff]  }
 0x10f   : > { %3214 = vmatpush1.bf16.msra.mxu0 %v8556_v45  ;;  %3300 = vmatpush1.bf16.msra.mxu1 %v8559_v46  ;;  %v8642_v45 = vld [vmem:[%s11938_s1 + $0xa04] ss:$16 sps:$4 sm:$0xff]   ;;  %v8645_v46 = vld [vmem:[%s11938_s1 + $0xa0c] ss:$16 sps:$4 sm:$0xff]  }
 0x110   : > { %3215 = vmatprep.subr.bf16.mxu0 %v8564_v47  ;;  %3301 = vmatprep.subr.bf16.mxu1 %v8567_v48  ;;  %v2414_v47 = vpack.c.bf16 %v2406_v38, %v2406_v38  ;;  %v2553_v48 = vrot.slane %v2407_v41, 1  ;;  %v8709_v38 = vld [vmem:[%s11938_s1 + $0xb68] ss:$16 sps:$4 sm:$0xff]   ;;  %v8712_v41 = vld [vmem:[%s11938_s1 + $0xb80] ss:$16 sps:$4 sm:$0xff]  }
 0x113   : > { %3216 = vmatpush1.bf16.msra.mxu0 %v8562_v49  ;;  %3302 = vmatpush1.bf16.msra.mxu1 %v8565_v50  ;;  %v2554_v49 = vrot.slane %v2411_v42, 1  ;;  %v8640_v50 = vld [vmem:[%s11938_s1 + $0xa00] ss:$16 sps:$4 sm:$0xff]   ;;  %v8715_v42 = vld [vmem:[%s11938_s1 + $0xb88] ss:$16 sps:$4 sm:$0xff]  }
 0x114   : > { %3217 = vmatprep.subr.bf16.mxu0 %v8570_v51  ;;  %3303 = vmatprep.subr.bf16.mxu1 %v8573_v52  ;;  %v8643_v51 = vld [vmem:[%s11938_s1 + $0xa08] ss:$16 sps:$4 sm:$0xff]   ;;  %v8648_v52 = vld [vmem:[%s11938_s1 + $0xa24] ss:$16 sps:$4 sm:$0xff]  }
 0x117   : > { %3218 = vmatpush1.bf16.msra.mxu0 %v8568_v53  ;;  %3304 = vmatpush1.bf16.msra.mxu1 %v8571_v54  ;;  %v2562_v53 = vrot.slane %v2410_v14, 1  ;;  %v2563_v54 = vrot.slane %v2414_v47, 1  ;;  %v8726_v14 = vld [vmem:[%s11938_s1 + $0xbc4] ss:$16 sps:$4 sm:$0xff]   ;;  %v8729_v47 = vld [vmem:[%s11938_s1 + $0xbcc] ss:$16 sps:$4 sm:$0xff]  }
 0x118   : > { %3219 = vmatprep.subr.bf16.mxu0 %v8576_v55  ;;  %3305 = vmatprep.subr.bf16.mxu1 %v8579_v56  ;;  %v2555_v55 = vsel %vm2552_vm3, %v2553_v48, %v2554_v49  ;;  %v8646_v56 = vld [vmem:[%s11938_s1 + $0xa20] ss:$16 sps:$4 sm:$0xff]  }
 0x119   : > { %v2401_v48 = vld [vmem:[#allocation2 + $0x10] sm:$0xfc]  ;;  %v2405_v49 = vld [vmem:[#allocation2 + $0x50] sm:$0x3] }
 0x11b   : > { %3220 = vmatpush1.bf16.msra.mxu0 %v8574_v57  ;;  %3306 = vmatpush1.bf16.msra.mxu1 %v8577_v58  ;;  %v8649_v57 = vld [vmem:[%s11938_s1 + $0xa28] ss:$16 sps:$4 sm:$0xff]   ;;  %v8654_v58 = vld [vmem:[%s11938_s1 + $0xa44] ss:$16 sps:$4 sm:$0xff]  }
 0x11c   : > { %3221 = vmatprep.subr.bf16.mxu0 %v8582_v59  ;;  %3307 = vmatprep.subr.bf16.mxu1 %v8585_v61  ;;  %v8657_v59 = vld [vmem:[%s11938_s1 + $0xa4c] ss:$16 sps:$4 sm:$0xff]   ;;  %v2564_v61 = vsel %vm2552_vm3, %v2562_v53, %v2563_v54  ;;  %v2409_v53 = vpack.c.bf16 %v9847_v32, %v2401_v48  ;;  %v2413_v54 = vpack.c.bf16 %v2405_v49, %v2405_v49  ;;  %v8808_v48 = vld [vmem:[%s11940_s3 + $0x180] ss:$16 sps:$4 sm:$0xff]   ;;  %v8811_v49 = vld [vmem:[%s11940_s3 + $0x188] ss:$16 sps:$4 sm:$0xff]  }
 0x11e   : > { %v2559_v32 = vrot.slane %v2409_v53, 1  ;;  %v8822_v53 = vld [vmem:[%s11940_s3 + $0x1c4] ss:$16 sps:$4 sm:$0xff]  }
 0x11f   : > { %3222 = vmatpush1.bf16.msra.mxu0 %v8580_v62  ;;  %3308 = vmatpush1.bf16.msra.mxu1 %v8583_v63  ;;  %v8652_v62 = vld [vmem:[%s11938_s1 + $0xa40] ss:$16 sps:$4 sm:$0xff]   ;;  %v8655_v63 = vld [vmem:[%s11938_s1 + $0xa48] ss:$16 sps:$4 sm:$0xff]  }
 0x120   : > { %3223 = vmatprep.subr.bf16.mxu0 %v8588_v2  ;;  %3309 = vmatprep.subr.bf16.mxu1 %v8591_v3  ;;  %v8660_v2 = vld [vmem:[%s11938_s1 + $0xa64] ss:$16 sps:$4 sm:$0xff]   ;;  %v8663_v3 = vld [vmem:[%s11938_s1 + $0xa6c] ss:$16 sps:$4 sm:$0xff]  }
 0x123   : > { %3224 = vmatpush1.bf16.msra.mxu0 %v8586_v4  ;;  %3310 = vmatpush1.bf16.msra.mxu1 %v8589_v5  ;;  %v8658_v4 = vld [vmem:[%s11938_s1 + $0xa60] ss:$16 sps:$4 sm:$0xff]   ;;  %v8661_v5 = vld [vmem:[%s11938_s1 + $0xa68] ss:$16 sps:$4 sm:$0xff]  }
 0x124   : > { %3225 = vmatprep.subr.bf16.mxu0 %v8594_v6  ;;  %3311 = vmatprep.subr.bf16.mxu1 %v8597_v7  ;;  %v8666_v6 = vld [vmem:[%s11938_s1 + $0xa84] ss:$16 sps:$4 sm:$0xff]   ;;  %v8669_v7 = vld [vmem:[%s11938_s1 + $0xa8c] ss:$16 sps:$4 sm:$0xff]  }
 0x127   : > { %3226 = vmatpush1.bf16.msra.mxu0 %v8592_v8  ;;  %3312 = vmatpush1.bf16.msra.mxu1 %v8595_v9  ;;  %v8664_v8 = vld [vmem:[%s11938_s1 + $0xa80] ss:$16 sps:$4 sm:$0xff]   ;;  %v8667_v9 = vld [vmem:[%s11938_s1 + $0xa88] ss:$16 sps:$4 sm:$0xff]  }
 0x128   : > { %3227 = vmatprep.subr.bf16.mxu0 %v8600_v10  ;;  %3313 = vmatprep.subr.bf16.mxu1 %v8603_v11  ;;  %v8672_v10 = vld [vmem:[%s11938_s1 + $0xaa4] ss:$16 sps:$4 sm:$0xff]   ;;  %v8675_v11 = vld [vmem:[%s11938_s1 + $0xaac] ss:$16 sps:$4 sm:$0xff]  }
 0x12b   : > { %3228 = vmatpush1.bf16.msra.mxu0 %v8598_v12  ;;  %3314 = vmatpush1.bf16.msra.mxu1 %v8601_v13  ;;  %v8670_v12 = vld [vmem:[%s11938_s1 + $0xaa0] ss:$16 sps:$4 sm:$0xff]   ;;  %v8673_v13 = vld [vmem:[%s11938_s1 + $0xaa8] ss:$16 sps:$4 sm:$0xff]  }
 0x12c   : > { %3229 = vmatprep.subr.bf16.mxu0 %v8606_v15  ;;  %3315 = vmatprep.subr.bf16.mxu1 %v8609_v16  ;;  %v8678_v15 = vld [vmem:[%s11938_s1 + $0xac4] ss:$16 sps:$4 sm:$0xff]   ;;  %v8681_v16 = vld [vmem:[%s11938_s1 + $0xacc] ss:$16 sps:$4 sm:$0xff]  }
 0x12f   : > { %3230 = vmatpush1.bf16.msra.mxu0 %v8604_v17  ;;  %3316 = vmatpush1.bf16.msra.mxu1 %v8607_v18  ;;  %v8676_v17 = vld [vmem:[%s11938_s1 + $0xac0] ss:$16 sps:$4 sm:$0xff]   ;;  %v8679_v18 = vld [vmem:[%s11938_s1 + $0xac8] ss:$16 sps:$4 sm:$0xff]  }
 0x130   : > { %3231 = vmatprep.subr.bf16.mxu0 %v8612_v19  ;;  %3317 = vmatprep.subr.bf16.mxu1 %v8615_v20  ;;  %v8684_v19 = vld [vmem:[%s11938_s1 + $0xae4] ss:$16 sps:$4 sm:$0xff]   ;;  %v8687_v20 = vld [vmem:[%s11938_s1 + $0xaec] ss:$16 sps:$4 sm:$0xff]  }
 0x133   : > { %3232 = vmatpush1.bf16.msra.mxu0 %v8610_v21  ;;  %3318 = vmatpush1.bf16.msra.mxu1 %v8613_v22  ;;  %v8682_v21 = vld [vmem:[%s11938_s1 + $0xae0] ss:$16 sps:$4 sm:$0xff]   ;;  %v8685_v22 = vld [vmem:[%s11938_s1 + $0xae8] ss:$16 sps:$4 sm:$0xff]  }
 0x134   : > { %3233 = vmatprep.subr.bf16.mxu0 %v8618_v23  ;;  %3319 = vmatprep.subr.bf16.mxu1 %v8621_v24  ;;  %v8690_v23 = vld [vmem:[%s11938_s1 + $0xb04] ss:$16 sps:$4 sm:$0xff]   ;;  %v8693_v24 = vld [vmem:[%s11938_s1 + $0xb0c] ss:$16 sps:$4 sm:$0xff]  }
 0x137   : > { %3234 = vmatpush1.bf16.msra.mxu0 %v8616_v25  ;;  %3320 = vmatpush1.bf16.msra.mxu1 %v8619_v26  ;;  %v8688_v25 = vld [vmem:[%s11938_s1 + $0xb00] ss:$16 sps:$4 sm:$0xff]   ;;  %v8691_v26 = vld [vmem:[%s11938_s1 + $0xb08] ss:$16 sps:$4 sm:$0xff]  }
 0x138   : > { %3235 = vmatprep.subr.bf16.mxu0 %v8624_v27  ;;  %3321 = vmatprep.subr.bf16.mxu1 %v8627_v28  ;;  %v8696_v27 = vld [vmem:[%s11938_s1 + $0xb24] ss:$16 sps:$4 sm:$0xff]   ;;  %v8699_v28 = vld [vmem:[%s11938_s1 + $0xb2c] ss:$16 sps:$4 sm:$0xff]  }
 0x13b   : > { %3236 = vmatpush1.bf16.msra.mxu0 %v8622_v29  ;;  %3322 = vmatpush1.bf16.msra.mxu1 %v8625_v30  ;;  %v8694_v29 = vld [vmem:[%s11938_s1 + $0xb20] ss:$16 sps:$4 sm:$0xff]   ;;  %v8697_v30 = vld [vmem:[%s11938_s1 + $0xb28] ss:$16 sps:$4 sm:$0xff]  }
 0x13c   : > { %3237 = vmatprep.subr.bf16.mxu0 %v8630_v31  ;;  %3323 = vmatprep.subr.bf16.mxu1 %v8633_v33  ;;  %v8702_v31 = vld [vmem:[%s11938_s1 + $0xb44] ss:$16 sps:$4 sm:$0xff]   ;;  %v8705_v33 = vld [vmem:[%s11938_s1 + $0xb4c] ss:$16 sps:$4 sm:$0xff]  }
 0x13f   : > { %3238 = vmatpush1.bf16.msra.mxu0 %v8628_v35  ;;  %3324 = vmatpush1.bf16.msra.mxu1 %v8631_v36  ;;  %v8708_v35 = vld [vmem:[%s11938_s1 + $0xb64] ss:$16 sps:$4 sm:$0xff]   ;;  %v8711_v36 = vld [vmem:[%s11938_s1 + $0xb6c] ss:$16 sps:$4 sm:$0xff]  }
 0x140   : > { %3239 = vmatprep.subr.bf16.mxu0 %v8636_v39  ;;  %3325 = vmatprep.subr.bf16.mxu1 %v8639_v40  ;;  %v8714_v39 = vld [vmem:[%s11938_s1 + $0xb84] ss:$16 sps:$4 sm:$0xff]   ;;  %v8717_v40 = vld [vmem:[%s11938_s1 + $0xb8c] ss:$16 sps:$4 sm:$0xff]  }
 0x143   : > { %3240 = vmatpush1.bf16.msra.mxu0 %v8634_v43  ;;  %3326 = vmatpush1.bf16.msra.mxu1 %v8637_v44  ;;  %v8720_v43 = vld [vmem:[%s11938_s1 + $0xba4] ss:$16 sps:$4 sm:$0xff]   ;;  %v8723_v44 = vld [vmem:[%s11938_s1 + $0xbac] ss:$16 sps:$4 sm:$0xff]  }
 0x144   : > { %3252 = vmatprep.subr.bf16.mxu0 %v8642_v45  ;;  %3338 = vmatprep.subr.bf16.mxu1 %v8645_v46  ;;  %v8718_v45 = vld [vmem:[%s11938_s1 + $0xba0] ss:$16 sps:$4 sm:$0xff]   ;;  %v8721_v46 = vld [vmem:[%s11938_s1 + $0xba8] ss:$16 sps:$4 sm:$0xff]  }
 0x146   : > { %3242 = vmatmul.mubr.bf16.vlgmr.msra.gmra.mrb[0].mxu0 %v2555_v55  ;;  %3328 = vmatmul.mubr.bf16.vlgmr.msra.gmra.mrb[0].mxu1 %v2555_v55  ;;  %v8730_v55 = vld [vmem:[%s11938_s1 + $0xbe0] ss:$16 sps:$4 sm:$0xff]  }
 0x147   : > { %3253 = vmatpush1.bf16.msra.mxu0 %v8640_v50  ;;  %3339 = vmatpush1.bf16.msra.mxu1 %v8643_v51  ;;  %v8724_v50 = vld [vmem:[%s11938_s1 + $0xbc0] ss:$16 sps:$4 sm:$0xff]   ;;  %v8727_v51 = vld [vmem:[%s11938_s1 + $0xbc8] ss:$16 sps:$4 sm:$0xff]  }
 0x148   : > { %3254 = vmatprep.subr.bf16.mxu0 %v8648_v52  ;;  %3340 = vmatprep.subr.bf16.mxu1 %v8651_v60  ;;  %v8732_v52 = vld [vmem:[%s11938_s1 + $0xbe4] ss:$16 sps:$4 sm:$0xff]   ;;  %v8735_v60 = vld [vmem:[%s11938_s1 + $0xbec] ss:$16 sps:$4 sm:$0xff]  }
 0x149   : > { %3284 = vmatprep.mubr.bf16.mxu0 %v2564_v61  ;;  %3370 = vmatprep.mubr.bf16.mxu1 %v2564_v61  ;;  %v8736_v61 = vld [vmem:[%s11940_s3] ss:$16 sps:$4 sm:$0xff]  }
 0x14b   : > { %3255 = vmatpush1.bf16.msra.mxu0 %v8646_v56  ;;  %3341 = vmatpush1.bf16.msra.mxu1 %v8649_v57  ;;  %v8733_v56 = vld [vmem:[%s11938_s1 + $0xbe8] ss:$16 sps:$4 sm:$0xff]   ;;  %v8738_v57 = vld [vmem:[%s11940_s3 + $0x4] ss:$16 sps:$4 sm:$0xff]  }
 0x14c   : > { %3256 = vmatprep.subr.bf16.mxu0 %v8654_v58  ;;  %3342 = vmatprep.subr.bf16.mxu1 %v8657_v59  ;;  %v8741_v58 = vld [vmem:[%s11940_s3 + $0xc] ss:$16 sps:$4 sm:$0xff]   ;;  %v2560_v59 = vrot.slane %v2413_v54, 1 }
 0x14d   : > { %v8825_v54 = vld [vmem:[%s11940_s3 + $0x1cc] ss:$16 sps:$4 sm:$0xff]  }
 0x14f   : > { %3257 = vmatpush1.bf16.msra.mxu0 %v8652_v62  ;;  %3343 = vmatpush1.bf16.msra.mxu1 %v8655_v63  ;;  %v8739_v62 = vld [vmem:[%s11940_s3 + $0x8] ss:$16 sps:$4 sm:$0xff]   ;;  %v8744_v63 = vld [vmem:[%s11940_s3 + $0x24] ss:$16 sps:$4 sm:$0xff]  }
 0x150   : > { %3258 = vmatprep.subr.bf16.mxu0 %v8660_v2  ;;  %3344 = vmatprep.subr.bf16.mxu1 %v8663_v3  ;;  %v8747_v2 = vld [vmem:[%s11940_s3 + $0x2c] ss:$16 sps:$4 sm:$0xff]   ;;  %v2561_v3 = vsel %vm2552_vm3, %v2559_v32, %v2560_v59  ;;  %v8829_v32 = vld [vmem:[%s11940_s3 + $0x1e8] ss:$16 sps:$4 sm:$0xff]  }
 0x151   : > { %v8831_v59 = vld [vmem:[%s11940_s3 + $0x1ec] ss:$16 sps:$4 sm:$0xff]  }
 0x153   : > { %3259 = vmatpush1.bf16.msra.mxu0 %v8658_v4  ;;  %3345 = vmatpush1.bf16.msra.mxu1 %v8661_v5  ;;  %v8742_v4 = vld [vmem:[%s11940_s3 + $0x20] ss:$16 sps:$4 sm:$0xff]   ;;  %v8745_v5 = vld [vmem:[%s11940_s3 + $0x28] ss:$16 sps:$4 sm:$0xff]  }
 0x154   : > { %3260 = vmatprep.subr.bf16.mxu0 %v8666_v6  ;;  %3346 = vmatprep.subr.bf16.mxu1 %v8669_v7  ;;  %v8750_v6 = vld [vmem:[%s11940_s3 + $0x44] ss:$16 sps:$4 sm:$0xff]   ;;  %v8753_v7 = vld [vmem:[%s11940_s3 + $0x4c] ss:$16 sps:$4 sm:$0xff]  }
 0x157   : > { %3261 = vmatpush1.bf16.msra.mxu0 %v8664_v8  ;;  %3347 = vmatpush1.bf16.msra.mxu1 %v8667_v9  ;;  %v8748_v8 = vld [vmem:[%s11940_s3 + $0x40] ss:$16 sps:$4 sm:$0xff]   ;;  %v8751_v9 = vld [vmem:[%s11940_s3 + $0x48] ss:$16 sps:$4 sm:$0xff]  }
 0x158   : > { %3262 = vmatprep.subr.bf16.mxu0 %v8672_v10  ;;  %3348 = vmatprep.subr.bf16.mxu1 %v8675_v11  ;;  %v8756_v10 = vld [vmem:[%s11940_s3 + $0x64] ss:$16 sps:$4 sm:$0xff]   ;;  %v8759_v11 = vld [vmem:[%s11940_s3 + $0x6c] ss:$16 sps:$4 sm:$0xff]  }
 0x15b   : > { %3263 = vmatpush1.bf16.msra.mxu0 %v8670_v12  ;;  %3349 = vmatpush1.bf16.msra.mxu1 %v8673_v13  ;;  %v8754_v12 = vld [vmem:[%s11940_s3 + $0x60] ss:$16 sps:$4 sm:$0xff]   ;;  %v8757_v13 = vld [vmem:[%s11940_s3 + $0x68] ss:$16 sps:$4 sm:$0xff]  }
 0x15c   : > { %3264 = vmatprep.subr.bf16.mxu0 %v8678_v15  ;;  %3350 = vmatprep.subr.bf16.mxu1 %v8681_v16  ;;  %v8762_v15 = vld [vmem:[%s11940_s3 + $0x84] ss:$16 sps:$4 sm:$0xff]   ;;  %v8765_v16 = vld [vmem:[%s11940_s3 + $0x8c] ss:$16 sps:$4 sm:$0xff]  }
 0x15f   : > { %3265 = vmatpush1.bf16.msra.mxu0 %v8676_v17  ;;  %3351 = vmatpush1.bf16.msra.mxu1 %v8679_v18  ;;  %v8760_v17 = vld [vmem:[%s11940_s3 + $0x80] ss:$16 sps:$4 sm:$0xff]   ;;  %v8763_v18 = vld [vmem:[%s11940_s3 + $0x88] ss:$16 sps:$4 sm:$0xff]  }
 0x160   : > { %3266 = vmatprep.subr.bf16.mxu0 %v8684_v19  ;;  %3352 = vmatprep.subr.bf16.mxu1 %v8687_v20  ;;  %v8768_v19 = vld [vmem:[%s11940_s3 + $0xa4] ss:$16 sps:$4 sm:$0xff]   ;;  %v8771_v20 = vld [vmem:[%s11940_s3 + $0xac] ss:$16 sps:$4 sm:$0xff]  }
 0x163   : > { %3267 = vmatpush1.bf16.msra.mxu0 %v8682_v21  ;;  %3353 = vmatpush1.bf16.msra.mxu1 %v8685_v22  ;;  %v8766_v21 = vld [vmem:[%s11940_s3 + $0xa0] ss:$16 sps:$4 sm:$0xff]   ;;  %v8769_v22 = vld [vmem:[%s11940_s3 + $0xa8] ss:$16 sps:$4 sm:$0xff]  }
 0x164   : > { %3268 = vmatprep.subr.bf16.mxu0 %v8690_v23  ;;  %3354 = vmatprep.subr.bf16.mxu1 %v8693_v24  ;;  %v8774_v23 = vld [vmem:[%s11940_s3 + $0xc4] ss:$16 sps:$4 sm:$0xff]   ;;  %v8777_v24 = vld [vmem:[%s11940_s3 + $0xcc] ss:$16 sps:$4 sm:$0xff]  }
 0x167   : > { %3269 = vmatpush1.bf16.msra.mxu0 %v8688_v25  ;;  %3355 = vmatpush1.bf16.msra.mxu1 %v8691_v26  ;;  %v8772_v25 = vld [vmem:[%s11940_s3 + $0xc0] ss:$16 sps:$4 sm:$0xff]   ;;  %v8775_v26 = vld [vmem:[%s11940_s3 + $0xc8] ss:$16 sps:$4 sm:$0xff]  }
 0x168   : > { %3270 = vmatprep.subr.bf16.mxu0 %v8696_v27  ;;  %3356 = vmatprep.subr.bf16.mxu1 %v8699_v28  ;;  %v8780_v27 = vld [vmem:[%s11940_s3 + $0xe4] ss:$16 sps:$4 sm:$0xff]   ;;  %v8783_v28 = vld [vmem:[%s11940_s3 + $0xec] ss:$16 sps:$4 sm:$0xff]  }
 0x16b   : > { %3271 = vmatpush1.bf16.msra.mxu0 %v8694_v29  ;;  %3357 = vmatpush1.bf16.msra.mxu1 %v8697_v30  ;;  %v8778_v29 = vld [vmem:[%s11940_s3 + $0xe0] ss:$16 sps:$4 sm:$0xff]   ;;  %v8781_v30 = vld [vmem:[%s11940_s3 + $0xe8] ss:$16 sps:$4 sm:$0xff]  }
 0x16c   : > { %3272 = vmatprep.subr.bf16.mxu0 %v8702_v31  ;;  %3358 = vmatprep.subr.bf16.mxu1 %v8705_v33  ;;  %v8786_v31 = vld [vmem:[%s11940_s3 + $0x104] ss:$16 sps:$4 sm:$0xff]   ;;  %v8789_v33 = vld [vmem:[%s11940_s3 + $0x10c] ss:$16 sps:$4 sm:$0xff]  }
 0x16f   : > { %3273 = vmatpush1.bf16.msra.mxu0 %v8700_v0  ;;  %3359 = vmatpush1.bf16.msra.mxu1 %v8703_v34  ;;  %v8784_v0 = vld [vmem:[%s11940_s3 + $0x100] ss:$16 sps:$4 sm:$0xff]   ;;  %v8787_v34 = vld [vmem:[%s11940_s3 + $0x108] ss:$16 sps:$4 sm:$0xff]  }
 0x170   : > { %3274 = vmatprep.subr.bf16.mxu0 %v8708_v35  ;;  %3360 = vmatprep.subr.bf16.mxu1 %v8711_v36  ;;  %v8792_v35 = vld [vmem:[%s11940_s3 + $0x124] ss:$16 sps:$4 sm:$0xff]   ;;  %v8795_v36 = vld [vmem:[%s11940_s3 + $0x12c] ss:$16 sps:$4 sm:$0xff]  }
 0x173   : > { %3275 = vmatpush1.bf16.msra.mxu0 %v8706_v37  ;;  %3361 = vmatpush1.bf16.msra.mxu1 %v8709_v38  ;;  %v8790_v37 = vld [vmem:[%s11940_s3 + $0x120] ss:$16 sps:$4 sm:$0xff]   ;;  %v8793_v38 = vld [vmem:[%s11940_s3 + $0x128] ss:$16 sps:$4 sm:$0xff]  }
 0x174   : > { %3276 = vmatprep.subr.bf16.mxu0 %v8714_v39  ;;  %3362 = vmatprep.subr.bf16.mxu1 %v8717_v40  ;;  %v8798_v39 = vld [vmem:[%s11940_s3 + $0x144] ss:$16 sps:$4 sm:$0xff]   ;;  %v8801_v40 = vld [vmem:[%s11940_s3 + $0x14c] ss:$16 sps:$4 sm:$0xff]  }
 0x177   : > { %3277 = vmatpush1.bf16.msra.mxu0 %v8712_v41  ;;  %3363 = vmatpush1.bf16.msra.mxu1 %v8715_v42  ;;  %v8796_v41 = vld [vmem:[%s11940_s3 + $0x140] ss:$16 sps:$4 sm:$0xff]   ;;  %v8799_v42 = vld [vmem:[%s11940_s3 + $0x148] ss:$16 sps:$4 sm:$0xff]  }
 0x178   : > { %3278 = vmatprep.subr.bf16.mxu0 %v8720_v43  ;;  %3364 = vmatprep.subr.bf16.mxu1 %v8723_v44  ;;  %v8804_v43 = vld [vmem:[%s11940_s3 + $0x164] ss:$16 sps:$4 sm:$0xff]   ;;  %v8807_v44 = vld [vmem:[%s11940_s3 + $0x16c] ss:$16 sps:$4 sm:$0xff]  }
 0x17b   : > { %3279 = vmatpush1.bf16.msra.mxu0 %v8718_v45  ;;  %3365 = vmatpush1.bf16.msra.mxu1 %v8721_v46  ;;  %v8802_v45 = vld [vmem:[%s11940_s3 + $0x160] ss:$16 sps:$4 sm:$0xff]   ;;  %v8805_v46 = vld [vmem:[%s11940_s3 + $0x168] ss:$16 sps:$4 sm:$0xff]  }
 0x17c   : > { %3280 = vmatprep.subr.bf16.mxu0 %v8726_v14  ;;  %3366 = vmatprep.subr.bf16.mxu1 %v8729_v47  ;;  %v8810_v14 = vld [vmem:[%s11940_s3 + $0x184] ss:$16 sps:$4 sm:$0xff]   ;;  %v8813_v47 = vld [vmem:[%s11940_s3 + $0x18c] ss:$16 sps:$4 sm:$0xff]  }
 0x17f   : > { %3281 = vmatpush1.bf16.msra.mxu0 %v8724_v50  ;;  %3367 = vmatpush1.bf16.msra.mxu1 %v8727_v51  ;;  %v8816_v50 = vld [vmem:[%s11940_s3 + $0x1a4] ss:$16 sps:$4 sm:$0xff]   ;;  %v8819_v51 = vld [vmem:[%s11940_s3 + $0x1ac] ss:$16 sps:$4 sm:$0xff]  }
 0x180   : > { %3282 = vmatprep.subr.bf16.mxu0 %v8732_v52  ;;  %3368 = vmatprep.subr.bf16.mxu1 %v8735_v60  ;;  %v8814_v52 = vld [vmem:[%s11940_s3 + $0x1a0] ss:$16 sps:$4 sm:$0xff]   ;;  %v8817_v60 = vld [vmem:[%s11940_s3 + $0x1a8] ss:$16 sps:$4 sm:$0xff]  }
 0x183   : > { %3283 = vmatpush1.bf16.msra.mxu0 %v8730_v55  ;;  %3369 = vmatpush1.bf16.msra.mxu1 %v8733_v56  ;;  %v8820_v55 = vld [vmem:[%s11940_s3 + $0x1c0] ss:$16 sps:$4 sm:$0xff]   ;;  %v8823_v56 = vld [vmem:[%s11940_s3 + $0x1c8] ss:$16 sps:$4 sm:$0xff]  }
 0x184   : > { %4243 = vmatprep.subr.bf16.mxu0 %v8738_v57  ;;  %4329 = vmatprep.subr.bf16.mxu1 %v8741_v58  ;;  %v8826_v57 = vld [vmem:[%s11940_s3 + $0x1e0] ss:$16 sps:$4 sm:$0xff]   ;;  %v8828_v58 = vld [vmem:[%s11940_s3 + $0x1e4] ss:$16 sps:$4 sm:$0xff]  }
 0x186   : > { %3285 = vmatmul.mubr.bf16.vlgmr.msra.gmra.mrb[0].mxu0 %v2561_v3  ;;  %3371 = vmatmul.mubr.bf16.vlgmr.msra.gmra.mrb[0].mxu1 %v2561_v3 }
 0x187   : > { %4244 = vmatpush1.bf16.msra.mxu0 %v8736_v61  ;;  %4330 = vmatpush1.bf16.msra.mxu1 %v8739_v62  ;;  %v8834_v61 = vld [vmem:[%s11940_s3 + $0x204] ss:$16 sps:$4 sm:$0xff]   ;;  %v8837_v62 = vld [vmem:[%s11940_s3 + $0x20c] ss:$16 sps:$4 sm:$0xff]  }
 0x188   : > { %4245 = vmatprep.subr.bf16.mxu0 %v8744_v63  ;;  %4331 = vmatprep.subr.bf16.mxu1 %v8747_v2  ;;  %v398_v63 = vshrl.u32 %v333_v1, 7 }
 0x18a   : > { %v10830_v2 = vsub.s32 0, %v398_v63  ;;  %v10832_v3 = vsub.s32 2, %v398_v63 }
 0x18b   : > { %4246 = vmatpush1.bf16.msra.mxu0 %v8742_v4  ;;  %4332 = vmatpush1.bf16.msra.mxu1 %v8745_v5  ;;  %v395_v4 = vld [vmem:[%s11939_s2] sm:$0xf]  ;;  %v10837_v5 = vsub.s32 1, %v398_v63 }
 0x18c   : > { %4247 = vmatprep.subr.bf16.mxu0 %v8750_v6  ;;  %4333 = vmatprep.subr.bf16.mxu1 %v8753_v7  ;;  %v10839_v6 = vsub.s32 3, %v398_v63  ;;  %v400_v7 = vrot.slane %v395_v4, %v10830_v2  ;;  %v8850_v63 = vld [vmem:[%s11940_s3 + $0x260] ss:$16 sps:$4 sm:$0xff]  }
 0x18e   : > { %v412_v1 = vrot.slane %v395_v4, %v10839_v6 }
 0x18f   : > { %4248 = vmatpush1.bf16.msra.mxu0 %v8748_v8  ;;  %4334 = vmatpush1.bf16.msra.mxu1 %v8751_v9  ;;  %v408_v8 = vrot.slane %v395_v4, %v10832_v3  ;;  %v404_v9 = vrot.slane %v395_v4, %v10837_v5  ;;  %v8853_v4 = vld [vmem:[%s11940_s3 + $0x268] ss:$16 sps:$4 sm:$0xff]  }
 0x190   : > { %4249 = vmatprep.subr.bf16.mxu0 %v8756_v10  ;;  %4335 = vmatprep.subr.bf16.mxu1 %v8759_v11 }
 0x193   : > { %4250 = vmatpush1.bf16.msra.mxu0 %v8754_v12  ;;  %4336 = vmatpush1.bf16.msra.mxu1 %v8757_v13 }
 0x194   : > { %4251 = vmatprep.subr.bf16.mxu0 %v8762_v15  ;;  %4337 = vmatprep.subr.bf16.mxu1 %v8765_v16 }
 0x197   : > { %4252 = vmatpush1.bf16.msra.mxu0 %v8760_v17  ;;  %4338 = vmatpush1.bf16.msra.mxu1 %v8763_v18 }
 0x198   : > { %4253 = vmatprep.subr.bf16.mxu0 %v8768_v19  ;;  %4339 = vmatprep.subr.bf16.mxu1 %v8771_v20 }
 0x19b   : > { %4254 = vmatpush1.bf16.msra.mxu0 %v8766_v21  ;;  %4340 = vmatpush1.bf16.msra.mxu1 %v8769_v22 }
 0x19c   : > { %4255 = vmatprep.subr.bf16.mxu0 %v8774_v23  ;;  %4341 = vmatprep.subr.bf16.mxu1 %v8777_v24 }
 0x19f   : > { %4256 = vmatpush1.bf16.msra.mxu0 %v8772_v25  ;;  %4342 = vmatpush1.bf16.msra.mxu1 %v8775_v26 }
 0x1a0   : > { %4257 = vmatprep.subr.bf16.mxu0 %v8780_v27  ;;  %4343 = vmatprep.subr.bf16.mxu1 %v8783_v28 }
 0x1a3   : > { %4258 = vmatpush1.bf16.msra.mxu0 %v8778_v29  ;;  %4344 = vmatpush1.bf16.msra.mxu1 %v8781_v30 }
 0x1a4   : > { %4259 = vmatprep.subr.bf16.mxu0 %v8786_v31  ;;  %4345 = vmatprep.subr.bf16.mxu1 %v8789_v33 }
 0x1a7   : > { %4260 = vmatpush1.bf16.msra.mxu0 %v8784_v0  ;;  %4346 = vmatpush1.bf16.msra.mxu1 %v8787_v34 }
 0x1a8   : > { %4261 = vmatprep.subr.bf16.mxu0 %v8792_v35  ;;  %4347 = vmatprep.subr.bf16.mxu1 %v8795_v36 }
 0x1ab   : > { %4262 = vmatpush1.bf16.msra.mxu0 %v8790_v37  ;;  %4348 = vmatpush1.bf16.msra.mxu1 %v8793_v38 }
 0x1ac   : > { %4263 = vmatprep.subr.bf16.mxu0 %v8798_v39  ;;  %4349 = vmatprep.subr.bf16.mxu1 %v8801_v40 }
 0x1af   : > { %4264 = vmatpush1.bf16.msra.mxu0 %v8796_v41  ;;  %4350 = vmatpush1.bf16.msra.mxu1 %v8799_v42 }
 0x1b0   : > { %4265 = vmatprep.subr.bf16.mxu0 %v8804_v43  ;;  %4351 = vmatprep.subr.bf16.mxu1 %v8807_v44 }
 0x1b3   : > { %4266 = vmatpush1.bf16.msra.mxu0 %v8802_v45  ;;  %4352 = vmatpush1.bf16.msra.mxu1 %v8805_v46 }
 0x1b4   : > { %4267 = vmatprep.subr.bf16.mxu0 %v8810_v14  ;;  %4353 = vmatprep.subr.bf16.mxu1 %v8813_v47 }
 0x1b7   : > { %4268 = vmatpush1.bf16.msra.mxu0 %v8808_v48  ;;  %4354 = vmatpush1.bf16.msra.mxu1 %v8811_v49  ;;  %v8832_v49 = vld [vmem:[%s11940_s3 + $0x200] ss:$16 sps:$4 sm:$0xff]  }
 0x1b8   : > { %4269 = vmatprep.subr.bf16.mxu0 %v8816_v50  ;;  %4355 = vmatprep.subr.bf16.mxu1 %v8819_v51  ;;  %v8835_v50 = vld [vmem:[%s11940_s3 + $0x208] ss:$16 sps:$4 sm:$0xff]  }
 0x1bb   : > { %4270 = vmatpush1.bf16.msra.mxu0 %v8814_v52  ;;  %4356 = vmatpush1.bf16.msra.mxu1 %v8817_v60  ;;  %v8840_v60 = vld [vmem:[%s11940_s3 + $0x224] ss:$16 sps:$4 sm:$0xff]  }
 0x1bc   : > { %4271 = vmatprep.subr.bf16.mxu0 %v8822_v53  ;;  %4357 = vmatprep.subr.bf16.mxu1 %v8825_v54  ;;  %v8843_v53 = vld [vmem:[%s11940_s3 + $0x22c] ss:$16 sps:$4 sm:$0xff]  }
 0x1bf   : > { %4272 = vmatpush1.bf16.msra.mxu0 %v8820_v55  ;;  %4358 = vmatpush1.bf16.msra.mxu1 %v8823_v56  ;;  %v8838_v55 = vld [vmem:[%s11940_s3 + $0x220] ss:$16 sps:$4 sm:$0xff]   ;;  %v8841_v56 = vld [vmem:[%s11940_s3 + $0x228] ss:$16 sps:$4 sm:$0xff]  }
 0x1c0   : > { %4273 = vmatprep.subr.bf16.mxu0 %v8828_v58  ;;  %4359 = vmatprep.subr.bf16.mxu1 %v8831_v59  ;;  %v8849_v58 = vld [vmem:[%s11940_s3 + $0x24c] ss:$16 sps:$4 sm:$0xff]   ;;  %v8847_v59 = vld [vmem:[%s11940_s3 + $0x248] ss:$16 sps:$4 sm:$0xff]  }
 0x1c3   : > { %4274 = vmatpush1.bf16.msra.mxu0 %v8826_v57  ;;  %4360 = vmatpush1.bf16.msra.mxu1 %v8829_v32  ;;  %v8846_v57 = vld [vmem:[%s11940_s3 + $0x244] ss:$16 sps:$4 sm:$0xff]   ;;  %v8844_v32 = vld [vmem:[%s11940_s3 + $0x240] ss:$16 sps:$4 sm:$0xff]  }
 0x1c4   : > { %4286 = vmatprep.subr.bf16.mxu0 %v8834_v61  ;;  %4372 = vmatprep.subr.bf16.mxu1 %v8837_v62  ;;  %v8852_v61 = vld [vmem:[%s11940_s3 + $0x264] ss:$16 sps:$4 sm:$0xff]   ;;  %v8855_v62 = vld [vmem:[%s11940_s3 + $0x26c] ss:$16 sps:$4 sm:$0xff]  }
 0x259   : > { %v3286_v10 = vpop.f32.mrb[0].mxu0  ;;  %v3372_v11 = vpop.f32.mrb[0].mxu1 }
 0x25a   : > { %v8052_v12 = vadd.f32 %v3286_v10, %v400_v7  ;;  %v8056_v13 = vadd.f32 %v3372_v11, %v408_v8  ;;  %v3288_v15 = vpop.f32.mrb[1].mxu0  ;;  %v3374_v16 = vpop.f32.mrb[1].mxu1  ;;  %v8864_v10 = vld [vmem:[%s11940_s3 + $0x2a4] ss:$16 sps:$4 sm:$0xff]   ;;  %v8867_v11 = vld [vmem:[%s11940_s3 + $0x2ac] ss:$16 sps:$4 sm:$0xff]  }
 0x25b   : > { %v8053_v17 = vadd.f32 %v3288_v15, %v404_v9  ;;  %v8057_v18 = vadd.f32 %v3374_v16, %v412_v1  ;;  %v3290_v19 = vpop.f32.mrb[2].mxu0  ;;  %v3376_v20 = vpop.f32.mrb[2].mxu1  ;;  %v8870_v15 = vld [vmem:[%s11940_s3 + $0x2c4] ss:$16 sps:$4 sm:$0xff]   ;;  %v8873_v16 = vld [vmem:[%s11940_s3 + $0x2cc] ss:$16 sps:$4 sm:$0xff]  }
 0x25c   : > { %v3389_v21 = vmax.f32 %v8052_v12, 0.0  ;;  %v3391_v22 = vmax.f32 %v8056_v13, 0.0  ;;  %v8054_v23 = vadd.f32 %v3290_v19, %v400_v7  ;;  %v8058_v24 = vadd.f32 %v3376_v20, %v408_v8  ;;  %v3292_v25 = vpop.f32.mrb[3].mxu0  ;;  %v3378_v26 = vpop.f32.mrb[3].mxu1  ;;  %v8858_v7 = vld [vmem:[%s11940_s3 + $0x284] ss:$16 sps:$4 sm:$0xff]  }
 0x25d   : > { %v3390_v27 = vmax.f32 %v8053_v17, 0.0  ;;  %v3392_v28 = vmax.f32 %v8057_v18, 0.0  ;;  %v8055_v29 = vadd.f32 %v3292_v25, %v404_v9  ;;  %v8059_v30 = vadd.f32 %v3378_v26, %v412_v1  ;;  %v8861_v8 = vld [vmem:[%s11940_s3 + $0x28c] ss:$16 sps:$4 sm:$0xff]   ;;  %v8856_v9 = vld [vmem:[%s11940_s3 + $0x280] ss:$16 sps:$4 sm:$0xff]  }
 0x25e   : > { %v3405_v31 = vrot.slane %v3389_v21, 7  ;;  %v3407_v33 = vrot.slane %v3391_v22, 7  ;;  %v3393_v0 = vmax.f32 %v8054_v23, 0.0  ;;  %v3395_v34 = vmax.f32 %v8058_v24, 0.0  ;;  %v8859_v1 = vld [vmem:[%s11940_s3 + $0x288] ss:$16 sps:$4 sm:$0xff]  }
 0x25f   : > { %v3406_v35 = vrot.slane %v3390_v27, 7  ;;  %v3408_v36 = vrot.slane %v3392_v28, 7  ;;  %v3394_v37 = vmax.f32 %v8055_v29, 0.0  ;;  %v3396_v38 = vmax.f32 %v8059_v30, 0.0  ;;  %v8862_v12 = vld [vmem:[%s11940_s3 + $0x2a0] ss:$16 sps:$4 sm:$0xff]  }
 0x260   : > { %3429 = vst [vmem:[#allocation2] sm:$0xfe] %v3405_v31  ;;  %3431 = vst [vmem:[#allocation2 + $0x10] sm:$0xfe] %v3407_v33  ;;  %v3409_v39 = vrot.slane %v3393_v0, 7  ;;  %v3413_v40 = vrot.slane %v3395_v34, 7 }
 0x261   : > { %3430 = vst [vmem:[#allocation2 + $0x8] sm:$0xfe] %v3406_v35  ;;  %3432 = vst [vmem:[#allocation2 + $0x18] sm:$0xfe] %v3408_v36  ;;  %v3411_v41 = vrot.slane %v3394_v37, 7  ;;  %v3415_v42 = vrot.slane %v3396_v38, 7 }
 0x262   : > { %v10846_v43 = vsel %vm358_vm1, %v3405_v31, %v3409_v39  ;;  %3437 = vst [vmem:[#allocation2 + $0x40] sm:$0x1] %v3409_v39  ;;  %v10849_v44 = vsel %vm358_vm1, %v3407_v33, %v3413_v40  ;;  %3439 = vst [vmem:[#allocation2 + $0x50] sm:$0x1] %v3413_v40  ;;  %v8865_v13 = vld [vmem:[%s11940_s3 + $0x2a8] ss:$16 sps:$4 sm:$0xff]  }
 0x263   : > { %3433 = vst [vmem:[#allocation2 + $0x20] sm:$0xff] %v10846_v43  ;;  %3435 = vst [vmem:[#allocation2 + $0x30] sm:$0xff] %v10849_v44  ;;  %v10854_v45 = vsel %vm358_vm1, %v3406_v35, %v3411_v41  ;;  %v10857_v46 = vsel %vm358_vm1, %v3408_v36, %v3415_v42  ;;  %v8868_v17 = vld [vmem:[%s11940_s3 + $0x2c0] ss:$16 sps:$4 sm:$0xff]   ;;  %v8871_v18 = vld [vmem:[%s11940_s3 + $0x2c8] ss:$16 sps:$4 sm:$0xff]  }
 0x264   : > { %3438 = vst [vmem:[#allocation2 + $0x48] sm:$0x1] %v3411_v41  ;;  %3440 = vst [vmem:[#allocation2 + $0x58] sm:$0x1] %v3415_v42  ;;  %v8876_v19 = vld [vmem:[%s11940_s3 + $0x2e4] ss:$16 sps:$4 sm:$0xff]  }
 0x265   : > { %3436 = vst [vmem:[#allocation2 + $0x38] sm:$0xff] %v10857_v46  ;;  %v8879_v20 = vld [vmem:[%s11940_s3 + $0x2ec] ss:$16 sps:$4 sm:$0xff]   ;;  %v8874_v21 = vld [vmem:[%s11940_s3 + $0x2e0] ss:$16 sps:$4 sm:$0xff]  }
 0x266   : > { %v8877_v22 = vld [vmem:[%s11940_s3 + $0x2e8] ss:$16 sps:$4 sm:$0xff]   ;;  %v8882_v23 = vld [vmem:[%s11940_s3 + $0x304] ss:$16 sps:$4 sm:$0xff]   ;;  %v8885_v24 = vld [vmem:[%s11940_s3 + $0x30c] ss:$16 sps:$4 sm:$0xff]  }
 0x267   : > { %v3463_v14 = vld [vmem:[#allocation2] sm:$0xff]  ;;  %v8883_v26 = vld [vmem:[%s11940_s3 + $0x308] ss:$16 sps:$4 sm:$0xff]   ;;  %v8891_v28 = vld [vmem:[%s11940_s3 + $0x32c] ss:$16 sps:$4 sm:$0xff]  }
 0x268   : > { %v3464_v47 = vld [vmem:[#allocation2 + $0x8] sm:$0xff]  ;;  %v3466_v51 = vld [vmem:[#allocation2 + $0x18] sm:$0xff]  ;;  %v3471_v52 = vpack.c.bf16 %v10846_v43, %v3463_v14  ;;  %v8880_v25 = vld [vmem:[%s11940_s3 + $0x300] ss:$16 sps:$4 sm:$0xff]  }
 0x269   : > { %v3472_v48 = vpack.c.bf16 %v10854_v45, %v3464_v47  ;;  %v3474_v54 = vpack.c.bf16 %v10857_v46, %v3466_v51  ;;  %v8888_v27 = vld [vmem:[%s11940_s3 + $0x324] ss:$16 sps:$4 sm:$0xff]   ;;  %v8886_v29 = vld [vmem:[%s11940_s3 + $0x320] ss:$16 sps:$4 sm:$0xff]   ;;  %v8889_v30 = vld [vmem:[%s11940_s3 + $0x328] ss:$16 sps:$4 sm:$0xff]  }
 0x26a   : > { %v8894_v31 = vld [vmem:[%s11940_s3 + $0x344] ss:$16 sps:$4 sm:$0xff]   ;;  %v8897_v33 = vld [vmem:[%s11940_s3 + $0x34c] ss:$16 sps:$4 sm:$0xff]   ;;  %v8892_v0 = vld [vmem:[%s11940_s3 + $0x340] ss:$16 sps:$4 sm:$0xff]  }
 0x26b   : > { %4275 = vmatprep.mubr.bf16.mxu0 %v3472_v48  ;;  %4361 = vmatprep.mubr.bf16.mxu1 %v3472_v48  ;;  %v8895_v34 = vld [vmem:[%s11940_s3 + $0x348] ss:$16 sps:$4 sm:$0xff]   ;;  %v8900_v35 = vld [vmem:[%s11940_s3 + $0x364] ss:$16 sps:$4 sm:$0xff]   ;;  %v8903_v36 = vld [vmem:[%s11940_s3 + $0x36c] ss:$16 sps:$4 sm:$0xff]  }
 0x26c   : > { %4276 = vmatmul.mubr.bf16.vlgmr.msra.gmra.mrb[4].mxu0 %v3471_v52  ;;  %4362 = vmatmul.mubr.bf16.vlgmr.msra.gmra.mrb[4].mxu1 %v3471_v52  ;;  %v8898_v37 = vld [vmem:[%s11940_s3 + $0x360] ss:$16 sps:$4 sm:$0xff]   ;;  %v8901_v38 = vld [vmem:[%s11940_s3 + $0x368] ss:$16 sps:$4 sm:$0xff]   ;;  %v8906_v39 = vld [vmem:[%s11940_s3 + $0x384] ss:$16 sps:$4 sm:$0xff]  }
 0x26d   : > { %4287 = vmatpush1.bf16.msra.mxu0 %v8832_v49  ;;  %4373 = vmatpush1.bf16.msra.mxu1 %v8835_v50  ;;  %v8909_v40 = vld [vmem:[%s11940_s3 + $0x38c] ss:$16 sps:$4 sm:$0xff]   ;;  %v8904_v41 = vld [vmem:[%s11940_s3 + $0x380] ss:$16 sps:$4 sm:$0xff]   ;;  %v8907_v42 = vld [vmem:[%s11940_s3 + $0x388] ss:$16 sps:$4 sm:$0xff]  }
 0x26e   : > { %4318 = vmatprep.mubr.bf16.mxu0 %v3474_v54  ;;  %4404 = vmatprep.mubr.bf16.mxu1 %v3474_v54  ;;  %v4424_v14 = vld [vmem:[#allocation2 + $0x8] sm:$0xfe]  ;;  %v8912_v47 = vld [vmem:[%s11940_s3 + $0x3a4] ss:$16 sps:$4 sm:$0xff]   ;;  %v8910_v50 = vld [vmem:[%s11940_s3 + $0x3a0] ss:$16 sps:$4 sm:$0xff]  }
 0x26f   : > { %4288 = vmatprep.subr.bf16.mxu0 %v8840_v60  ;;  %4374 = vmatprep.subr.bf16.mxu1 %v8843_v53  ;;  %v8915_v48 = vld [vmem:[%s11940_s3 + $0x3ac] ss:$16 sps:$4 sm:$0xff]   ;;  %v4436_v49 = vpack.c.bf16 %v10854_v45, %v4424_v14  ;;  %v8913_v51 = vld [vmem:[%s11940_s3 + $0x3a8] ss:$16 sps:$4 sm:$0xff]   ;;  %v8918_v60 = vld [vmem:[%s11940_s3 + $0x3c4] ss:$16 sps:$4 sm:$0xff]  }
 0x270   : > { %v4432_v52 = vld [vmem:[#allocation2 + $0x48] sm:$0x1]  ;;  %v8921_v53 = vld [vmem:[%s11940_s3 + $0x3cc] ss:$16 sps:$4 sm:$0xff]   ;;  %v8978_v14 = vld [vmem:[%s11940_s3 + $0x504] ss:$16 sps:$4 sm:$0xff]  }
 0x271   : > { %4289 = vmatpush1.bf16.msra.mxu0 %v8838_v55  ;;  %4375 = vmatpush1.bf16.msra.mxu1 %v8841_v56  ;;  %v4440_v54 = vpack.c.bf16 %v4432_v52, %v4432_v52  ;;  %v4587_v55 = vshll.u32 %v4436_v49, 16  ;;  %v8916_v56 = vld [vmem:[%s11940_s3 + $0x3c0] ss:$16 sps:$4 sm:$0xff]  }
 0x272   : > { %4290 = vmatprep.subr.bf16.mxu0 %v8846_v57  ;;  %4376 = vmatprep.subr.bf16.mxu1 %v8849_v58  ;;  %v8919_v57 = vld [vmem:[%s11940_s3 + $0x3c8] ss:$16 sps:$4 sm:$0xff]   ;;  %v8924_v58 = vld [vmem:[%s11940_s3 + $0x3e4] ss:$16 sps:$4 sm:$0xff]   ;;  %v8982_v52 = vld [vmem:[%s11940_s3 + $0x520] ss:$16 sps:$4 sm:$0xff]  }
 0x275   : > { %4291 = vmatpush1.bf16.msra.mxu0 %v8844_v32  ;;  %4377 = vmatpush1.bf16.msra.mxu1 %v8847_v59  ;;  %v8927_v32 = vld [vmem:[%s11940_s3 + $0x3ec] ss:$16 sps:$4 sm:$0xff]   ;;  %v4589_v59 = vrot.slane %v4587_v55, 1  ;;  %v8988_v55 = vld [vmem:[%s11940_s3 + $0x540] ss:$16 sps:$4 sm:$0xff]  }
 0x276   : > { %4292 = vmatprep.subr.bf16.mxu0 %v8852_v61  ;;  %4378 = vmatprep.subr.bf16.mxu1 %v8855_v62  ;;  %v4592_v61 = vshll.u32 %v4440_v54, 16  ;;  %v8922_v62 = vld [vmem:[%s11940_s3 + $0x3e0] ss:$16 sps:$4 sm:$0xff]   ;;  %v8993_v54 = vld [vmem:[%s11940_s3 + $0x54c] ss:$16 sps:$4 sm:$0xff]  }
 0x279   : > { %4293 = vmatpush1.bf16.msra.mxu0 %v8850_v63  ;;  %4379 = vmatpush1.bf16.msra.mxu1 %v8853_v4  ;;  %v8925_v63 = vld [vmem:[%s11940_s3 + $0x3e8] ss:$16 sps:$4 sm:$0xff]   ;;  %v8930_v4 = vld [vmem:[%s11940_s3 + $0x404] ss:$16 sps:$4 sm:$0xff]  }
 0x27a   : > { %4294 = vmatprep.subr.bf16.mxu0 %v8858_v7  ;;  %4380 = vmatprep.subr.bf16.mxu1 %v8861_v8  ;;  %v8933_v7 = vld [vmem:[%s11940_s3 + $0x40c] ss:$16 sps:$4 sm:$0xff]   ;;  %v4585_v8 = vshrl.u32 %v4436_v49, 16  ;;  %v8979_v49 = vld [vmem:[%s11940_s3 + $0x508] ss:$16 sps:$4 sm:$0xff]  }
 0x27d   : > { %4295 = vmatpush1.bf16.msra.mxu0 %v8856_v9  ;;  %4381 = vmatpush1.bf16.msra.mxu1 %v8859_v1  ;;  %v3465_v9 = vld [vmem:[#allocation2 + $0x10] sm:$0xff]  ;;  %v4590_v1 = vor.u32 %v4589_v59, %v4585_v8  ;;  %v8997_v59 = vld [vmem:[%s11940_s3 + $0x568] ss:$16 sps:$4 sm:$0xff]  }
 0x27e   : > { %4296 = vmatprep.subr.bf16.mxu0 %v8864_v10  ;;  %4382 = vmatprep.subr.bf16.mxu1 %v8867_v11  ;;  %v4594_v10 = vrot.slane %v4592_v61, 1  ;;  %v8928_v11 = vld [vmem:[%s11940_s3 + $0x400] ss:$16 sps:$4 sm:$0xff]   ;;  %v9002_v61 = vld [vmem:[%s11940_s3 + $0x584] ss:$16 sps:$4 sm:$0xff]  }
 0x27f   : > { %v9008_v8 = vld [vmem:[%s11940_s3 + $0x5a4] ss:$16 sps:$4 sm:$0xff]  }
 0x281   : > { %4297 = vmatpush1.bf16.msra.mxu0 %v8862_v12  ;;  %4383 = vmatpush1.bf16.msra.mxu1 %v8865_v13  ;;  %v3473_v12 = vpack.c.bf16 %v10849_v44, %v3465_v9  ;;  %v8931_v13 = vld [vmem:[%s11940_s3 + $0x408] ss:$16 sps:$4 sm:$0xff]   ;;  %v8934_v44 = vld [vmem:[%s11940_s3 + $0x420] ss:$16 sps:$4 sm:$0xff]  }
 0x282   : > { %4298 = vmatprep.subr.bf16.mxu0 %v8870_v15  ;;  %4384 = vmatprep.subr.bf16.mxu1 %v8873_v16  ;;  %v8936_v15 = vld [vmem:[%s11940_s3 + $0x424] ss:$16 sps:$4 sm:$0xff]   ;;  %v8939_v16 = vld [vmem:[%s11940_s3 + $0x42c] ss:$16 sps:$4 sm:$0xff]  }
 0x283   : > { %v4426_v9 = vld [vmem:[#allocation2 + $0x18] sm:$0xfe] }
 0x285   : > { %4299 = vmatpush1.bf16.msra.mxu0 %v8868_v17  ;;  %4385 = vmatpush1.bf16.msra.mxu1 %v8871_v18  ;;  %v4595_v17 = vsel %vm1526_vm2, %v4590_v1, %v4594_v10  ;;  %v8937_v18 = vld [vmem:[%s11940_s3 + $0x428] ss:$16 sps:$4 sm:$0xff]   ;;  %v9011_v1 = vld [vmem:[%s11940_s3 + $0x5ac] ss:$16 sps:$4 sm:$0xff]  }
 0x286   : > { %4300 = vmatprep.subr.bf16.mxu0 %v8876_v19  ;;  %4386 = vmatprep.subr.bf16.mxu1 %v8879_v20  ;;  %v8942_v19 = vld [vmem:[%s11940_s3 + $0x444] ss:$16 sps:$4 sm:$0xff]   ;;  %v8945_v20 = vld [vmem:[%s11940_s3 + $0x44c] ss:$16 sps:$4 sm:$0xff]  }
 0x289   : > { %4301 = vmatpush1.bf16.msra.mxu0 %v8874_v21  ;;  %4387 = vmatpush1.bf16.msra.mxu1 %v8877_v22  ;;  %v8940_v21 = vld [vmem:[%s11940_s3 + $0x440] ss:$16 sps:$4 sm:$0xff]   ;;  %v8943_v22 = vld [vmem:[%s11940_s3 + $0x448] ss:$16 sps:$4 sm:$0xff]  }
 0x28a   : > { %4302 = vmatprep.subr.bf16.mxu0 %v8882_v23  ;;  %4388 = vmatprep.subr.bf16.mxu1 %v8885_v24  ;;  %v8948_v23 = vld [vmem:[%s11940_s3 + $0x464] ss:$16 sps:$4 sm:$0xff]   ;;  %v8951_v24 = vld [vmem:[%s11940_s3 + $0x46c] ss:$16 sps:$4 sm:$0xff]  }
 0x28d   : > { %4303 = vmatpush1.bf16.msra.mxu0 %v8880_v25  ;;  %4389 = vmatpush1.bf16.msra.mxu1 %v8883_v26  ;;  %v8946_v25 = vld [vmem:[%s11940_s3 + $0x460] ss:$16 sps:$4 sm:$0xff]   ;;  %v8949_v26 = vld [vmem:[%s11940_s3 + $0x468] ss:$16 sps:$4 sm:$0xff]  }
 0x28e   : > { %4304 = vmatprep.subr.bf16.mxu0 %v8888_v27  ;;  %4390 = vmatprep.subr.bf16.mxu1 %v8891_v28  ;;  %v8954_v27 = vld [vmem:[%s11940_s3 + $0x484] ss:$16 sps:$4 sm:$0xff]   ;;  %v8957_v28 = vld [vmem:[%s11940_s3 + $0x48c] ss:$16 sps:$4 sm:$0xff]  }
 0x291   : > { %4305 = vmatpush1.bf16.msra.mxu0 %v8886_v29  ;;  %4391 = vmatpush1.bf16.msra.mxu1 %v8889_v30  ;;  %v8952_v29 = vld [vmem:[%s11940_s3 + $0x480] ss:$16 sps:$4 sm:$0xff]   ;;  %v8955_v30 = vld [vmem:[%s11940_s3 + $0x488] ss:$16 sps:$4 sm:$0xff]  }
 0x292   : > { %4306 = vmatprep.subr.bf16.mxu0 %v8894_v31  ;;  %4392 = vmatprep.subr.bf16.mxu1 %v8897_v33  ;;  %v8960_v31 = vld [vmem:[%s11940_s3 + $0x4a4] ss:$16 sps:$4 sm:$0xff]   ;;  %v8963_v33 = vld [vmem:[%s11940_s3 + $0x4ac] ss:$16 sps:$4 sm:$0xff]  }
 0x295   : > { %4307 = vmatpush1.bf16.msra.mxu0 %v8892_v0  ;;  %4393 = vmatpush1.bf16.msra.mxu1 %v8895_v34  ;;  %v8958_v0 = vld [vmem:[%s11940_s3 + $0x4a0] ss:$16 sps:$4 sm:$0xff]   ;;  %v8961_v34 = vld [vmem:[%s11940_s3 + $0x4a8] ss:$16 sps:$4 sm:$0xff]  }
 0x296   : > { %4308 = vmatprep.subr.bf16.mxu0 %v8900_v35  ;;  %4394 = vmatprep.subr.bf16.mxu1 %v8903_v36  ;;  %v8966_v35 = vld [vmem:[%s11940_s3 + $0x4c4] ss:$16 sps:$4 sm:$0xff]   ;;  %v8969_v36 = vld [vmem:[%s11940_s3 + $0x4cc] ss:$16 sps:$4 sm:$0xff]  }
 0x299   : > { %4309 = vmatpush1.bf16.msra.mxu0 %v8898_v37  ;;  %4395 = vmatpush1.bf16.msra.mxu1 %v8901_v38  ;;  %v8964_v37 = vld [vmem:[%s11940_s3 + $0x4c0] ss:$16 sps:$4 sm:$0xff]   ;;  %v8967_v38 = vld [vmem:[%s11940_s3 + $0x4c8] ss:$16 sps:$4 sm:$0xff]  }
 0x29a   : > { %4310 = vmatprep.subr.bf16.mxu0 %v8906_v39  ;;  %4396 = vmatprep.subr.bf16.mxu1 %v8909_v40  ;;  %v8972_v39 = vld [vmem:[%s11940_s3 + $0x4e4] ss:$16 sps:$4 sm:$0xff]   ;;  %v8975_v40 = vld [vmem:[%s11940_s3 + $0x4ec] ss:$16 sps:$4 sm:$0xff]  }
 0x29d   : > { %4311 = vmatpush1.bf16.msra.mxu0 %v8904_v41  ;;  %4397 = vmatpush1.bf16.msra.mxu1 %v8907_v42  ;;  %v8970_v41 = vld [vmem:[%s11940_s3 + $0x4e0] ss:$16 sps:$4 sm:$0xff]   ;;  %v8973_v42 = vld [vmem:[%s11940_s3 + $0x4e8] ss:$16 sps:$4 sm:$0xff]  }
 0x29e   : > { %4312 = vmatprep.subr.bf16.mxu0 %v8912_v47  ;;  %4398 = vmatprep.subr.bf16.mxu1 %v8915_v48  ;;  %v8981_v47 = vld [vmem:[%s11940_s3 + $0x50c] ss:$16 sps:$4 sm:$0xff]   ;;  %v8976_v48 = vld [vmem:[%s11940_s3 + $0x500] ss:$16 sps:$4 sm:$0xff]  }
 0x2a1   : > { %4313 = vmatpush1.bf16.msra.mxu0 %v8910_v50  ;;  %4399 = vmatpush1.bf16.msra.mxu1 %v8913_v51  ;;  %v8984_v50 = vld [vmem:[%s11940_s3 + $0x524] ss:$16 sps:$4 sm:$0xff]   ;;  %v8987_v51 = vld [vmem:[%s11940_s3 + $0x52c] ss:$16 sps:$4 sm:$0xff]  }
 0x2a2   : > { %4314 = vmatprep.subr.bf16.mxu0 %v8918_v60  ;;  %4400 = vmatprep.subr.bf16.mxu1 %v8921_v53  ;;  %v8985_v60 = vld [vmem:[%s11940_s3 + $0x528] ss:$16 sps:$4 sm:$0xff]   ;;  %v8990_v53 = vld [vmem:[%s11940_s3 + $0x544] ss:$16 sps:$4 sm:$0xff]  }
 0x2a5   : > { %4315 = vmatpush1.bf16.msra.mxu0 %v8916_v56  ;;  %4401 = vmatpush1.bf16.msra.mxu1 %v8919_v57  ;;  %v8991_v56 = vld [vmem:[%s11940_s3 + $0x548] ss:$16 sps:$4 sm:$0xff]   ;;  %v8996_v57 = vld [vmem:[%s11940_s3 + $0x564] ss:$16 sps:$4 sm:$0xff]  }
 0x2a6   : > { %4316 = vmatprep.subr.bf16.mxu0 %v8924_v58  ;;  %4402 = vmatprep.subr.bf16.mxu1 %v8927_v32  ;;  %v8999_v58 = vld [vmem:[%s11940_s3 + $0x56c] ss:$16 sps:$4 sm:$0xff]   ;;  %v8994_v32 = vld [vmem:[%s11940_s3 + $0x560] ss:$16 sps:$4 sm:$0xff]  }
 0x2a9   : > { %4317 = vmatpush1.bf16.msra.mxu0 %v8922_v62  ;;  %4403 = vmatpush1.bf16.msra.mxu1 %v8925_v63  ;;  %v9005_v62 = vld [vmem:[%s11940_s3 + $0x58c] ss:$16 sps:$4 sm:$0xff]   ;;  %v4423_v63 = vld [vmem:[#allocation2] sm:$0xfe] }
 0x2aa   : > { %5264 = vmatprep.subr.bf16.mxu0 %v8930_v4  ;;  %5350 = vmatprep.subr.bf16.mxu1 %v8933_v7  ;;  %v9000_v4 = vld [vmem:[%s11940_s3 + $0x580] ss:$16 sps:$4 sm:$0xff]   ;;  %v9003_v7 = vld [vmem:[%s11940_s3 + $0x588] ss:$16 sps:$4 sm:$0xff]   ;;  %v4435_v10 = vpack.c.bf16 %v10846_v43, %v4423_v63  ;;  %v9017_v43 = vld [vmem:[%s11940_s3 + $0x5cc] ss:$16 sps:$4 sm:$0xff]  }
 0x2ab   : > { %v9057_v63 = vld [vmem:[%s11940_s3 + $0x6a8] ss:$16 sps:$4 sm:$0xff]  }
 0x2ac   : > { %4319 = vmatmul.mubr.bf16.vlgmr.msra.gmra.mrb[4].mxu0 %v3473_v12  ;;  %4405 = vmatmul.mubr.bf16.vlgmr.msra.gmra.mrb[4].mxu1 %v3473_v12  ;;  %v9006_v12 = vld [vmem:[%s11940_s3 + $0x5a0] ss:$16 sps:$4 sm:$0xff]  }
 0x2ad   : > { %5265 = vmatpush1.bf16.msra.mxu0 %v8928_v11  ;;  %5296 = vmatprep.mubr.bf16.mxu0 %v4595_v17  ;;  %v4431_v11 = vld [vmem:[#allocation2 + $0x40] sm:$0x1] }
 0x2ae   : > { %5351 = vmatpush1.bf16.msra.mxu1 %v8931_v13  ;;  %5382 = vmatprep.mubr.bf16.mxu1 %v4595_v17  ;;  %v4438_v13 = vpack.c.bf16 %v10857_v46, %v4426_v9  ;;  %v4434_v17 = vld [vmem:[#allocation2 + $0x58] sm:$0x1]  ;;  %v9012_v46 = vld [vmem:[%s11940_s3 + $0x5c0] ss:$16 sps:$4 sm:$0xff]  }
 0x2af   : > { %5266 = vmatprep.subr.bf16.mxu0 %v8936_v15  ;;  %5352 = vmatprep.subr.bf16.mxu1 %v8939_v16  ;;  %v9009_v15 = vld [vmem:[%s11940_s3 + $0x5a8] ss:$16 sps:$4 sm:$0xff]   ;;  %v9014_v16 = vld [vmem:[%s11940_s3 + $0x5c4] ss:$16 sps:$4 sm:$0xff]  }
 0x2b0   : > { %v9063_v9 = vld [vmem:[%s11940_s3 + $0x6c8] ss:$16 sps:$4 sm:$0xff]  }
 0x2b1   : > { %5267 = vmatpush1.bf16.msra.mxu0 %v8934_v44  ;;  %v4439_v44 = vpack.c.bf16 %v4431_v11, %v4431_v11  ;;  %v9066_v11 = vld [vmem:[%s11940_s3 + $0x6e0] ss:$16 sps:$4 sm:$0xff]  }
 0x2b2   : > { %5353 = vmatpush1.bf16.msra.mxu1 %v8937_v18  ;;  %5268 = vmatprep.subr.bf16.mxu0 %v8942_v19  ;;  %v4575_v18 = vshll.u32 %v4435_v10, 16  ;;  %v4442_v19 = vpack.c.bf16 %v4434_v17, %v4434_v17  ;;  %v9075_v17 = vld [vmem:[%s11940_s3 + $0x708] ss:$16 sps:$4 sm:$0xff]  }
 0x2b3   : > { %5354 = vmatprep.subr.bf16.mxu1 %v8945_v20  ;;  %v4611_v20 = vshll.u32 %v4438_v13, 16 }
 0x2b5   : > { %5269 = vmatpush1.bf16.msra.mxu0 %v8940_v21  ;;  %v9015_v21 = vld [vmem:[%s11940_s3 + $0x5c8] ss:$16 sps:$4 sm:$0xff]  }
 0x2b6   : > { %5355 = vmatpush1.bf16.msra.mxu1 %v8943_v22  ;;  %5270 = vmatprep.subr.bf16.mxu0 %v8948_v23  ;;  %v9020_v22 = vld [vmem:[%s11940_s3 + $0x5e4] ss:$16 sps:$4 sm:$0xff]   ;;  %v9023_v23 = vld [vmem:[%s11940_s3 + $0x5ec] ss:$16 sps:$4 sm:$0xff]  }
 0x2b7   : > { %5356 = vmatprep.subr.bf16.mxu1 %v8951_v24  ;;  %v4577_v24 = vrot.slane %v4575_v18, 1  ;;  %v9078_v18 = vld [vmem:[%s11940_s3 + $0x720] ss:$16 sps:$4 sm:$0xff]  }
 0x2b9   : > { %5271 = vmatpush1.bf16.msra.mxu0 %v8946_v25  ;;  %v4580_v25 = vshll.u32 %v4439_v44, 16  ;;  %v9083_v44 = vld [vmem:[%s11940_s3 + $0x72c] ss:$16 sps:$4 sm:$0xff]  }
 0x2ba   : > { %5357 = vmatpush1.bf16.msra.mxu1 %v8949_v26  ;;  %5272 = vmatprep.subr.bf16.mxu0 %v8954_v27  ;;  %v9018_v26 = vld [vmem:[%s11940_s3 + $0x5e0] ss:$16 sps:$4 sm:$0xff]   ;;  %v4573_v27 = vshrl.u32 %v4435_v10, 16  ;;  %v9071_v10 = vld [vmem:[%s11940_s3 + $0x6ec] ss:$16 sps:$4 sm:$0xff]  }
 0x2bb   : > { %5358 = vmatprep.subr.bf16.mxu1 %v8957_v28  ;;  %v4613_v28 = vrot.slane %v4611_v20, 1  ;;  %v9089_v20 = vld [vmem:[%s11940_s3 + $0x74c] ss:$16 sps:$4 sm:$0xff]  }
 0x2bd   : > { %5273 = vmatpush1.bf16.msra.mxu0 %v8952_v29  ;;  %v4616_v29 = vshll.u32 %v4442_v19, 16  ;;  %v9086_v19 = vld [vmem:[%s11940_s3 + $0x744] ss:$16 sps:$4 sm:$0xff]  }
 0x2be   : > { %5359 = vmatpush1.bf16.msra.mxu1 %v8955_v30  ;;  %5274 = vmatprep.subr.bf16.mxu0 %v8960_v31  ;;  %v9021_v30 = vld [vmem:[%s11940_s3 + $0x5e8] ss:$16 sps:$4 sm:$0xff]   ;;  %v9026_v31 = vld [vmem:[%s11940_s3 + $0x604] ss:$16 sps:$4 sm:$0xff]  }
 0x2bf   : > { %5360 = vmatprep.subr.bf16.mxu1 %v8963_v33  ;;  %v4578_v33 = vor.u32 %v4577_v24, %v4573_v27  ;;  %v9095_v24 = vld [vmem:[%s11940_s3 + $0x76c] ss:$16 sps:$4 sm:$0xff]   ;;  %v9098_v27 = vld [vmem:[%s11940_s3 + $0x784] ss:$16 sps:$4 sm:$0xff]  }
 0x2c1   : > { %5275 = vmatpush1.bf16.msra.mxu0 %v8958_v0  ;;  %v4582_v0 = vrot.slane %v4580_v25, 1  ;;  %v9090_v25 = vld [vmem:[%s11940_s3 + $0x760] ss:$16 sps:$4 sm:$0xff]  }
 0x2c2   : > { %5361 = vmatpush1.bf16.msra.mxu1 %v8961_v34  ;;  %5276 = vmatprep.subr.bf16.mxu0 %v8966_v35  ;;  %v9029_v34 = vld [vmem:[%s11940_s3 + $0x60c] ss:$16 sps:$4 sm:$0xff]   ;;  %v4609_v35 = vshrl.u32 %v4438_v13, 16  ;;  %v9074_v13 = vld [vmem:[%s11940_s3 + $0x704] ss:$16 sps:$4 sm:$0xff]  }
 0x2c3   : > { %5362 = vmatprep.subr.bf16.mxu1 %v8969_v36  ;;  %v9024_v36 = vld [vmem:[%s11940_s3 + $0x600] ss:$16 sps:$4 sm:$0xff]  }
 0x2c5   : > { %5277 = vmatpush1.bf16.msra.mxu0 %v8964_v37  ;;  %v4614_v37 = vor.u32 %v4613_v28, %v4609_v35  ;;  %v9101_v28 = vld [vmem:[%s11940_s3 + $0x78c] ss:$16 sps:$4 sm:$0xff]  }
 0x2c6   : > { %5363 = vmatpush1.bf16.msra.mxu1 %v8967_v38  ;;  %5278 = vmatprep.subr.bf16.mxu0 %v8972_v39  ;;  %v4618_v38 = vrot.slane %v4616_v29, 1  ;;  %v9027_v39 = vld [vmem:[%s11940_s3 + $0x608] ss:$16 sps:$4 sm:$0xff]   ;;  %v11398_v29 = vld [vmem:[#allocation2 + $0x30] sm:$0xff] }
 0x2c7   : > { %5364 = vmatprep.subr.bf16.mxu1 %v8975_v40  ;;  %v4583_v40 = vsel %vm1526_vm2, %v4578_v33, %v4582_v0  ;;  %v9104_v33 = vld [vmem:[%s11940_s3 + $0x7a4] ss:$16 sps:$4 sm:$0xff]  }
 0x2c8   : > { %v4425_v0 = vld [vmem:[#allocation2 + $0x10] sm:$0xfe] }
 0x2c9   : > { %5279 = vmatpush1.bf16.msra.mxu0 %v8970_v41  ;;  %v9032_v41 = vld [vmem:[%s11940_s3 + $0x624] ss:$16 sps:$4 sm:$0xff]   ;;  %v4437_v35 = vpack.c.bf16 %v11398_v29, %v4425_v0  ;;  %v9162_v0 = vld [vmem:[%s11940_s3 + $0x8e0] ss:$16 sps:$4 sm:$0xff]  }
 0x2ca   : > { %5365 = vmatpush1.bf16.msra.mxu1 %v8973_v42  ;;  %5280 = vmatprep.subr.bf16.mxu0 %v8978_v14  ;;  %v9035_v42 = vld [vmem:[%s11940_s3 + $0x62c] ss:$16 sps:$4 sm:$0xff]   ;;  %v4619_v14 = vsel %vm1526_vm2, %v4614_v37, %v4618_v38  ;;  %v9105_v37 = vld [vmem:[%s11940_s3 + $0x7a8] ss:$16 sps:$4 sm:$0xff]   ;;  %v9110_v38 = vld [vmem:[%s11940_s3 + $0x7c4] ss:$16 sps:$4 sm:$0xff]  }
 0x2cb   : > { %5366 = vmatprep.subr.bf16.mxu1 %v8981_v47  ;;  %v9030_v47 = vld [vmem:[%s11940_s3 + $0x620] ss:$16 sps:$4 sm:$0xff]  }
 0x2cd   : > { %5281 = vmatpush1.bf16.msra.mxu0 %v8976_v48  ;;  %v9033_v48 = vld [vmem:[%s11940_s3 + $0x628] ss:$16 sps:$4 sm:$0xff]  }
 0x2ce   : > { %5367 = vmatpush1.bf16.msra.mxu1 %v8979_v49  ;;  %5282 = vmatprep.subr.bf16.mxu0 %v8984_v50  ;;  %v9038_v49 = vld [vmem:[%s11940_s3 + $0x644] ss:$16 sps:$4 sm:$0xff]   ;;  %v9041_v50 = vld [vmem:[%s11940_s3 + $0x64c] ss:$16 sps:$4 sm:$0xff]  }
 0x2cf   : > { %5368 = vmatprep.subr.bf16.mxu1 %v8987_v51  ;;  %v9036_v51 = vld [vmem:[%s11940_s3 + $0x640] ss:$16 sps:$4 sm:$0xff]  }
 0x2d1   : > { %5283 = vmatpush1.bf16.msra.mxu0 %v8982_v52  ;;  %v9039_v52 = vld [vmem:[%s11940_s3 + $0x648] ss:$16 sps:$4 sm:$0xff]  }
 0x2d2   : > { %5369 = vmatpush1.bf16.msra.mxu1 %v8985_v60  ;;  %5284 = vmatprep.subr.bf16.mxu0 %v8990_v53  ;;  %v9044_v60 = vld [vmem:[%s11940_s3 + $0x664] ss:$16 sps:$4 sm:$0xff]   ;;  %v9047_v53 = vld [vmem:[%s11940_s3 + $0x66c] ss:$16 sps:$4 sm:$0xff]  }
 0x2d3   : > { %5370 = vmatprep.subr.bf16.mxu1 %v8993_v54  ;;  %v9042_v54 = vld [vmem:[%s11940_s3 + $0x660] ss:$16 sps:$4 sm:$0xff]  }
 0x2d5   : > { %5285 = vmatpush1.bf16.msra.mxu0 %v8988_v55  ;;  %v9045_v55 = vld [vmem:[%s11940_s3 + $0x668] ss:$16 sps:$4 sm:$0xff]  }
 0x2d6   : > { %5371 = vmatpush1.bf16.msra.mxu1 %v8991_v56  ;;  %5286 = vmatprep.subr.bf16.mxu0 %v8996_v57  ;;  %v9050_v56 = vld [vmem:[%s11940_s3 + $0x684] ss:$16 sps:$4 sm:$0xff]   ;;  %v9053_v57 = vld [vmem:[%s11940_s3 + $0x68c] ss:$16 sps:$4 sm:$0xff]  }
 0x2d7   : > { %5372 = vmatprep.subr.bf16.mxu1 %v8999_v58  ;;  %v9048_v58 = vld [vmem:[%s11940_s3 + $0x680] ss:$16 sps:$4 sm:$0xff]  }
 0x2d9   : > { %5287 = vmatpush1.bf16.msra.mxu0 %v8994_v32  ;;  %v9051_v32 = vld [vmem:[%s11940_s3 + $0x688] ss:$16 sps:$4 sm:$0xff]  }
 0x2da   : > { %5373 = vmatpush1.bf16.msra.mxu1 %v8997_v59  ;;  %5288 = vmatprep.subr.bf16.mxu0 %v9002_v61  ;;  %v9056_v59 = vld [vmem:[%s11940_s3 + $0x6a4] ss:$16 sps:$4 sm:$0xff]   ;;  %v9059_v61 = vld [vmem:[%s11940_s3 + $0x6ac] ss:$16 sps:$4 sm:$0xff]  }
 0x2db   : > { %5374 = vmatprep.subr.bf16.mxu1 %v9005_v62  ;;  %v9054_v62 = vld [vmem:[%s11940_s3 + $0x6a0] ss:$16 sps:$4 sm:$0xff]  }
 0x2dd   : > { %5289 = vmatpush1.bf16.msra.mxu0 %v9000_v4  ;;  %v9062_v4 = vld [vmem:[%s11940_s3 + $0x6c4] ss:$16 sps:$4 sm:$0xff]  }
 0x2de   : > { %5375 = vmatpush1.bf16.msra.mxu1 %v9003_v7  ;;  %5290 = vmatprep.subr.bf16.mxu0 %v9008_v8  ;;  %v9065_v7 = vld [vmem:[%s11940_s3 + $0x6cc] ss:$16 sps:$4 sm:$0xff]   ;;  %v9060_v8 = vld [vmem:[%s11940_s3 + $0x6c0] ss:$16 sps:$4 sm:$0xff]  }
 0x2df   : > { %5376 = vmatprep.subr.bf16.mxu1 %v9011_v1  ;;  %v9068_v1 = vld [vmem:[%s11940_s3 + $0x6e4] ss:$16 sps:$4 sm:$0xff]  }
 0x2e1   : > { %5291 = vmatpush1.bf16.msra.mxu0 %v9006_v12  ;;  %v9069_v12 = vld [vmem:[%s11940_s3 + $0x6e8] ss:$16 sps:$4 sm:$0xff]  }
 0x2e2   : > { %5377 = vmatpush1.bf16.msra.mxu1 %v9009_v15  ;;  %5292 = vmatprep.subr.bf16.mxu0 %v9014_v16  ;;  %v9077_v15 = vld [vmem:[%s11940_s3 + $0x70c] ss:$16 sps:$4 sm:$0xff]   ;;  %v9072_v16 = vld [vmem:[%s11940_s3 + $0x700] ss:$16 sps:$4 sm:$0xff]  }
 0x2e3   : > { %5378 = vmatprep.subr.bf16.mxu1 %v9017_v43  ;;  %v9080_v43 = vld [vmem:[%s11940_s3 + $0x724] ss:$16 sps:$4 sm:$0xff]  }
 0x2e5   : > { %5293 = vmatpush1.bf16.msra.mxu0 %v9012_v46  ;;  %v9081_v46 = vld [vmem:[%s11940_s3 + $0x728] ss:$16 sps:$4 sm:$0xff]  }
 0x2e6   : > { %5379 = vmatpush1.bf16.msra.mxu1 %v9015_v21  ;;  %5294 = vmatprep.subr.bf16.mxu0 %v9020_v22  ;;  %v9084_v21 = vld [vmem:[%s11940_s3 + $0x740] ss:$16 sps:$4 sm:$0xff]   ;;  %v9087_v22 = vld [vmem:[%s11940_s3 + $0x748] ss:$16 sps:$4 sm:$0xff]  }
 0x2e7   : > { %5380 = vmatprep.subr.bf16.mxu1 %v9023_v23  ;;  %v9092_v23 = vld [vmem:[%s11940_s3 + $0x764] ss:$16 sps:$4 sm:$0xff]  }
 0x2e9   : > { %5295 = vmatpush1.bf16.msra.mxu0 %v9018_v26  ;;  %v9093_v26 = vld [vmem:[%s11940_s3 + $0x768] ss:$16 sps:$4 sm:$0xff]  }
 0x2ea   : > { %5381 = vmatpush1.bf16.msra.mxu1 %v9021_v30  ;;  %5307 = vmatprep.subr.bf16.mxu0 %v9026_v31  ;;  %v9096_v30 = vld [vmem:[%s11940_s3 + $0x780] ss:$16 sps:$4 sm:$0xff]   ;;  %v9099_v31 = vld [vmem:[%s11940_s3 + $0x788] ss:$16 sps:$4 sm:$0xff]  }
 0x2eb   : > { %5393 = vmatprep.subr.bf16.mxu1 %v9029_v34  ;;  %v9107_v34 = vld [vmem:[%s11940_s3 + $0x7ac] ss:$16 sps:$4 sm:$0xff]  }
 0x2ec   : > { %5297 = vmatmul.mubr.bf16.vlgmr.msra.gmra.mrb[4].mxu0 %v4583_v40 }
 0x2ed   : > { %5383 = vmatmul.mubr.bf16.vlgmr.msra.gmra.mrb[4].mxu1 %v4583_v40  ;;  %5308 = vmatpush1.bf16.msra.mxu0 %v9024_v36  ;;  %v9102_v36 = vld [vmem:[%s11940_s3 + $0x7a0] ss:$16 sps:$4 sm:$0xff]   ;;  %v9113_v40 = vld [vmem:[%s11940_s3 + $0x7cc] ss:$16 sps:$4 sm:$0xff]  }
 0x2ee   : > { %5339 = vmatprep.mubr.bf16.mxu0 %v4619_v14  ;;  %5394 = vmatpush1.bf16.msra.mxu1 %v9027_v39  ;;  %v4433_v39 = vld [vmem:[#allocation2 + $0x50] sm:$0x1] }
 0x2ef   : > { %5425 = vmatprep.mubr.bf16.mxu1 %v4619_v14  ;;  %5309 = vmatprep.subr.bf16.mxu0 %v9032_v41  ;;  %v4599_v41 = vshll.u32 %v4437_v35, 16  ;;  %v4441_v14 = vpack.c.bf16 %v4433_v39, %v4433_v39  ;;  %v9176_v39 = vld [vmem:[%s11940_s3 + $0x924] ss:$16 sps:$4 sm:$0xff]  }
 0x2f0   : > { %5395 = vmatprep.subr.bf16.mxu1 %v9035_v42  ;;  %v9108_v42 = vld [vmem:[%s11940_s3 + $0x7c0] ss:$16 sps:$4 sm:$0xff]  }
 0x2f1   : > { %5310 = vmatpush1.bf16.msra.mxu0 %v9030_v47  ;;  %v9111_v47 = vld [vmem:[%s11940_s3 + $0x7c8] ss:$16 sps:$4 sm:$0xff]  }
 0x2f2   : > { %5396 = vmatpush1.bf16.msra.mxu1 %v9033_v48  ;;  %5311 = vmatprep.subr.bf16.mxu0 %v9038_v49  ;;  %v9116_v48 = vld [vmem:[%s11940_s3 + $0x7e4] ss:$16 sps:$4 sm:$0xff]   ;;  %v5449_v49 = vld [vmem:[#allocation2 + $0x48] sm:$0x3] }
 0x2f3   : > { %5397 = vmatprep.subr.bf16.mxu1 %v9041_v50  ;;  %v9119_v50 = vld [vmem:[%s11940_s3 + $0x7ec] ss:$16 sps:$4 sm:$0xff]  }
 0x2f5   : > { %5312 = vmatpush1.bf16.msra.mxu0 %v9036_v51  ;;  %v4601_v51 = vrot.slane %v4599_v41, 1  ;;  %v9174_v41 = vld [vmem:[%s11940_s3 + $0x920] ss:$16 sps:$4 sm:$0xff]  }
 0x2f6   : > { %5398 = vmatpush1.bf16.msra.mxu1 %v9039_v52  ;;  %5313 = vmatprep.subr.bf16.mxu0 %v9044_v60  ;;  %v5445_v52 = vld [vmem:[#allocation2 + $0x8] sm:$0xfc]  ;;  %v9114_v60 = vld [vmem:[%s11940_s3 + $0x7e0] ss:$16 sps:$4 sm:$0xff]  }
 0x2f7   : > { %5399 = vmatprep.subr.bf16.mxu1 %v9047_v53  ;;  %v4597_v53 = vshrl.u32 %v4437_v35, 16  ;;  %v9170_v35 = vld [vmem:[%s11940_s3 + $0x904] ss:$16 sps:$4 sm:$0xff]  }
 0x2f9   : > { %5314 = vmatpush1.bf16.msra.mxu0 %v9042_v54  ;;  %v4604_v54 = vshll.u32 %v4441_v14, 16  ;;  %v9182_v14 = vld [vmem:[%s11940_s3 + $0x944] ss:$16 sps:$4 sm:$0xff]  }
 0x2fa   : > { %5400 = vmatpush1.bf16.msra.mxu1 %v9045_v55  ;;  %5315 = vmatprep.subr.bf16.mxu0 %v9050_v56  ;;  %v5457_v55 = vpack.c.bf16 %v5449_v49, %v5449_v49  ;;  %v9117_v56 = vld [vmem:[%s11940_s3 + $0x7e8] ss:$16 sps:$4 sm:$0xff]  }
 0x2fb   : > { %5401 = vmatprep.subr.bf16.mxu1 %v9053_v57  ;;  %v9122_v57 = vld [vmem:[%s11940_s3 + $0x804] ss:$16 sps:$4 sm:$0xff]   ;;  %v9183_v49 = vld [vmem:[%s11940_s3 + $0x948] ss:$16 sps:$4 sm:$0xff]  }
 0x2fd   : > { %5316 = vmatpush1.bf16.msra.mxu0 %v9048_v58  ;;  %v4602_v58 = vor.u32 %v4601_v51, %v4597_v53  ;;  %v9191_v51 = vld [vmem:[%s11940_s3 + $0x96c] ss:$16 sps:$4 sm:$0xff]   ;;  %v9194_v53 = vld [vmem:[%s11940_s3 + $0x984] ss:$16 sps:$4 sm:$0xff]  }
 0x2fe   : > { %5402 = vmatpush1.bf16.msra.mxu1 %v9051_v32  ;;  %5317 = vmatprep.subr.bf16.mxu0 %v9056_v59  ;;  %v9125_v32 = vld [vmem:[%s11940_s3 + $0x80c] ss:$16 sps:$4 sm:$0xff]   ;;  %v5453_v59 = vpack.c.bf16 %v10854_v45, %v5445_v52  ;;  %v9128_v45 = vld [vmem:[%s11940_s3 + $0x824] ss:$16 sps:$4 sm:$0xff]   ;;  %v9186_v52 = vld [vmem:[%s11940_s3 + $0x960] ss:$16 sps:$4 sm:$0xff]  }
 0x2ff   : > { %5403 = vmatprep.subr.bf16.mxu1 %v9059_v61  ;;  %v4606_v61 = vrot.slane %v4604_v54, 1  ;;  %v9197_v54 = vld [vmem:[%s11940_s3 + $0x98c] ss:$16 sps:$4 sm:$0xff]  }
 0x301   : > { %5318 = vmatpush1.bf16.msra.mxu0 %v9054_v62  ;;  %v9120_v62 = vld [vmem:[%s11940_s3 + $0x800] ss:$16 sps:$4 sm:$0xff]  }
 0x302   : > { %5404 = vmatpush1.bf16.msra.mxu1 %v9057_v63  ;;  %5319 = vmatprep.subr.bf16.mxu0 %v9062_v4  ;;  %v5601_v63 = vrot.slane %v5457_v55, 1  ;;  %v9123_v4 = vld [vmem:[%s11940_s3 + $0x808] ss:$16 sps:$4 sm:$0xff]   ;;  %v9192_v55 = vld [vmem:[%s11940_s3 + $0x980] ss:$16 sps:$4 sm:$0xff]  }
 0x303   : > { %5405 = vmatprep.subr.bf16.mxu1 %v9065_v7  ;;  %v4607_v7 = vsel %vm1526_vm2, %v4602_v58, %v4606_v61  ;;  %v9203_v58 = vld [vmem:[%s11940_s3 + $0x9ac] ss:$16 sps:$4 sm:$0xff]   ;;  %v9206_v61 = vld [vmem:[%s11940_s3 + $0x9c4] ss:$16 sps:$4 sm:$0xff]  }
 0x305   : > { %5320 = vmatpush1.bf16.msra.mxu0 %v9060_v8  ;;  %v5600_v8 = vrot.slane %v5453_v59, 1  ;;  %v9201_v59 = vld [vmem:[%s11940_s3 + $0x9a8] ss:$16 sps:$4 sm:$0xff]  }
 0x306   : > { %5406 = vmatpush1.bf16.msra.mxu1 %v9063_v9  ;;  %5321 = vmatprep.subr.bf16.mxu0 %v9068_v1  ;;  %v9131_v9 = vld [vmem:[%s11940_s3 + $0x82c] ss:$16 sps:$4 sm:$0xff]  }
 0x307   : > { %5407 = vmatprep.subr.bf16.mxu1 %v9071_v10  ;;  %v5602_v1 = vsel %vm2552_vm3, %v5600_v8, %v5601_v63  ;;  %v9126_v10 = vld [vmem:[%s11940_s3 + $0x820] ss:$16 sps:$4 sm:$0xff]   ;;  %v9207_v8 = vld [vmem:[%s11940_s3 + $0x9c8] ss:$16 sps:$4 sm:$0xff]  }
 0x308   : > { %v5448_v63 = vld [vmem:[#allocation2 + $0x40] sm:$0x3] }
 0x309   : > { %5322 = vmatpush1.bf16.msra.mxu0 %v9066_v11  ;;  %v9129_v11 = vld [vmem:[%s11940_s3 + $0x828] ss:$16 sps:$4 sm:$0xff]  }
 0x30a   : > { %5408 = vmatpush1.bf16.msra.mxu1 %v9069_v12  ;;  %5323 = vmatprep.subr.bf16.mxu0 %v9074_v13  ;;  %v9134_v12 = vld [vmem:[%s11940_s3 + $0x844] ss:$16 sps:$4 sm:$0xff]   ;;  %v9137_v13 = vld [vmem:[%s11940_s3 + $0x84c] ss:$16 sps:$4 sm:$0xff]  }
 0x30b   : > { %5409 = vmatprep.subr.bf16.mxu1 %v9077_v15  ;;  %v9132_v15 = vld [vmem:[%s11940_s3 + $0x840] ss:$16 sps:$4 sm:$0xff]  }
 0x30d   : > { %5324 = vmatpush1.bf16.msra.mxu0 %v9072_v16  ;;  %v9135_v16 = vld [vmem:[%s11940_s3 + $0x848] ss:$16 sps:$4 sm:$0xff]  }
 0x30e   : > { %5410 = vmatpush1.bf16.msra.mxu1 %v9075_v17  ;;  %5325 = vmatprep.subr.bf16.mxu0 %v9080_v43  ;;  %v9140_v17 = vld [vmem:[%s11940_s3 + $0x864] ss:$16 sps:$4 sm:$0xff]   ;;  %v9143_v43 = vld [vmem:[%s11940_s3 + $0x86c] ss:$16 sps:$4 sm:$0xff]  }
 0x30f   : > { %5411 = vmatprep.subr.bf16.mxu1 %v9083_v44  ;;  %v9138_v44 = vld [vmem:[%s11940_s3 + $0x860] ss:$16 sps:$4 sm:$0xff]  }
 0x311   : > { %5326 = vmatpush1.bf16.msra.mxu0 %v9078_v18  ;;  %v9141_v18 = vld [vmem:[%s11940_s3 + $0x868] ss:$16 sps:$4 sm:$0xff]  }
 0x312   : > { %5412 = vmatpush1.bf16.msra.mxu1 %v9081_v46  ;;  %5327 = vmatprep.subr.bf16.mxu0 %v9086_v19  ;;  %v9146_v46 = vld [vmem:[%s11940_s3 + $0x884] ss:$16 sps:$4 sm:$0xff]   ;;  %v9149_v19 = vld [vmem:[%s11940_s3 + $0x88c] ss:$16 sps:$4 sm:$0xff]  }
 0x313   : > { %5413 = vmatprep.subr.bf16.mxu1 %v9089_v20  ;;  %v9144_v20 = vld [vmem:[%s11940_s3 + $0x880] ss:$16 sps:$4 sm:$0xff]  }
 0x315   : > { %5328 = vmatpush1.bf16.msra.mxu0 %v9084_v21  ;;  %v9147_v21 = vld [vmem:[%s11940_s3 + $0x888] ss:$16 sps:$4 sm:$0xff]  }
 0x316   : > { %5414 = vmatpush1.bf16.msra.mxu1 %v9087_v22  ;;  %5329 = vmatprep.subr.bf16.mxu0 %v9092_v23  ;;  %v9152_v22 = vld [vmem:[%s11940_s3 + $0x8a4] ss:$16 sps:$4 sm:$0xff]   ;;  %v9155_v23 = vld [vmem:[%s11940_s3 + $0x8ac] ss:$16 sps:$4 sm:$0xff]  }
 0x317   : > { %5415 = vmatprep.subr.bf16.mxu1 %v9095_v24  ;;  %v9150_v24 = vld [vmem:[%s11940_s3 + $0x8a0] ss:$16 sps:$4 sm:$0xff]  }
 0x319   : > { %5330 = vmatpush1.bf16.msra.mxu0 %v9090_v25  ;;  %v9153_v25 = vld [vmem:[%s11940_s3 + $0x8a8] ss:$16 sps:$4 sm:$0xff]  }
 0x31a   : > { %5416 = vmatpush1.bf16.msra.mxu1 %v9093_v26  ;;  %5331 = vmatprep.subr.bf16.mxu0 %v9098_v27  ;;  %v9158_v26 = vld [vmem:[%s11940_s3 + $0x8c4] ss:$16 sps:$4 sm:$0xff]   ;;  %v9161_v27 = vld [vmem:[%s11940_s3 + $0x8cc] ss:$16 sps:$4 sm:$0xff]  }
 0x31b   : > { %5417 = vmatprep.subr.bf16.mxu1 %v9101_v28  ;;  %v9156_v28 = vld [vmem:[%s11940_s3 + $0x8c0] ss:$16 sps:$4 sm:$0xff]  }
 0x31d   : > { %5332 = vmatpush1.bf16.msra.mxu0 %v9096_v30  ;;  %v9159_v30 = vld [vmem:[%s11940_s3 + $0x8c8] ss:$16 sps:$4 sm:$0xff]  }
 0x31e   : > { %5418 = vmatpush1.bf16.msra.mxu1 %v9099_v31  ;;  %5333 = vmatprep.subr.bf16.mxu0 %v9104_v33  ;;  %v9164_v31 = vld [vmem:[%s11940_s3 + $0x8e4] ss:$16 sps:$4 sm:$0xff]   ;;  %v9167_v33 = vld [vmem:[%s11940_s3 + $0x8ec] ss:$16 sps:$4 sm:$0xff]  }
 0x31f   : > { %5419 = vmatprep.subr.bf16.mxu1 %v9107_v34  ;;  %v9165_v34 = vld [vmem:[%s11940_s3 + $0x8e8] ss:$16 sps:$4 sm:$0xff]  }
 0x321   : > { %5334 = vmatpush1.bf16.msra.mxu0 %v9102_v36  ;;  %v9173_v36 = vld [vmem:[%s11940_s3 + $0x90c] ss:$16 sps:$4 sm:$0xff]  }
 0x322   : > { %5420 = vmatpush1.bf16.msra.mxu1 %v9105_v37  ;;  %5335 = vmatprep.subr.bf16.mxu0 %v9110_v38  ;;  %v9168_v37 = vld [vmem:[%s11940_s3 + $0x900] ss:$16 sps:$4 sm:$0xff]   ;;  %v9171_v38 = vld [vmem:[%s11940_s3 + $0x908] ss:$16 sps:$4 sm:$0xff]  }
 0x323   : > { %5421 = vmatprep.subr.bf16.mxu1 %v9113_v40  ;;  %v9179_v40 = vld [vmem:[%s11940_s3 + $0x92c] ss:$16 sps:$4 sm:$0xff]  }
 0x325   : > { %5336 = vmatpush1.bf16.msra.mxu0 %v9108_v42  ;;  %v9177_v42 = vld [vmem:[%s11940_s3 + $0x928] ss:$16 sps:$4 sm:$0xff]  }
 0x326   : > { %5422 = vmatpush1.bf16.msra.mxu1 %v9111_v47  ;;  %5337 = vmatprep.subr.bf16.mxu0 %v9116_v48  ;;  %v9185_v47 = vld [vmem:[%s11940_s3 + $0x94c] ss:$16 sps:$4 sm:$0xff]   ;;  %v9180_v48 = vld [vmem:[%s11940_s3 + $0x940] ss:$16 sps:$4 sm:$0xff]  }
 0x327   : > { %5423 = vmatprep.subr.bf16.mxu1 %v9119_v50  ;;  %v9188_v50 = vld [vmem:[%s11940_s3 + $0x964] ss:$16 sps:$4 sm:$0xff]  }
 0x329   : > { %5338 = vmatpush1.bf16.msra.mxu0 %v9114_v60  ;;  %v9189_v60 = vld [vmem:[%s11940_s3 + $0x968] ss:$16 sps:$4 sm:$0xff]  }
 0x32a   : > { %5424 = vmatpush1.bf16.msra.mxu1 %v9117_v56  ;;  %6253 = vmatprep.subr.bf16.mxu0 %v9122_v57  ;;  %v9195_v56 = vld [vmem:[%s11940_s3 + $0x988] ss:$16 sps:$4 sm:$0xff]   ;;  %v9200_v57 = vld [vmem:[%s11940_s3 + $0x9a4] ss:$16 sps:$4 sm:$0xff]  }
 0x32b   : > { %6339 = vmatprep.subr.bf16.mxu1 %v9125_v32  ;;  %v9198_v32 = vld [vmem:[%s11940_s3 + $0x9a0] ss:$16 sps:$4 sm:$0xff]  }
 0x32c   : > { %5340 = vmatmul.mubr.bf16.vlgmr.msra.gmra.mrb[4].mxu0 %v4607_v7 }
 0x32d   : > { %5426 = vmatmul.mubr.bf16.vlgmr.msra.gmra.mrb[4].mxu1 %v4607_v7  ;;  %6254 = vmatpush1.bf16.msra.mxu0 %v9120_v62  ;;  %v9209_v62 = vld [vmem:[%s11940_s3 + $0x9cc] ss:$16 sps:$4 sm:$0xff]   ;;  %v5444_v7 = vld [vmem:[#allocation2] sm:$0xfc] }
 0x32e   : > { %6285 = vmatprep.mubr.bf16.mxu0 %v5602_v1  ;;  %6340 = vmatpush1.bf16.msra.mxu1 %v9123_v4  ;;  %v9204_v4 = vld [vmem:[%s11940_s3 + $0x9c0] ss:$16 sps:$4 sm:$0xff]  }
 0x32f   : > { %6371 = vmatprep.mubr.bf16.mxu1 %v5602_v1  ;;  %6255 = vmatprep.subr.bf16.mxu0 %v9128_v45  ;;  %v9212_v45 = vld [vmem:[%s11940_s3 + $0x9e4] ss:$16 sps:$4 sm:$0xff]   ;;  %v9215_v1 = vld [vmem:[%s11940_s3 + $0x9ec] ss:$16 sps:$4 sm:$0xff]  }
 0x330   : > { %6341 = vmatprep.subr.bf16.mxu1 %v9131_v9  ;;  %v5451_v9 = vld [vmem:[#allocation2 + $0x58] sm:$0x3] }
 0x331   : > { %6256 = vmatpush1.bf16.msra.mxu0 %v9126_v10  ;;  %v5456_v10 = vpack.c.bf16 %v5448_v63, %v5448_v63  ;;  %v9275_v63 = vld [vmem:[%s11940_s3 + $0xb2c] ss:$16 sps:$4 sm:$0xff]  }
 0x332   : > { %6342 = vmatpush1.bf16.msra.mxu1 %v9129_v11  ;;  %6257 = vmatprep.subr.bf16.mxu0 %v9134_v12  ;;  %v5447_v11 = vld [vmem:[#allocation2 + $0x18] sm:$0xfc]  ;;  %v9210_v12 = vld [vmem:[%s11940_s3 + $0x9e0] ss:$16 sps:$4 sm:$0xff]  }
 0x333   : > { %6343 = vmatprep.subr.bf16.mxu1 %v9137_v13  ;;  %v9330_v13 = vld [vmem:[#allocation2 + $0x20] sm:$0xff] }
 0x335   : > { %6258 = vmatpush1.bf16.msra.mxu0 %v9132_v15  ;;  %v5452_v15 = vpack.c.bf16 %v9330_v13, %v5444_v7  ;;  %v9273_v7 = vld [vmem:[%s11940_s3 + $0xb28] ss:$16 sps:$4 sm:$0xff]  }
 0x336   : > { %6344 = vmatpush1.bf16.msra.mxu1 %v9135_v16  ;;  %6259 = vmatprep.subr.bf16.mxu0 %v9140_v17  ;;  %v5459_v16 = vpack.c.bf16 %v5451_v9, %v5451_v9  ;;  %v9213_v17 = vld [vmem:[%s11940_s3 + $0x9e8] ss:$16 sps:$4 sm:$0xff]   ;;  %v9276_v9 = vld [vmem:[%s11940_s3 + $0xb40] ss:$16 sps:$4 sm:$0xff]  }
 0x337   : > { %6345 = vmatprep.subr.bf16.mxu1 %v9143_v43  ;;  %v9218_v43 = vld [vmem:[%s11940_s3 + $0xa04] ss:$16 sps:$4 sm:$0xff]   ;;  %v9285_v13 = vld [vmem:[%s11940_s3 + $0xb68] ss:$16 sps:$4 sm:$0xff]  }
 0x339   : > { %6260 = vmatpush1.bf16.msra.mxu0 %v9138_v44  ;;  %v5598_v44 = vrot.slane %v5456_v10, 1  ;;  %v9284_v10 = vld [vmem:[%s11940_s3 + $0xb64] ss:$16 sps:$4 sm:$0xff]  }
 0x33a   : > { %6346 = vmatpush1.bf16.msra.mxu1 %v9141_v18  ;;  %6261 = vmatprep.subr.bf16.mxu0 %v9146_v46  ;;  %v9221_v18 = vld [vmem:[%s11940_s3 + $0xa0c] ss:$16 sps:$4 sm:$0xff]  }
 0x33b   : > { %6347 = vmatprep.subr.bf16.mxu1 %v9149_v19  ;;  %v9331_v46 = vld [vmem:[#allocation2 + $0x38] sm:$0xff] }
 0x33c   : > { %v5455_v19 = vpack.c.bf16 %v9331_v46, %v5447_v11  ;;  %v9287_v11 = vld [vmem:[%s11940_s3 + $0xb6c] ss:$16 sps:$4 sm:$0xff]   ;;  %v9294_v46 = vld [vmem:[%s11940_s3 + $0xba0] ss:$16 sps:$4 sm:$0xff]  }
 0x33d   : > { %6262 = vmatpush1.bf16.msra.mxu0 %v9144_v20  ;;  %v5597_v20 = vrot.slane %v5452_v15, 1  ;;  %v9290_v15 = vld [vmem:[%s11940_s3 + $0xb84] ss:$16 sps:$4 sm:$0xff]  }
 0x33e   : > { %6348 = vmatpush1.bf16.msra.mxu1 %v9147_v21  ;;  %6263 = vmatprep.subr.bf16.mxu0 %v9152_v22  ;;  %v9216_v21 = vld [vmem:[%s11940_s3 + $0xa00] ss:$16 sps:$4 sm:$0xff]   ;;  %v5607_v22 = vrot.slane %v5459_v16, 1  ;;  %v9293_v16 = vld [vmem:[%s11940_s3 + $0xb8c] ss:$16 sps:$4 sm:$0xff]  }
 0x33f   : > { %6349 = vmatprep.subr.bf16.mxu1 %v9155_v23  ;;  %v9219_v23 = vld [vmem:[%s11940_s3 + $0xa08] ss:$16 sps:$4 sm:$0xff]  }
 0x341   : > { %6264 = vmatpush1.bf16.msra.mxu0 %v9150_v24  ;;  %v5599_v24 = vsel %vm2552_vm3, %v5597_v20, %v5598_v44  ;;  %v9296_v44 = vld [vmem:[%s11940_s3 + $0xba4] ss:$16 sps:$4 sm:$0xff]  }
 0x342   : > { %6350 = vmatpush1.bf16.msra.mxu1 %v9153_v25  ;;  %6265 = vmatprep.subr.bf16.mxu0 %v9158_v26  ;;  %v5606_v25 = vrot.slane %v5455_v19, 1  ;;  %v9224_v26 = vld [vmem:[%s11940_s3 + $0xa24] ss:$16 sps:$4 sm:$0xff]   ;;  %v9297_v19 = vld [vmem:[%s11940_s3 + $0xba8] ss:$16 sps:$4 sm:$0xff]  }
 0x343   : > { %6351 = vmatprep.subr.bf16.mxu1 %v9161_v27  ;;  %v9227_v27 = vld [vmem:[%s11940_s3 + $0xa2c] ss:$16 sps:$4 sm:$0xff]   ;;  %v9302_v20 = vld [vmem:[%s11940_s3 + $0xbc4] ss:$16 sps:$4 sm:$0xff]  }
 0x345   : > { %6266 = vmatpush1.bf16.msra.mxu0 %v9156_v28  ;;  %v5608_v28 = vsel %vm2552_vm3, %v5606_v25, %v5607_v22  ;;  %v5450_v22 = vld [vmem:[#allocation2 + $0x50] sm:$0x3]  ;;  %v9308_v25 = vld [vmem:[%s11940_s3 + $0xbe4] ss:$16 sps:$4 sm:$0xff]  }
 0x346   : > { %6352 = vmatpush1.bf16.msra.mxu1 %v9159_v30  ;;  %6267 = vmatprep.subr.bf16.mxu0 %v9164_v31  ;;  %v9222_v30 = vld [vmem:[%s11940_s3 + $0xa20] ss:$16 sps:$4 sm:$0xff]   ;;  %v9225_v31 = vld [vmem:[%s11940_s3 + $0xa28] ss:$16 sps:$4 sm:$0xff]  }
 0x347   : > { %6353 = vmatprep.subr.bf16.mxu1 %v9167_v33  ;;  %v9230_v33 = vld [vmem:[%s11940_s3 + $0xa44] ss:$16 sps:$4 sm:$0xff]  }
 0x349   : > { %6268 = vmatpush1.bf16.msra.mxu0 %v9162_v0  ;;  %v9233_v0 = vld [vmem:[%s11940_s3 + $0xa4c] ss:$16 sps:$4 sm:$0xff]  }
 0x34a   : > { %6354 = vmatpush1.bf16.msra.mxu1 %v9165_v34  ;;  %6269 = vmatprep.subr.bf16.mxu0 %v9170_v35  ;;  %v9228_v34 = vld [vmem:[%s11940_s3 + $0xa40] ss:$16 sps:$4 sm:$0xff]   ;;  %v9231_v35 = vld [vmem:[%s11940_s3 + $0xa48] ss:$16 sps:$4 sm:$0xff]  }
 0x34b   : > { %6355 = vmatprep.subr.bf16.mxu1 %v9173_v36  ;;  %v9236_v36 = vld [vmem:[%s11940_s3 + $0xa64] ss:$16 sps:$4 sm:$0xff]  }
 0x34d   : > { %6270 = vmatpush1.bf16.msra.mxu0 %v9168_v37  ;;  %v9239_v37 = vld [vmem:[%s11940_s3 + $0xa6c] ss:$16 sps:$4 sm:$0xff]  }
 0x34e   : > { %6356 = vmatpush1.bf16.msra.mxu1 %v9171_v38  ;;  %6271 = vmatprep.subr.bf16.mxu0 %v9176_v39  ;;  %v9234_v38 = vld [vmem:[%s11940_s3 + $0xa60] ss:$16 sps:$4 sm:$0xff]   ;;  %v9237_v39 = vld [vmem:[%s11940_s3 + $0xa68] ss:$16 sps:$4 sm:$0xff]  }
 0x34f   : > { %6357 = vmatprep.subr.bf16.mxu1 %v9179_v40  ;;  %v9242_v40 = vld [vmem:[%s11940_s3 + $0xa84] ss:$16 sps:$4 sm:$0xff]  }
 0x351   : > { %6272 = vmatpush1.bf16.msra.mxu0 %v9174_v41  ;;  %v9245_v41 = vld [vmem:[%s11940_s3 + $0xa8c] ss:$16 sps:$4 sm:$0xff]  }
 0x352   : > { %6358 = vmatpush1.bf16.msra.mxu1 %v9177_v42  ;;  %6273 = vmatprep.subr.bf16.mxu0 %v9182_v14  ;;  %v9240_v42 = vld [vmem:[%s11940_s3 + $0xa80] ss:$16 sps:$4 sm:$0xff]   ;;  %v9243_v14 = vld [vmem:[%s11940_s3 + $0xa88] ss:$16 sps:$4 sm:$0xff]  }
 0x353   : > { %6359 = vmatprep.subr.bf16.mxu1 %v9185_v47  ;;  %v9248_v47 = vld [vmem:[%s11940_s3 + $0xaa4] ss:$16 sps:$4 sm:$0xff]  }
 0x355   : > { %6274 = vmatpush1.bf16.msra.mxu0 %v9180_v48  ;;  %v9251_v48 = vld [vmem:[%s11940_s3 + $0xaac] ss:$16 sps:$4 sm:$0xff]  }
 0x356   : > { %6360 = vmatpush1.bf16.msra.mxu1 %v9183_v49  ;;  %6275 = vmatprep.subr.bf16.mxu0 %v9188_v50  ;;  %v9246_v49 = vld [vmem:[%s11940_s3 + $0xaa0] ss:$16 sps:$4 sm:$0xff]   ;;  %v9249_v50 = vld [vmem:[%s11940_s3 + $0xaa8] ss:$16 sps:$4 sm:$0xff]  }
 0x357   : > { %6361 = vmatprep.subr.bf16.mxu1 %v9191_v51  ;;  %v9254_v51 = vld [vmem:[%s11940_s3 + $0xac4] ss:$16 sps:$4 sm:$0xff]  }
 0x359   : > { %6276 = vmatpush1.bf16.msra.mxu0 %v9186_v52  ;;  %v9257_v52 = vld [vmem:[%s11940_s3 + $0xacc] ss:$16 sps:$4 sm:$0xff]  }
 0x35a   : > { %6362 = vmatpush1.bf16.msra.mxu1 %v9189_v60  ;;  %6277 = vmatprep.subr.bf16.mxu0 %v9194_v53  ;;  %v9252_v60 = vld [vmem:[%s11940_s3 + $0xac0] ss:$16 sps:$4 sm:$0xff]   ;;  %v9255_v53 = vld [vmem:[%s11940_s3 + $0xac8] ss:$16 sps:$4 sm:$0xff]  }
 0x35b   : > { %6363 = vmatprep.subr.bf16.mxu1 %v9197_v54  ;;  %v9260_v54 = vld [vmem:[%s11940_s3 + $0xae4] ss:$16 sps:$4 sm:$0xff]  }
 0x35d   : > { %6278 = vmatpush1.bf16.msra.mxu0 %v9192_v55  ;;  %v9263_v55 = vld [vmem:[%s11940_s3 + $0xaec] ss:$16 sps:$4 sm:$0xff]  }
 0x35e   : > { %6364 = vmatpush1.bf16.msra.mxu1 %v9195_v56  ;;  %6279 = vmatprep.subr.bf16.mxu0 %v9200_v57  ;;  %v9258_v56 = vld [vmem:[%s11940_s3 + $0xae0] ss:$16 sps:$4 sm:$0xff]   ;;  %v9261_v57 = vld [vmem:[%s11940_s3 + $0xae8] ss:$16 sps:$4 sm:$0xff]  }
 0x35f   : > { %6365 = vmatprep.subr.bf16.mxu1 %v9203_v58  ;;  %v9266_v58 = vld [vmem:[%s11940_s3 + $0xb04] ss:$16 sps:$4 sm:$0xff]  }
 0x361   : > { %6280 = vmatpush1.bf16.msra.mxu0 %v9198_v32  ;;  %v9269_v32 = vld [vmem:[%s11940_s3 + $0xb0c] ss:$16 sps:$4 sm:$0xff]  }
 0x362   : > { %6366 = vmatpush1.bf16.msra.mxu1 %v9201_v59  ;;  %6281 = vmatprep.subr.bf16.mxu0 %v9206_v61  ;;  %v9264_v59 = vld [vmem:[%s11940_s3 + $0xb00] ss:$16 sps:$4 sm:$0xff]   ;;  %v9267_v61 = vld [vmem:[%s11940_s3 + $0xb08] ss:$16 sps:$4 sm:$0xff]  }
 0x363   : > { %6367 = vmatprep.subr.bf16.mxu1 %v9209_v62  ;;  %v9272_v62 = vld [vmem:[%s11940_s3 + $0xb24] ss:$16 sps:$4 sm:$0xff]  }
 0x365   : > { %6282 = vmatpush1.bf16.msra.mxu0 %v9204_v4  ;;  %v9270_v4 = vld [vmem:[%s11940_s3 + $0xb20] ss:$16 sps:$4 sm:$0xff]  }
 0x366   : > { %6368 = vmatpush1.bf16.msra.mxu1 %v9207_v8  ;;  %6283 = vmatprep.subr.bf16.mxu0 %v9212_v45  ;;  %v9278_v8 = vld [vmem:[%s11940_s3 + $0xb44] ss:$16 sps:$4 sm:$0xff]   ;;  %v9281_v45 = vld [vmem:[%s11940_s3 + $0xb4c] ss:$16 sps:$4 sm:$0xff]  }
 0x367   : > { %6369 = vmatprep.subr.bf16.mxu1 %v9215_v1  ;;  %v9279_v1 = vld [vmem:[%s11940_s3 + $0xb48] ss:$16 sps:$4 sm:$0xff]  }
 0x369   : > { %6284 = vmatpush1.bf16.msra.mxu0 %v9210_v12  ;;  %v9282_v12 = vld [vmem:[%s11940_s3 + $0xb60] ss:$16 sps:$4 sm:$0xff]  }
 0x36a   : > { %6370 = vmatpush1.bf16.msra.mxu1 %v9213_v17  ;;  %6296 = vmatprep.subr.bf16.mxu0 %v9218_v43  ;;  %v9288_v17 = vld [vmem:[%s11940_s3 + $0xb80] ss:$16 sps:$4 sm:$0xff]   ;;  %v9291_v43 = vld [vmem:[%s11940_s3 + $0xb88] ss:$16 sps:$4 sm:$0xff]  }
 0x36b   : > { %6382 = vmatprep.subr.bf16.mxu1 %v9221_v18  ;;  %v9299_v18 = vld [vmem:[%s11940_s3 + $0xbac] ss:$16 sps:$4 sm:$0xff]  }
 0x36c   : > { %6286 = vmatmul.mubr.bf16.vlgmr.msra.gmra.mrb[4].mxu0 %v5599_v24 }
 0x36d   : > { %6372 = vmatmul.mubr.bf16.vlgmr.msra.gmra.mrb[4].mxu1 %v5599_v24  ;;  %6297 = vmatpush1.bf16.msra.mxu0 %v9216_v21  ;;  %v9305_v21 = vld [vmem:[%s11940_s3 + $0xbcc] ss:$16 sps:$4 sm:$0xff]   ;;  %v9303_v24 = vld [vmem:[%s11940_s3 + $0xbc8] ss:$16 sps:$4 sm:$0xff]  }
 0x36e   : > { %6328 = vmatprep.mubr.bf16.mxu0 %v5608_v28  ;;  %6383 = vmatpush1.bf16.msra.mxu1 %v9219_v23  ;;  %v9300_v23 = vld [vmem:[%s11940_s3 + $0xbc0] ss:$16 sps:$4 sm:$0xff]  }
 0x36f   : > { %6414 = vmatprep.mubr.bf16.mxu1 %v5608_v28  ;;  %6298 = vmatprep.subr.bf16.mxu0 %v9224_v26  ;;  %v5446_v26 = vld [vmem:[#allocation2 + $0x10] sm:$0xfc] }
 0x370   : > { %6384 = vmatprep.subr.bf16.mxu1 %v9227_v27  ;;  %v9311_v27 = vld [vmem:[%s11940_s3 + $0xbec] ss:$16 sps:$4 sm:$0xff]   ;;  %v5454_v28 = vpack.c.bf16 %v11398_v29, %v5446_v26  ;;  %v3441_v29 = vld [vmem:[%s11941_s4] sm:$0xf] }
 0x371   : > { %6299 = vmatpush1.bf16.msra.mxu0 %v9222_v30  ;;  %v5458_v30 = vpack.c.bf16 %v5450_v22, %v5450_v22 }
 0x372   : > { %6385 = vmatpush1.bf16.msra.mxu1 %v9225_v31  ;;  %6300 = vmatprep.subr.bf16.mxu0 %v9230_v33  ;;  %v9306_v31 = vld [vmem:[%s11940_s3 + $0xbe0] ss:$16 sps:$4 sm:$0xff]   ;;  %v9309_v33 = vld [vmem:[%s11940_s3 + $0xbe8] ss:$16 sps:$4 sm:$0xff]  }
 0x373   : > { %6386 = vmatprep.subr.bf16.mxu1 %v9233_v0  ;;  %v5603_v0 = vrot.slane %v5454_v28, 1 }
 0x375   : > { %6301 = vmatpush1.bf16.msra.mxu0 %v9228_v34  ;;  %v5604_v34 = vrot.slane %v5458_v30, 1 }
 0x376   : > { %6387 = vmatpush1.bf16.msra.mxu1 %v9231_v35  ;;  %6302 = vmatprep.subr.bf16.mxu0 %v9236_v36  ;;  %v3446_v36 = vrot.slane %v3441_v29, %v10830_v2 }
 0x377   : > { %6388 = vmatprep.subr.bf16.mxu1 %v9239_v37  ;;  %v5605_v35 = vsel %vm2552_vm3, %v5603_v0, %v5604_v34 }
 0x379   : > { %6303 = vmatpush1.bf16.msra.mxu0 %v9234_v38  ;;  %v3454_v38 = vrot.slane %v3441_v29, %v10832_v3 }
 0x37a   : > { %6389 = vmatpush1.bf16.msra.mxu1 %v9237_v39  ;;  %6304 = vmatprep.subr.bf16.mxu0 %v9242_v40  ;;  %v3450_v39 = vrot.slane %v3441_v29, %v10837_v5 }
 0x37b   : > { %6390 = vmatprep.subr.bf16.mxu1 %v9245_v41 }
 0x37d   : > { %6305 = vmatpush1.bf16.msra.mxu0 %v9240_v42 }
 0x37e   : > { %6391 = vmatpush1.bf16.msra.mxu1 %v9243_v14  ;;  %6306 = vmatprep.subr.bf16.mxu0 %v9248_v47 }
 0x37f   : > { %6392 = vmatprep.subr.bf16.mxu1 %v9251_v48  ;;  %v3458_v48 = vrot.slane %v3441_v29, %v10839_v6 }
 0x381   : > { %6307 = vmatpush1.bf16.msra.mxu0 %v9246_v49 }
 0x382   : > { %6393 = vmatpush1.bf16.msra.mxu1 %v9249_v50  ;;  %6308 = vmatprep.subr.bf16.mxu0 %v9254_v51 }
 0x383   : > { %6394 = vmatprep.subr.bf16.mxu1 %v9257_v52 }
 0x385   : > { %6309 = vmatpush1.bf16.msra.mxu0 %v9252_v60 }
 0x386   : > { %6395 = vmatpush1.bf16.msra.mxu1 %v9255_v53  ;;  %6310 = vmatprep.subr.bf16.mxu0 %v9260_v54 }
 0x387   : > { %6396 = vmatprep.subr.bf16.mxu1 %v9263_v55 }
 0x389   : > { %6311 = vmatpush1.bf16.msra.mxu0 %v9258_v56 }
 0x38a   : > { %6397 = vmatpush1.bf16.msra.mxu1 %v9261_v57  ;;  %6312 = vmatprep.subr.bf16.mxu0 %v9266_v58 }
 0x38b   : > { %6398 = vmatprep.subr.bf16.mxu1 %v9269_v32 }
 0x38d   : > { %6313 = vmatpush1.bf16.msra.mxu0 %v9264_v59 }
 0x38e   : > { %6399 = vmatpush1.bf16.msra.mxu1 %v9267_v61  ;;  %6314 = vmatprep.subr.bf16.mxu0 %v9272_v62 }
 0x38f   : > { %6400 = vmatprep.subr.bf16.mxu1 %v9275_v63 }
 0x391   : > { %6315 = vmatpush1.bf16.msra.mxu0 %v9270_v4 }
 0x392   : > { %6401 = vmatpush1.bf16.msra.mxu1 %v9273_v7  ;;  %6316 = vmatprep.subr.bf16.mxu0 %v9278_v8 }
 0x393   : > { %6402 = vmatprep.subr.bf16.mxu1 %v9281_v45 }
 0x395   : > { %6317 = vmatpush1.bf16.msra.mxu0 %v9276_v9 }
 0x396   : > { %6403 = vmatpush1.bf16.msra.mxu1 %v9279_v1  ;;  %6318 = vmatprep.subr.bf16.mxu0 %v9284_v10 }
 0x397   : > { %6404 = vmatprep.subr.bf16.mxu1 %v9287_v11 }
 0x399   : > { %6319 = vmatpush1.bf16.msra.mxu0 %v9282_v12 }
 0x39a   : > { %6405 = vmatpush1.bf16.msra.mxu1 %v9285_v13  ;;  %6320 = vmatprep.subr.bf16.mxu0 %v9290_v15 }
 0x39b   : > { %6406 = vmatprep.subr.bf16.mxu1 %v9293_v16 }
 0x39d   : > { %6321 = vmatpush1.bf16.msra.mxu0 %v9288_v17 }
 0x39e   : > { %6407 = vmatpush1.bf16.msra.mxu1 %v9291_v43  ;;  %6322 = vmatprep.subr.bf16.mxu0 %v9296_v44 }
 0x39f   : > { %6408 = vmatprep.subr.bf16.mxu1 %v9299_v18 }
 0x3a1   : > { %6323 = vmatpush1.bf16.msra.mxu0 %v9294_v46 }
 0x3a2   : > { %6409 = vmatpush1.bf16.msra.mxu1 %v9297_v19  ;;  %6324 = vmatprep.subr.bf16.mxu0 %v9302_v20 }
 0x3a3   : > { %6410 = vmatprep.subr.bf16.mxu1 %v9305_v21 }
 0x3a5   : > { %6325 = vmatpush1.bf16.msra.mxu0 %v9300_v23 }
 0x3a6   : > { %6411 = vmatpush1.bf16.msra.mxu1 %v9303_v24  ;;  %6326 = vmatprep.subr.bf16.mxu0 %v9308_v25 }
 0x3a7   : > { %6412 = vmatprep.subr.bf16.mxu1 %v9311_v27 }
 0x3a9   : > { %6327 = vmatpush1.bf16.msra.mxu0 %v9306_v31 }
 0x3aa   : > { %6413 = vmatpush1.bf16.msra.mxu1 %v9309_v33 }
 0x3ac   : > { %6329 = vmatmul.mubr.bf16.vlgmr.msra.gmra.mrb[4].mxu0 %v5605_v35 }
 0x3ad   : > { %6415 = vmatmul.mubr.bf16.vlgmr.msra.gmra.mrb[4].mxu1 %v5605_v35 }
 0x47f   : > { %v6330_v37 = vpop.f32.mrb[4].mxu0 }
 0x480   : > { %v6416_v40 = vpop.f32.mrb[4].mxu1  ;;  %v6332_v41 = vpop.f32.mrb[5].mxu0  ;;  %v11840_v47 = vadd.f32 %v6330_v37, %v3446_v36 }
 0x481   : > { %v6418_v42 = vpop.f32.mrb[5].mxu1  ;;  %v6334_v14 = vpop.f32.mrb[6].mxu0  ;;  %v11845_v52 = vadd.f32 %v6416_v40, %v3454_v38  ;;  %v11847_v60 = vadd.f32 %v6332_v41, %v3450_v39 }
 0x482   : > { %v11843_v49 = vadd.f32 %v6334_v14, %v3446_v36  ;;  %v6420_v50 = vpop.f32.mrb[6].mxu1  ;;  %v6336_v51 = vpop.f32.mrb[7].mxu0  ;;  %v11861_v59 = vadd.f32 %v6418_v42, %v3458_v48 }
 0x483   : > { %v11849_v53 = vadd.f32 %v6420_v50, %v3454_v38  ;;  %v11851_v54 = vadd.f32 %v6336_v51, %v3450_v39  ;;  %v6422_v55 = vpop.f32.mrb[7].mxu1 }
 0x484   : > { %v6433_v56 = vadd.f32 %v11843_v49, %v11840_v47  ;;  %v11855_v57 = vadd.f32 %v6422_v55, %v3458_v48 }
 0x485   : > { %v6447_v58 = vadd.f32 %v11849_v53, %v11845_v52  ;;  %v6440_v32 = vadd.f32 %v11851_v54, %v11847_v60 }
 0x486   : > { %v6434_v61 = vrot.slane %v6433_v56, 4  ;;  %v6454_v7 = vadd.f32 %v11855_v57, %v11861_v59 }
 0x487   : > { %v6441_v62 = vrot.slane %v6440_v32, 4  ;;  %v6448_v4 = vrot.slane %v6447_v58, 4 }
 0x488   : > { %v6435_v63 = vadd.f32 %v6434_v61, %v6433_v56  ;;  %v6455_v11 = vrot.slane %v6454_v7, 4 }
 0x489   : > { %v6442_v8 = vadd.f32 %v6441_v62, %v6440_v32  ;;  %v6449_v10 = vadd.f32 %v6448_v4, %v6447_v58  ;;  %v6537_v4 = vld [vmem:[%s11942_s5] sm:$0xff] }
 0x48a   : > { %v6436_v45 = vrot.slane %v6435_v63, 2  ;;  %v6456_v17 = vadd.f32 %v6455_v11, %v6454_v7 }
 0x48b   : > { %v6443_v9 = vrot.slane %v6442_v8, 2  ;;  %v6450_v15 = vrot.slane %v6449_v10, 2 }
 0x48c   : > { %v6437_v1 = vadd.f32 %v6436_v45, %v6435_v63  ;;  %v6457_v18 = vrot.slane %v6456_v17, 2  ;;  %v6538_v63 = vld [vmem:[%s11942_s5 + $0x8] sm:$0xff] }
 0x48d   : > { %v6444_v12 = vadd.f32 %v6443_v9, %v6442_v8  ;;  %v6451_v44 = vadd.f32 %v6450_v15, %v6449_v10  ;;  %v6539_v10 = vld [vmem:[%s11942_s5 + $0x10] sm:$0xff] }
 0x48e   : > { %v6438_v13 = vrot.slane %v6437_v1, 1  ;;  %v6458_v20 = vadd.f32 %v6457_v18, %v6456_v17 }
 0x48f   : > { %v6445_v16 = vrot.slane %v6444_v12, 1  ;;  %v6452_v19 = vrot.slane %v6451_v44, 1 }
 0x490   : > { %v6439_v43 = vadd.f32 %v6438_v13, %v6437_v1  ;;  %v6459_v21 = vrot.slane %v6458_v20, 1  ;;  %v6540_v1 = vld [vmem:[%s11942_s5 + $0x18] sm:$0xff] }
 0x491   : > { %v6446_v46 = vadd.f32 %v6445_v16, %v6444_v12  ;;  %v6453_v22 = vadd.f32 %v6452_v19, %v6451_v44 }
 0x492   : > { %6471 = vrot.lane.b32.xlu1 %v6439_v43, %s9349_s15  ;;  %6463 = vrot.lane.b32.xlu0 %v6439_v43, %s9350_s16  ;;  %v6460_v23 = vadd.f32 %v6459_v21, %v6458_v20 }
 0x496   : > { %6467 = vrot.lane.b32.xlu0 %v6439_v43, %s9351_s18  ;;  %6477 = vrot.lane.b32.xlu1 %v6446_v46, %s9350_s16 }
 0x49a   : > { %6481 = vrot.lane.b32.xlu0 %v6446_v46, %s9351_s18  ;;  %6485 = vrot.lane.b32.xlu1 %v6446_v46, %s9349_s15 }
 0x49e   : > { %6491 = vrot.lane.b32.xlu0 %v6453_v22, %s9350_s16  ;;  %6495 = vrot.lane.b32.xlu1 %v6453_v22, %s9351_s18 }
 0x4a2   : > { %6499 = vrot.lane.b32.xlu0 %v6453_v22, %s9349_s15  ;;  %6505 = vrot.lane.b32.xlu1 %v6460_v23, %s9350_s16 }
 0x4a6   : > { %6509 = vrot.lane.b32.xlu0 %v6460_v23, %s9351_s18  ;;  %6513 = vrot.lane.b32.xlu1 %v6460_v23, %s9349_s15 }
 0x504   : > { %v6472_v24 = vpop.permute.xlu1 %6471  ;;  %v6464_v25 = vpop.permute.xlu0 %6463 }
 0x505   : > { %v6466_v26 = vadd.f32 %v6464_v25, %v6439_v43  ;;  %v6559_v25 = vld [vmem:[%s11943_s6] sm:$0x1] }
 0x508   : > { %v6468_v27 = vpop.permute.xlu0 %6467  ;;  %v6478_v30 = vpop.permute.xlu1 %6477 }
 0x509   : > { %v6470_v28 = vadd.f32 %v6468_v27, %v6466_v26 }
 0x50b   : > { %v6474_v31 = vadd.f32 %v6472_v24, %v6470_v28 }
 0x50c   : > { %v6482_v0 = vpop.permute.xlu0 %6481  ;;  %v6486_v35 = vpop.permute.xlu1 %6485 }
 0x50d   : > { %v6475_v33 = vadd.f32 %v6474_v31, %v6446_v46  ;;  %v6569_v31 = vld [vmem:[%s11944_s7] sm:$0xff] }
 0x50f   : > { %v6480_v34 = vadd.f32 %v6478_v30, %v6475_v33  ;;  %v6570_v33 = vld [vmem:[%s11944_s7 + $0x8] sm:$0xff] }
 0x510   : > { %v6492_v37 = vpop.permute.xlu0 %6491  ;;  %v6496_v39 = vpop.permute.xlu1 %6495 }
 0x511   : > { %v6484_v29 = vadd.f32 %v6482_v0, %v6480_v34  ;;  %v6573_v0 = vcombine.high %v6569_v31, %v6569_v31  ;;  %v6574_v34 = vcombine.high %v6570_v33, %v6570_v33 }
 0x513   : > { %v6488_v36 = vadd.f32 %v6486_v35, %v6484_v29 }
 0x514   : > { %v6500_v42 = vpop.permute.xlu0 %6499  ;;  %v6506_v48 = vpop.permute.xlu1 %6505 }
 0x515   : > { %v6489_v38 = vadd.f32 %v6488_v36, %v6453_v22 }
 0x517   : > { %v6494_v40 = vadd.f32 %v6492_v37, %v6489_v38 }
 0x518   : > { %v6510_v55 = vpop.permute.xlu0 %6509  ;;  %v6514_v58 = vpop.permute.xlu1 %6513 }
 0x519   : > { %v6498_v41 = vadd.f32 %v6496_v39, %v6494_v40 }
 0x51b   : > { %v6502_v14 = vadd.f32 %v6500_v42, %v6498_v41 }
 0x51d   : > { %v6503_v50 = vadd.f32 %v6502_v14, %v6460_v23 }
 0x51f   : > { %v6508_v51 = vadd.f32 %v6506_v48, %v6503_v50 }
 0x521   : > { %v6512_v56 = vadd.f32 %v6510_v55, %v6508_v51 }
 0x523   : > { %v6516_v32 = vadd.f32 %v6514_v58, %v6512_v56 }
 0x525   : > { %v6517_v61 = vmul.f32 0.00390625, %v6516_v32 }
 0x527   : > { %v6521_v62 = vrot.slane %v6517_v61, %v10830_v2  ;;  %v6610_v61 = vld [vmem:[%s11945_s8] sm:$0xf] }
 0x529   : > { %6527 = vbcast.lane.b32.xlu1 %v6521_v62, 264  ;;  %6523 = vbcast.lane.b32.xlu0 %v6521_v62, 256 }
 0x52d   : > { %6535 = vbcast.lane.b32.xlu1 %v6521_v62, 280  ;;  %6531 = vbcast.lane.b32.xlu0 %v6521_v62, 272 }
 0x59b   : > { %v6528_v7 = vpop.permute.xlu1 %6527  ;;  %v6524_v8 = vpop.permute.xlu0 %6523 }
 0x59c   : > { %v6542_v45 = vmul.f32 %v6538_v63, %v6528_v7  ;;  %v6541_v9 = vmul.f32 %v6537_v4, %v6524_v8 }
 0x59e   : > { %v6547_v11 = vsel %vm6545_vm4, %v6542_v45, 0.0  ;;  %v6546_v12 = vsel %vm6545_vm4, %v6541_v9, 0.0 }
 0x59f   : > { %v6536_v13 = vpop.permute.xlu1 %6535  ;;  %v6532_v15 = vpop.permute.xlu0 %6531  ;;  %v6548_v43 = vadd.f32 %v6547_v11, %v6546_v12  ;;  %v6619_v11 = vrot.slane %v6610_v61, %v10837_v5  ;;  %v6627_v12 = vrot.slane %v6610_v61, %v10839_v6 }
 0x5a0   : > { %v6544_v16 = vmul.f32 %v6540_v1, %v6536_v13  ;;  %v6543_v17 = vmul.f32 %v6539_v10, %v6532_v15  ;;  %v6623_v10 = vrot.slane %v6610_v61, %v10832_v3  ;;  %v6615_v13 = vrot.slane %v6610_v61, %v10830_v2 }
 0x5a2   : > { %v6549_v44 = vsel %vm6545_vm4, %v6543_v17, 0.0  ;;  %v6551_v46 = vsel %vm6545_vm4, %v6544_v16, 0.0 }
 0x5a3   : > { %v6550_v18 = vadd.f32 %v6549_v44, %v6548_v43 }
 0x5a5   : > { %v6552_v19 = vadd.f32 %v6551_v46, %v6550_v18 }
 0x5a7   : > { %v6553_v20 = vrot.slane %v6552_v19, 4 }
 0x5a9   : > { %v6554_v21 = vadd.f32 %v6553_v20, %v6552_v19 }
 0x5ab   : > { %v6555_v22 = vrot.slane %v6554_v21, 2 }
 0x5ad   : > { %v6556_v23 = vadd.f32 %v6555_v22, %v6554_v21 }
 0x5af   : > { %v6557_v24 = vrot.slane %v6556_v23, 1 }
 0x5b1   : > { %v6558_v26 = vadd.f32 %v6557_v24, %v6556_v23 }
 0x5b3   : > { %v6560_v27 = vadd.f32 %v6559_v25, %v6558_v26 }
 0x5b5   : > { %v6561_v28 = vmax.f32 %v6560_v27, 0.0 }
 0x5b7   : > { %v6565_v30 = vrot.slane %v6561_v28, %v10830_v2 }
 0x5b9   : > { %6567 = vbcast.lane.b32.xlu0 %v6565_v30, 256 }
 0x62b   : > { %v6568_v35 = vpop.permute.xlu0 %6567 }
 0x62c   : > { %v6577_v29 = vmul.f32 %v6569_v31, %v6568_v35  ;;  %v6578_v36 = vmul.f32 %v6573_v0, %v6568_v35  ;;  %v6579_v37 = vmul.f32 %v6570_v33, %v6568_v35  ;;  %v6580_v38 = vmul.f32 %v6574_v34, %v6568_v35 }
 0x62e   : > { %v6582_v39 = vsel %vm6581_vm5, %v6577_v29, 0.0  ;;  %v6589_v40 = vsel %vm6581_vm5, %v6578_v36, 0.0  ;;  %v6596_v41 = vsel %vm6581_vm5, %v6579_v37, 0.0  ;;  %v6603_v42 = vsel %vm6581_vm5, %v6580_v38, 0.0 }
 0x62f   : > { %v6583_v14 = vrot.slane %v6582_v39, 4  ;;  %v6590_v48 = vrot.slane %v6589_v40, 4  ;;  %v6597_v50 = vrot.slane %v6596_v41, 4  ;;  %v6604_v51 = vrot.slane %v6603_v42, 4 }
 0x631   : > { %v6584_v55 = vadd.f32 %v6583_v14, %v6582_v39  ;;  %v6591_v56 = vadd.f32 %v6590_v48, %v6589_v40  ;;  %v6598_v58 = vadd.f32 %v6597_v50, %v6596_v41  ;;  %v6605_v32 = vadd.f32 %v6604_v51, %v6603_v42 }
 0x633   : > { %v6585_v62 = vrot.slane %v6584_v55, 2  ;;  %v6592_v63 = vrot.slane %v6591_v56, 2  ;;  %v6599_v4 = vrot.slane %v6598_v58, 2  ;;  %v6606_v7 = vrot.slane %v6605_v32, 2 }
 0x635   : > { %v6586_v8 = vadd.f32 %v6585_v62, %v6584_v55  ;;  %v6593_v45 = vadd.f32 %v6592_v63, %v6591_v56  ;;  %v6600_v9 = vadd.f32 %v6599_v4, %v6598_v58  ;;  %v6607_v1 = vadd.f32 %v6606_v7, %v6605_v32  ;;  %v9333_v55 = vld [vmem:[%s9555_s26 + $0x20] sm:$0xff]  ;;  %v9336_v32 = vld [vmem:[%s9555_s26 + $0x10] sm:$0xff]  ;;  %v9338_v4 = vld [vmem:[%s9555_s26 + $0x18] sm:$0xff] }
 0x636   : > { %v9337_v62 = vld [vmem:[%s9555_s26 + $0x30] sm:$0xff]  ;;  %v9339_v7 = vld [vmem:[%s9555_s26 + $0x38] sm:$0xff] }
 0x637   : > { %v6587_v15 = vrot.slane %v6586_v8, 1  ;;  %v6594_v16 = vrot.slane %v6593_v45, 1  ;;  %v6601_v17 = vrot.slane %v6600_v9, 1  ;;  %v6608_v43 = vrot.slane %v6607_v1, 1 }
 0x639   : > { %v6588_v44 = vadd.f32 %v6587_v15, %v6586_v8  ;;  %v6595_v18 = vadd.f32 %v6594_v16, %v6593_v45  ;;  %v6602_v46 = vadd.f32 %v6601_v17, %v6600_v9  ;;  %v6609_v19 = vadd.f32 %v6608_v43, %v6607_v1 }
 0x63b   : > { %v6632_v20 = vadd.f32 %v6615_v13, %v6588_v44  ;;  %v6633_v21 = vadd.f32 %v6619_v11, %v6595_v18  ;;  %v6634_v22 = vadd.f32 %v6623_v10, %v6602_v46  ;;  %v6635_v23 = vadd.f32 %v6627_v12, %v6609_v19 }
 0x63d   : > { %v8044_v24 = vmul.f32 -1.442695, %v6632_v20  ;;  %v8045_v3 = vmul.f32 -1.442695, %v6633_v21  ;;  %v8046_v25 = vmul.f32 -1.442695, %v6634_v22 }
 0x63e   : > { %v8047_v5 = vmul.f32 -1.442695, %v6635_v23 }
 0x63f   : > { %9314 = vpow2.f32 %v8044_v24 }
 0x640   : > { %9316 = vpow2.f32 %v8045_v3 }
 0x641   : > { %9318 = vpow2.f32 %v8046_v25 }
 0x642   : > { %9320 = vpow2.f32 %v8047_v5 }
 0x649   : > { %v9315_v6 = vpop.eup %9314 }
 0x64a   : > { %v9317_v26 = vpop.eup %9316  ;;  %v6648_v27 = vadd.f32 1.0, %v9315_v6 }
 0x64b   : > { %v9319_v28 = vpop.eup %9318  ;;  %v6649_v30 = vadd.f32 1.0, %v9317_v26 }
 0x64c   : > { %v9321_v31 = vpop.eup %9320  ;;  %v6650_v33 = vadd.f32 1.0, %v9319_v28  ;;  %9322 = vrcp.f32 %v6648_v27 }
 0x64d   : > { %v6651_v0 = vadd.f32 1.0, %v9321_v31  ;;  %9324 = vrcp.f32 %v6649_v30 }
 0x64e   : > { %9326 = vrcp.f32 %v6650_v33 }
 0x64f   : > { %9328 = vrcp.f32 %v6651_v0 }
 0x656   : > { %v9323_v34 = vpop.eup %9322 }
 0x657   : > { %v9325_v35 = vpop.eup %9324  ;;  %v6663_v29 = vrot.slane %v9323_v34, %v10830_v2 }
 0x658   : > { %v9327_v36 = vpop.eup %9326  ;;  %v6667_v37 = vrot.slane %v9325_v35, %v10830_v2 }
 0x659   : > { %v9329_v38 = vpop.eup %9328  ;;  %v6671_v39 = vrot.slane %v9327_v36, %v10830_v2  ;;  %v6676_v40 = vmul.f32 %v11840_v47, %v6663_v29  ;;  %v6680_v41 = vmul.f32 %v11843_v49, %v6663_v29  ;;  %v9332_v49 = vld [vmem:[%s9555_s26] sm:$0xff] }
 0x65a   : > { %v6675_v42 = vrot.slane %v9329_v38, %v10830_v2  ;;  %v6677_v14 = vmul.f32 %v11847_v60, %v6667_v37  ;;  %v6681_v48 = vmul.f32 %v11851_v54, %v6667_v37  ;;  %v9334_v60 = vld [vmem:[%s9555_s26 + $0x8] sm:$0xff] }
 0x65b   : > { %v6678_v50 = vmul.f32 %v11845_v52, %v6671_v39  ;;  %v6682_v47 = vmul.f32 %v11849_v53, %v6671_v39  ;;  %v6684_v51 = vadd.f32 %v9332_v49, %v6676_v40  ;;  %v6688_v56 = vadd.f32 %v9333_v55, %v6680_v41  ;;  %v9335_v52 = vld [vmem:[%s9555_s26 + $0x28] sm:$0xff] }
 0x65c   : > { %v6679_v58 = vmul.f32 %v11861_v59, %v6675_v42  ;;  %v6683_v2 = vmul.f32 %v11855_v57, %v6675_v42  ;;  %v6685_v54 = vadd.f32 %v9334_v60, %v6677_v14  ;;  %v6689_v53 = vadd.f32 %v9335_v52, %v6681_v48 }
 0x65d   : > { %v6686_v61 = vadd.f32 %v9336_v32, %v6678_v50  ;;  %v6690_v63 = vadd.f32 %v9337_v62, %v6682_v47  ;;  %6692 = vst [vmem:[%s11909_s20] sm:$0xff] %v6684_v51  ;;  %6696 = vst [vmem:[%s11909_s20 + $0x20] sm:$0xff] %v6688_v56 }
 0x65e   : > { %v6687_v59 = vadd.f32 %v9338_v4, %v6679_v58  ;;  %v6691_v8 = vadd.f32 %v9339_v7, %v6683_v2  ;;  %6693 = vst [vmem:[%s11909_s20 + $0x8] sm:$0xff] %v6685_v54  ;;  %6697 = vst [vmem:[%s11909_s20 + $0x28] sm:$0xff] %v6689_v53 }
 0x65f   : > { %6694 = vst [vmem:[%s11909_s20 + $0x10] sm:$0xff] %v6686_v61  ;;  %6698 = vst [vmem:[%s11909_s20 + $0x30] sm:$0xff] %v6690_v63 }
 0x660   : > { %6695 = vst [vmem:[%s11909_s20 + $0x18] sm:$0xff] %v6687_v59  ;;  %6699 = vst [vmem:[%s11909_s20 + $0x38] sm:$0xff] %v6691_v8 }
 0x661 PF: > { %s19_s30 = sadd.s32 1, %s9346_s30  }
 0x662   : > { %p16_p4 = scmp.ge.s32.totalorder %s19_s30, 4  }
 0x664   :  { %18 = sbr.rel (!%p16_p4) target bundleno = 1 (0x1), region = 91 }

</bundles_post_ra>
